<compile_context>
chip_gen: v7x
topology: tpu7x:2x2x1
jax: 0.10.0
libtpu: 0.0.40
codegen_flags: <defaults>
</compile_context>

<pallas_src>
import functools
import math

import jax
import jax.numpy as jnp
from jax import lax
from jax.experimental import pallas as pl
from jax.experimental.pallas import tpu as pltpu

# ---------------- config (small shapes consistent with the module) ----------
IN_CHANNELS = 3
EMBED_DIM   = 64          # stands in for 768 of the frozen Meta-Transformer blocks
DEPTH       = 2           # stands in for 12
NUM_HEADS   = 4           # stands in for 12
HEAD_DIM    = EMBED_DIM // NUM_HEADS
MLP_HIDDEN  = EMBED_DIM * 4
NUM_GROUPS  = 8           # embed_args.num_groups
GROUP_SIZE  = 8           # embed_args.group_size
PE_HIDDEN   = 32          # patch-embed hidden width
PE_OUT      = 32          # patch_embed.out_channels != embed_dim -> self.proj is a Linear
POS_HIDDEN  = 128         # pos_embed = Linear(3,128)+GELU, Linear(128, embed_dim)
NUM_TOKENS  = NUM_GROUPS + 1
T_PAD       = 16          # tokens padded to a sublane-aligned count per sample
LN_EPS_BLK  = 1e-5        # timm Block nn.LayerNorm default
LN_EPS_OUT  = 1e-6        # norm_args eps
TILE_B      = 16          # point clouds per grid step (16*16 = 256 token rows)
ATT_CHUNK_MAX = 8         # attention processes 8 samples (128 rows) at a time

assert T_PAD & (T_PAD - 1) == 0           # power of two (shift/mask mask math)
_T_SHIFT = T_PAD.bit_length() - 1


# ---------------- in-kernel helpers ----------------
def _gelu(x):
    # TODO(synk): nn.GELU is exact erf-GELU; tanh approximation used here
    # (erf lowering availability on Mosaic varies).
    c = math.sqrt(2.0 / math.pi)
    return 0.5 * x * (1.0 + jnp.tanh(c * (x + 0.044715 * x * x * x)))


def _layernorm(x, g, b, eps):
    mu = jnp.mean(x, axis=-1, keepdims=True)
    xc = x - mu
    var = jnp.mean(xc * xc, axis=-1, keepdims=True)
    return xc * jax.lax.rsqrt(var + eps) * g + b


def _linear3_fma(x3, w, b):
    """x3:(R,3) @ w:(3,H) + b on the VPU (contraction depth 3 -> 3 broadcast FMAs)."""
    return (x3[:, 0:1] * w[0:1, :] + x3[:, 1:2] * w[1:2, :]
            + x3[:, 2:3] * w[2:3, :] + b)


# ---------------- the kernel ----------------
def meta_transformer_kernel(
    feat_ref, center_ref,
    pe_w1_ref, pe_b1_ref, pe_w2_ref, pe_b2_ref,
    proj_w_ref, proj_b_ref,
    cls_tok_ref, cls_pos_ref,
    pos_w1_ref, pos_b1_ref, pos_w2_ref, pos_b2_ref,
    ln1_g_ref, ln1_b_ref, qkv_w_ref, qkv_b_ref,
    atp_w_ref, atp_b_ref,
    ln2_g_ref, ln2_b_ref, fc1_w_ref, fc1_b_ref, fc2_w_ref, fc2_b_ref,
    nf_g_ref, nf_b_ref,
    out_ref,
    *, tile_b,
):
    f32, bf16 = jnp.float32, jnp.bfloat16
    G, K, D, H = NUM_GROUPS, GROUP_SIZE, EMBED_DIM, NUM_HEADS
    TB = tile_b
    TBG = TB * G                                   # group-token rows in this tile
    ROWS = TB * T_PAD                              # transformer rows in this tile
    att_chunk = math.gcd(TB, ATT_CHUNK_MAX)        # samples per attention chunk
    n_chunks = TB // att_chunk
    RQ = att_chunk * T_PAD                         # rows per attention chunk (<= 128)

    # ---- patch embed: shared pointwise MLP over grouped neighbor feats, max over K ----
    # TODO(synk): instance-norm ('in2d') inside the original PointPatchEmbed is omitted.
    # Merged over all K neighbors: weight-row broadcasts emitted once, single big matmul.
    fk = feat_ref[...].reshape(K * TBG, IN_CHANNELS)                        # (K*TBG, 3)
    h = _gelu(_linear3_fma(fk, pe_w1_ref[...], pe_b1_ref[...]))             # (K*TBG, PE_HIDDEN)
    z = jnp.dot(h.astype(bf16), pe_w2_ref[...],
                preferred_element_type=f32) + pe_b2_ref[...]                # (K*TBG, PE_OUT)
    z = z.reshape(K, TBG, PE_OUT)
    xg = z[0]
    for kk in range(1, K):                                                  # max over K
        xg = jnp.maximum(xg, z[kk])                                         # (TBG, PE_OUT)

    # ---- self.proj: Linear(PE_OUT -> D) ----
    xg = jnp.dot(xg.astype(bf16), proj_w_ref[...],
                 preferred_element_type=f32) + proj_b_ref[...]              # (TBG, D)

    # ---- pos_embed MLP on group centers (Linear(3,128)+GELU, Linear(128,D)) ----
    pe = _gelu(_linear3_fma(center_ref[...], pos_w1_ref[...], pos_b1_ref[...]))
    pe = jnp.dot(pe.astype(bf16), pos_w2_ref[...],
                 preferred_element_type=f32) + pos_b2_ref[...]              # (TBG, D)

    # ---- token layout (8-sublane aligned slabs per sample):
    #      row 0 = cls, rows 1..7 = pad, rows 8..15 = group tokens
    pad7 = jnp.zeros((T_PAD - 1 - G, D), f32)
    cls_slab = jnp.concatenate([cls_tok_ref[...], pad7], axis=0)            # (8, D)
    pos_slab = jnp.concatenate([cls_pos_ref[...], pad7], axis=0)            # (8, D)
    x = jnp.concatenate(
        [jnp.broadcast_to(cls_slab[None], (TB, T_PAD - G, D)),
         xg.reshape(TB, G, D)], axis=1).reshape(ROWS, D)                    # (ROWS, D)
    pos = jnp.concatenate(
        [jnp.broadcast_to(pos_slab[None], (TB, T_PAD - G, D)),
         pe.reshape(TB, G, D)], axis=1).reshape(ROWS, D)

    # ---- block-diagonal sample mask fused with key-pad mask (shared by layers/heads) ----
    ri = lax.broadcasted_iota(jnp.int32, (RQ, RQ), 0)
    ci = lax.broadcasted_iota(jnp.int32, (RQ, RQ), 1)
    same_sample = (ri >> _T_SHIFT) == (ci >> _T_SHIFT)
    col_t = ci & (T_PAD - 1)
    col_valid = (col_t == 0) | (col_t >= T_PAD - G)    # valid keys: cls + group rows
    attn_mask = jnp.where(same_sample & col_valid, 0.0, -1e30).astype(f32)

    scale = 1.0 / math.sqrt(HEAD_DIM)
    for l in range(DEPTH):                                                  # static unroll
        y = x + pos                                                         # add_pos_each_block=True
        # --- attention: x + attn(LN1(x)); per-head, batched over all samples in chunk ---
        yn = _layernorm(y, ln1_g_ref[l:l + 1, :], ln1_b_ref[l:l + 1, :], LN_EPS_BLK)
        qkv = jnp.dot(yn.astype(bf16), qkv_w_ref[l],
                      preferred_element_type=f32) + qkv_b_ref[l:l + 1, :]   # (ROWS, 3D)
        atp_w_l = atp_w_ref[l]                                              # (D, D) bf16
        ao_chunks = []
        for c in range(n_chunks):
            r0 = c * RQ
            qkv_c = qkv[r0:r0 + RQ, :].astype(bf16)                         # (RQ, 3D)
            ao_c = None
            for hh in range(H):
                lo = hh * HEAD_DIM
                qh = qkv_c[:, lo:lo + HEAD_DIM]
                kh = qkv_c[:, D + lo:D + lo + HEAD_DIM]
                vh = qkv_c[:, 2 * D + lo:2 * D + lo + HEAD_DIM]
                s = lax.dot_general(qh, kh, (((1,), (1,)), ((), ())),
                                    preferred_element_type=f32) * scale + attn_mask
                s = s - jnp.max(s, axis=-1, keepdims=True)
                p = jnp.exp(s)
                p = p * pl.reciprocal(jnp.sum(p, axis=-1, keepdims=True), approx=True)
                oh = jnp.dot(p.astype(bf16), vh, preferred_element_type=f32)  # (RQ, HD)
                # head-concat fused into the attention projection
                pr = jnp.dot(oh.astype(bf16), atp_w_l[lo:lo + HEAD_DIM, :],
                             preferred_element_type=f32)                     # (RQ, D)
                ao_c = pr if ao_c is None else ao_c + pr
            ao_chunks.append(ao_c)
        ao = ao_chunks[0] if n_chunks == 1 else jnp.concatenate(ao_chunks, axis=0)
        y = y + ao + atp_b_ref[l:l + 1, :]
        # --- mlp: x + MLP(LN2(x)) ---
        yn = _layernorm(y, ln2_g_ref[l:l + 1, :], ln2_b_ref[l:l + 1, :], LN_EPS_BLK)
        hm = _gelu(jnp.dot(yn.astype(bf16), fc1_w_ref[l],
                           preferred_element_type=f32) + fc1_b_ref[l:l + 1, :])
        hm = jnp.dot(hm.astype(bf16), fc2_w_ref[l],
                     preferred_element_type=f32) + fc2_b_ref[l:l + 1, :]
        x = y + hm

    # ---- final self.norm (LayerNorm, eps=1e-6) ----
    out_ref[...] = _layernorm(x, nf_g_ref[...], nf_b_ref[...], LN_EPS_OUT)


# ---------------- wrapper ----------------
PARAM_ORDER = [
    "pe_w1", "pe_b1", "pe_w2", "pe_b2",
    "proj_w", "proj_b",
    "cls_token", "cls_pos",
    "pos_w1", "pos_b1", "pos_w2", "pos_b2",
    "ln1_g", "ln1_b", "qkv_w", "qkv_b",
    "atp_w", "atp_b",
    "ln2_g", "ln2_b", "fc1_w", "fc1_b", "fc2_w", "fc2_b",
    "nf_g", "nf_b",
]


def _full_spec(a):
    # Constant block index: weight stays VMEM-resident, no re-DMA across grid steps.
    nd = a.ndim
    return pl.BlockSpec(a.shape, lambda b, _n=nd: (0,) * _n)


def run_meta_transformer(feat_km, centers_flat, params, tile_b):
    """feat_km: (K, Bp*G, 3) neighbor-major; centers_flat: (Bp*G, 3). Bp % tile_b == 0."""
    Bp = centers_flat.shape[0] // NUM_GROUPS
    assert Bp % tile_b == 0
    num_steps = Bp // tile_b
    weights = [params[n] for n in PARAM_ORDER]
    in_specs = [
        pl.BlockSpec((GROUP_SIZE, tile_b * NUM_GROUPS, IN_CHANNELS), lambda b: (0, b, 0)),
        pl.BlockSpec((tile_b * NUM_GROUPS, IN_CHANNELS), lambda b: (b, 0)),
    ] + [_full_spec(w) for w in weights]
    kernel = functools.partial(meta_transformer_kernel, tile_b=tile_b)
    return pl.pallas_call(
        kernel,
        out_shape=jax.ShapeDtypeStruct((Bp * T_PAD, EMBED_DIM), jnp.float32),
        grid_spec=pltpu.PrefetchScalarGridSpec(
            num_scalar_prefetch=0,
            grid=(num_steps,),
            in_specs=in_specs,
            out_specs=pl.BlockSpec((tile_b * T_PAD, EMBED_DIM), lambda b: (b, 0)),
        ),
        # batch axis is fully independent -> shard across v7x's 2 TensorCores
        compiler_params=pltpu.CompilerParams(dimension_semantics=("parallel",)),
    )(feat_km, centers_flat, *weights)


# ---------------- glue: grouping (patch_embed's sample + group) ----------------
def group_points(p, num_groups, group_size):
    B, N, _ = p.shape
    stride = N // num_groups
    # TODO(synk): farthest-point-sampling replaced with deterministic strided subsample.
    centers = p[:, ::stride, :][:, :num_groups, :]                              # (B, G, 3)
    d2 = jnp.sum((centers[:, :, None, :] - p[:, None, :, :]) ** 2, axis=-1)     # (B, G, N)
    _, idx = jax.lax.top_k(-d2, group_size)                                     # (B, G, K) kNN
    pts = jnp.broadcast_to(p[:, None, :, :], (B, num_groups, N, IN_CHANNELS))
    grouped = jnp.take_along_axis(pts, idx[..., None], axis=2)                  # (B, G, K, 3)
    return centers, grouped


def meta_transformer_forward(p, x, params, tile_b=TILE_B):
    """Mirrors MetaTransformer.forward: returns (p_list, x_list, tokens)."""
    B = p.shape[0]
    if x is None:
        x = jnp.transpose(p, (0, 2, 1))          # (B, 3, N) channel-first features
    centers, grouped = group_points(p, NUM_GROUPS, GROUP_SIZE)

    tb = min(tile_b, B)
    if B >= 2:
        # v7x: keep >= 2 grid steps so the parallel batch axis can use both TensorCores.
        tb = max(1, min(tb, (B + 1) // 2))
    Bp = ((B + tb - 1) // tb) * tb               # pad batch to a multiple of the tile
    pad_b = Bp - B
    grouped_p = jnp.pad(grouped, ((0, pad_b), (0, 0), (0, 0), (0, 0)))
    centers_p = jnp.pad(centers, ((0, pad_b), (0, 0), (0, 0)))

    # neighbor-major global layout (K, Bp*G, 3): the in-kernel max over K is a
    # static contiguous slice even with the batch flattened into rows.
    feat_km = jnp.transpose(grouped_p, (2, 0, 1, 3)).reshape(
        GROUP_SIZE, Bp * NUM_GROUPS, IN_CHANNELS)
    centers_flat = centers_p.reshape(Bp * NUM_GROUPS, IN_CHANNELS)

    out = run_meta_transformer(feat_km, centers_flat, params, tb)   # (Bp*T_PAD, D)
    full = out.reshape(Bp, T_PAD, EMBED_DIM)[:B]
    # kernel token layout: row 0 = cls, rows T_PAD-G..T_PAD-1 = group tokens
    tokens = jnp.concatenate(
        [full[:, 0:1, :], full[:, T_PAD - NUM_GROUPS:, :]], axis=1)  # (B, NUM_TOKENS, D)

    p_list = [p, centers]
    x_list = [x, jnp.transpose(tokens[:, 1:, :], (0, 2, 1))]         # channel-first convention
    return p_list, x_list, tokens


# ---------------- deterministic parameter init ----------------
def _xavier(key, shape):
    fan_in, fan_out = shape[-2], shape[-1]
    lim = math.sqrt(6.0 / (fan_in + fan_out))
    return jax.random.uniform(key, shape, jnp.float32, -lim, lim)


def init_params(key):
    ks = jax.random.split(key, 12)
    D, L, H3, Hm = EMBED_DIM, DEPTH, 3 * EMBED_DIM, MLP_HIDDEN
    bf16 = jnp.bfloat16
    z = lambda *s: jnp.zeros(s, jnp.float32)
    o = lambda *s: jnp.ones(s, jnp.float32)
    p = {}
    # first layers of the two Linear(3, .) MLPs stay f32 (VPU FMA path)
    p["pe_w1"] = _xavier(ks[0], (IN_CHANNELS, PE_HIDDEN));        p["pe_b1"] = z(1, PE_HIDDEN)
    # MXU weights stored in bf16 (f32 accumulation in-kernel)
    p["pe_w2"] = _xavier(ks[1], (PE_HIDDEN, PE_OUT)).astype(bf16); p["pe_b2"] = z(1, PE_OUT)
    p["proj_w"] = _xavier(ks[2], (PE_OUT, D)).astype(bf16);        p["proj_b"] = z(1, D)
    p["cls_token"] = 0.02 * jax.random.normal(ks[3], (1, D), jnp.float32)
    p["cls_pos"] = 0.02 * jax.random.normal(ks[4], (1, D), jnp.float32)
    p["pos_w1"] = _xavier(ks[5], (IN_CHANNELS, POS_HIDDEN));       p["pos_b1"] = z(1, POS_HIDDEN)
    p["pos_w2"] = _xavier(ks[6], (POS_HIDDEN, D)).astype(bf16);    p["pos_b2"] = z(1, D)
    p["ln1_g"] = o(L, D); p["ln1_b"] = z(L, D)
    p["qkv_w"] = _xavier(ks[7], (L, D, H3)).astype(bf16);          p["qkv_b"] = z(L, H3)
    p["atp_w"] = _xavier(ks[8], (L, D, D)).astype(bf16);           p["atp_b"] = z(L, D)
    p["ln2_g"] = o(L, D); p["ln2_b"] = z(L, D)
    p["fc1_w"] = _xavier(ks[9], (L, D, Hm)).astype(bf16);          p["fc1_b"] = z(L, Hm)
    p["fc2_w"] = _xavier(ks[10], (L, Hm, D)).astype(bf16);         p["fc2_b"] = z(L, D)
    p["nf_g"] = o(1, D); p["nf_b"] = z(1, D)
    return p


# TODO(synk): torch.load of the frozen Meta-Transformer checkpoint is replaced by
# deterministic synthetic weights; dropout / drop_path are identity (rates are 0 / eval).

if __name__ == "__main__":
    B, N = 2, 64
    key = jax.random.PRNGKey(0)
    p_pts = jax.random.normal(key, (B, N, 3), jnp.float32)
    params = init_params(jax.random.PRNGKey(1))

    p_list, x_list, tokens = jax.jit(meta_transformer_forward)(p_pts, None, params)
    tokens = jax.block_until_ready(tokens)

    assert tokens.shape == (B, NUM_TOKENS, EMBED_DIM), tokens.shape
    assert bool(jnp.all(jnp.isfinite(tokens)))
    print("KERNEL_OK")
</pallas_src>

<mosaic_0001>
module attributes {stable_mosaic.version = 11 : i64} {
  func.func @meta_transformer_kernel(%arg0: i32, %arg1: memref<8x8x3xf32, #tpu.memory_space<vmem>>, %arg2: memref<8x3xf32, #tpu.memory_space<vmem>>, %arg3: memref<3x32xf32, #tpu.memory_space<vmem>>, %arg4: memref<1x32xf32, #tpu.memory_space<vmem>>, %arg5: memref<32x32xbf16, #tpu.memory_space<vmem>>, %arg6: memref<1x32xf32, #tpu.memory_space<vmem>>, %arg7: memref<32x64xbf16, #tpu.memory_space<vmem>>, %arg8: memref<1x64xf32, #tpu.memory_space<vmem>>, %arg9: memref<1x64xf32, #tpu.memory_space<vmem>>, %arg10: memref<1x64xf32, #tpu.memory_space<vmem>>, %arg11: memref<3x128xf32, #tpu.memory_space<vmem>>, %arg12: memref<1x128xf32, #tpu.memory_space<vmem>>, %arg13: memref<128x64xbf16, #tpu.memory_space<vmem>>, %arg14: memref<1x64xf32, #tpu.memory_space<vmem>>, %arg15: memref<2x64xf32, #tpu.memory_space<vmem>>, %arg16: memref<2x64xf32, #tpu.memory_space<vmem>>, %arg17: memref<2x64x192xbf16, #tpu.memory_space<vmem>>, %arg18: memref<2x192xf32, #tpu.memory_space<vmem>>, %arg19: memref<2x64x64xbf16, #tpu.memory_space<vmem>>, %arg20: memref<2x64xf32, #tpu.memory_space<vmem>>, %arg21: memref<2x64xf32, #tpu.memory_space<vmem>>, %arg22: memref<2x64xf32, #tpu.memory_space<vmem>>, %arg23: memref<2x64x256xbf16, #tpu.memory_space<vmem>>, %arg24: memref<2x256xf32, #tpu.memory_space<vmem>>, %arg25: memref<2x256x64xbf16, #tpu.memory_space<vmem>>, %arg26: memref<2x64xf32, #tpu.memory_space<vmem>>, %arg27: memref<1x64xf32, #tpu.memory_space<vmem>>, %arg28: memref<1x64xf32, #tpu.memory_space<vmem>>, %arg29: memref<16x64xf32, #tpu.memory_space<vmem>>) attributes {dimension_semantics = [#tpu.dimension_semantics<parallel>], iteration_bounds = array<i64: 2>, scalar_prefetch = 0 : i64, scratch_operands = 0 : i64, tpu.core_type = #tpu.core_type<tc>, window_params = [{transform_indices = @transform_0, window_bounds = array<i64: 8, 8, 3>}, {transform_indices = @transform_1, window_bounds = array<i64: 8, 3>}, {pipeline_mode = #tpu.pipeline_mode<synchronous>, transform_indices = @transform_2, window_bounds = array<i64: 3, 32>}, {pipeline_mode = #tpu.pipeline_mode<synchronous>, transform_indices = @transform_3, window_bounds = array<i64: 1, 32>}, {pipeline_mode = #tpu.pipeline_mode<synchronous>, transform_indices = @transform_4, window_bounds = array<i64: 32, 32>}, {pipeline_mode = #tpu.pipeline_mode<synchronous>, transform_indices = @transform_5, window_bounds = array<i64: 1, 32>}, {pipeline_mode = #tpu.pipeline_mode<synchronous>, transform_indices = @transform_6, window_bounds = array<i64: 32, 64>}, {pipeline_mode = #tpu.pipeline_mode<synchronous>, transform_indices = @transform_7, window_bounds = array<i64: 1, 64>}, {pipeline_mode = #tpu.pipeline_mode<synchronous>, transform_indices = @transform_8, window_bounds = array<i64: 1, 64>}, {pipeline_mode = #tpu.pipeline_mode<synchronous>, transform_indices = @transform_9, window_bounds = array<i64: 1, 64>}, {pipeline_mode = #tpu.pipeline_mode<synchronous>, transform_indices = @transform_10, window_bounds = array<i64: 3, 128>}, {pipeline_mode = #tpu.pipeline_mode<synchronous>, transform_indices = @transform_11, window_bounds = array<i64: 1, 128>}, {pipeline_mode = #tpu.pipeline_mode<synchronous>, transform_indices = @transform_12, window_bounds = array<i64: 128, 64>}, {pipeline_mode = #tpu.pipeline_mode<synchronous>, transform_indices = @transform_13, window_bounds = array<i64: 1, 64>}, {pipeline_mode = #tpu.pipeline_mode<synchronous>, transform_indices = @transform_14, window_bounds = array<i64: 2, 64>}, {pipeline_mode = #tpu.pipeline_mode<synchronous>, transform_indices = @transform_15, window_bounds = array<i64: 2, 64>}, {pipeline_mode = #tpu.pipeline_mode<synchronous>, transform_indices = @transform_16, window_bounds = array<i64: 2, 64, 192>}, {pipeline_mode = #tpu.pipeline_mode<synchronous>, transform_indices = @transform_17, window_bounds = array<i64: 2, 192>}, {pipeline_mode = #tpu.pipeline_mode<synchronous>, transform_indices = @transform_18, window_bounds = array<i64: 2, 64, 64>}, {pipeline_mode = #tpu.pipeline_mode<synchronous>, transform_indices = @transform_19, window_bounds = array<i64: 2, 64>}, {pipeline_mode = #tpu.pipeline_mode<synchronous>, transform_indices = @transform_20, window_bounds = array<i64: 2, 64>}, {pipeline_mode = #tpu.pipeline_mode<synchronous>, transform_indices = @transform_21, window_bounds = array<i64: 2, 64>}, {pipeline_mode = #tpu.pipeline_mode<synchronous>, transform_indices = @transform_22, window_bounds = array<i64: 2, 64, 256>}, {pipeline_mode = #tpu.pipeline_mode<synchronous>, transform_indices = @transform_23, window_bounds = array<i64: 2, 256>}, {pipeline_mode = #tpu.pipeline_mode<synchronous>, transform_indices = @transform_24, window_bounds = array<i64: 2, 256, 64>}, {pipeline_mode = #tpu.pipeline_mode<synchronous>, transform_indices = @transform_25, window_bounds = array<i64: 2, 64>}, {pipeline_mode = #tpu.pipeline_mode<synchronous>, transform_indices = @transform_26, window_bounds = array<i64: 1, 64>}, {pipeline_mode = #tpu.pipeline_mode<synchronous>, transform_indices = @transform_27, window_bounds = array<i64: 1, 64>}, {transform_indices = @transform_28, window_bounds = array<i64: 16, 64>}]} {
    %c0 = arith.constant 0 : index
    %c0_0 = arith.constant 0 : index
    %c0_1 = arith.constant 0 : index
    %0 = vector.load %arg1[%c0, %c0_0, %c0_1] : memref<8x8x3xf32, #tpu.memory_space<vmem>>, vector<8x8x3xf32>
    %1 = vector.shape_cast %0 : vector<8x8x3xf32> to vector<64x3xf32>
    %c0_2 = arith.constant 0 : index
    %c0_3 = arith.constant 0 : index
    %2 = vector.load %arg3[%c0_2, %c0_3] : memref<3x32xf32, #tpu.memory_space<vmem>>, vector<3x32xf32>
    %c0_4 = arith.constant 0 : index
    %c0_5 = arith.constant 0 : index
    %3 = vector.load %arg4[%c0_4, %c0_5] : memref<1x32xf32, #tpu.memory_space<vmem>>, vector<1x32xf32>
    %4 = vector.extract_strided_slice %1 {offsets = [0, 0], sizes = [64, 1], strides = [1, 1]} : vector<64x3xf32> to vector<64x1xf32>
    %5 = vector.extract_strided_slice %2 {offsets = [0, 0], sizes = [1, 32], strides = [1, 1]} : vector<3x32xf32> to vector<1x32xf32>
    %6 = vector.broadcast %4 : vector<64x1xf32> to vector<64x32xf32>
    %7 = vector.broadcast %5 : vector<1x32xf32> to vector<64x32xf32>
    %8 = arith.mulf %6, %7 : vector<64x32xf32>
    %9 = vector.extract_strided_slice %1 {offsets = [0, 1], sizes = [64, 1], strides = [1, 1]} : vector<64x3xf32> to vector<64x1xf32>
    %10 = vector.extract_strided_slice %2 {offsets = [1, 0], sizes = [1, 32], strides = [1, 1]} : vector<3x32xf32> to vector<1x32xf32>
    %11 = vector.broadcast %9 : vector<64x1xf32> to vector<64x32xf32>
    %12 = vector.broadcast %10 : vector<1x32xf32> to vector<64x32xf32>
    %13 = arith.mulf %11, %12 : vector<64x32xf32>
    %14 = arith.addf %8, %13 : vector<64x32xf32>
    %15 = vector.extract_strided_slice %1 {offsets = [0, 2], sizes = [64, 1], strides = [1, 1]} : vector<64x3xf32> to vector<64x1xf32>
    %16 = vector.extract_strided_slice %2 {offsets = [2, 0], sizes = [1, 32], strides = [1, 1]} : vector<3x32xf32> to vector<1x32xf32>
    %17 = vector.broadcast %15 : vector<64x1xf32> to vector<64x32xf32>
    %18 = vector.broadcast %16 : vector<1x32xf32> to vector<64x32xf32>
    %19 = arith.mulf %17, %18 : vector<64x32xf32>
    %20 = arith.addf %14, %19 : vector<64x32xf32>
    %21 = vector.broadcast %3 : vector<1x32xf32> to vector<64x32xf32>
    %22 = arith.addf %20, %21 : vector<64x32xf32>
    %cst = arith.constant 5.000000e-01 : f32
    %23 = vector.broadcast %cst : f32 to vector<64x32xf32>
    %24 = arith.mulf %23, %22 : vector<64x32xf32>
    %cst_6 = arith.constant 4.471500e-02 : f32
    %25 = vector.broadcast %cst_6 : f32 to vector<64x32xf32>
    %26 = arith.mulf %25, %22 : vector<64x32xf32>
    %27 = arith.mulf %26, %22 : vector<64x32xf32>
    %28 = arith.mulf %27, %22 : vector<64x32xf32>
    %29 = arith.addf %22, %28 : vector<64x32xf32>
    %cst_7 = arith.constant 0.797884583 : f32
    %30 = vector.broadcast %cst_7 : f32 to vector<64x32xf32>
    %31 = arith.mulf %30, %29 : vector<64x32xf32>
    %32 = math.tanh %31 : vector<64x32xf32>
    %cst_8 = arith.constant 1.000000e+00 : f32
    %33 = vector.broadcast %cst_8 : f32 to vector<64x32xf32>
    %34 = arith.addf %33, %32 : vector<64x32xf32>
    %35 = arith.mulf %24, %34 : vector<64x32xf32>
    %36 = arith.truncf %35 : vector<64x32xf32> to vector<64x32xbf16>
    %c0_9 = arith.constant 0 : index
    %c0_10 = arith.constant 0 : index
    %37 = vector.load %arg5[%c0_9, %c0_10] : memref<32x32xbf16, #tpu.memory_space<vmem>>, vector<32x32xbf16>
    %cst_11 = arith.constant dense<0.000000e+00> : vector<64x32xf32>
    %38 = tpu.matmul %36, %37, %cst_11 {dimension_numbers = #tpu.dot_dimension_numbers<[1], [0], [0], [1], [0, 0, 1, 1], [], []>} : vector<64x32xbf16>, vector<32x32xbf16>, vector<64x32xf32> -> vector<64x32xf32>
    %c0_12 = arith.constant 0 : index
    %c0_13 = arith.constant 0 : index
    %39 = vector.load %arg6[%c0_12, %c0_13] : memref<1x32xf32, #tpu.memory_space<vmem>>, vector<1x32xf32>
    %40 = vector.broadcast %39 : vector<1x32xf32> to vector<64x32xf32>
    %41 = arith.addf %38, %40 : vector<64x32xf32>
    %42 = vector.shape_cast %41 : vector<64x32xf32> to vector<8x8x32xf32>
    %43 = vector.extract_strided_slice %42 {offsets = [0, 0, 0], sizes = [1, 8, 32], strides = [1, 1, 1]} : vector<8x8x32xf32> to vector<1x8x32xf32>
    %44 = vector.shape_cast %43 : vector<1x8x32xf32> to vector<8x32xf32>
    %45 = vector.extract_strided_slice %42 {offsets = [1, 0, 0], sizes = [1, 8, 32], strides = [1, 1, 1]} : vector<8x8x32xf32> to vector<1x8x32xf32>
    %46 = vector.shape_cast %45 : vector<1x8x32xf32> to vector<8x32xf32>
    %47 = arith.maximumf %44, %46 : vector<8x32xf32>
    %48 = vector.extract_strided_slice %42 {offsets = [2, 0, 0], sizes = [1, 8, 32], strides = [1, 1, 1]} : vector<8x8x32xf32> to vector<1x8x32xf32>
    %49 = vector.shape_cast %48 : vector<1x8x32xf32> to vector<8x32xf32>
    %50 = arith.maximumf %47, %49 : vector<8x32xf32>
    %51 = vector.extract_strided_slice %42 {offsets = [3, 0, 0], sizes = [1, 8, 32], strides = [1, 1, 1]} : vector<8x8x32xf32> to vector<1x8x32xf32>
    %52 = vector.shape_cast %51 : vector<1x8x32xf32> to vector<8x32xf32>
    %53 = arith.maximumf %50, %52 : vector<8x32xf32>
    %54 = vector.extract_strided_slice %42 {offsets = [4, 0, 0], sizes = [1, 8, 32], strides = [1, 1, 1]} : vector<8x8x32xf32> to vector<1x8x32xf32>
    %55 = vector.shape_cast %54 : vector<1x8x32xf32> to vector<8x32xf32>
    %56 = arith.maximumf %53, %55 : vector<8x32xf32>
    %57 = vector.extract_strided_slice %42 {offsets = [5, 0, 0], sizes = [1, 8, 32], strides = [1, 1, 1]} : vector<8x8x32xf32> to vector<1x8x32xf32>
    %58 = vector.shape_cast %57 : vector<1x8x32xf32> to vector<8x32xf32>
    %59 = arith.maximumf %56, %58 : vector<8x32xf32>
    %60 = vector.extract_strided_slice %42 {offsets = [6, 0, 0], sizes = [1, 8, 32], strides = [1, 1, 1]} : vector<8x8x32xf32> to vector<1x8x32xf32>
    %61 = vector.shape_cast %60 : vector<1x8x32xf32> to vector<8x32xf32>
    %62 = arith.maximumf %59, %61 : vector<8x32xf32>
    %63 = vector.extract_strided_slice %42 {offsets = [7, 0, 0], sizes = [1, 8, 32], strides = [1, 1, 1]} : vector<8x8x32xf32> to vector<1x8x32xf32>
    %64 = vector.shape_cast %63 : vector<1x8x32xf32> to vector<8x32xf32>
    %65 = arith.maximumf %62, %64 : vector<8x32xf32>
    %66 = arith.truncf %65 : vector<8x32xf32> to vector<8x32xbf16>
    %c0_14 = arith.constant 0 : index
    %c0_15 = arith.constant 0 : index
    %67 = vector.load %arg7[%c0_14, %c0_15] : memref<32x64xbf16, #tpu.memory_space<vmem>>, vector<32x64xbf16>
    %cst_16 = arith.constant dense<0.000000e+00> : vector<8x64xf32>
    %68 = tpu.matmul %66, %67, %cst_16 {dimension_numbers = #tpu.dot_dimension_numbers<[1], [0], [0], [1], [0, 0, 1, 1], [], []>} : vector<8x32xbf16>, vector<32x64xbf16>, vector<8x64xf32> -> vector<8x64xf32>
    %c0_17 = arith.constant 0 : index
    %c0_18 = arith.constant 0 : index
    %69 = vector.load %arg8[%c0_17, %c0_18] : memref<1x64xf32, #tpu.memory_space<vmem>>, vector<1x64xf32>
    %70 = vector.broadcast %69 : vector<1x64xf32> to vector<8x64xf32>
    %71 = arith.addf %68, %70 : vector<8x64xf32>
    %c0_19 = arith.constant 0 : index
    %c0_20 = arith.constant 0 : index
    %72 = vector.load %arg2[%c0_19, %c0_20] : memref<8x3xf32, #tpu.memory_space<vmem>>, vector<8x3xf32>
    %c0_21 = arith.constant 0 : index
    %c0_22 = arith.constant 0 : index
    %73 = vector.load %arg11[%c0_21, %c0_22] : memref<3x128xf32, #tpu.memory_space<vmem>>, vector<3x128xf32>
    %c0_23 = arith.constant 0 : index
    %c0_24 = arith.constant 0 : index
    %74 = vector.load %arg12[%c0_23, %c0_24] : memref<1x128xf32, #tpu.memory_space<vmem>>, vector<1x128xf32>
    %75 = vector.extract_strided_slice %72 {offsets = [0, 0], sizes = [8, 1], strides = [1, 1]} : vector<8x3xf32> to vector<8x1xf32>
    %76 = vector.extract_strided_slice %73 {offsets = [0, 0], sizes = [1, 128], strides = [1, 1]} : vector<3x128xf32> to vector<1x128xf32>
    %77 = vector.broadcast %75 : vector<8x1xf32> to vector<8x128xf32>
    %78 = vector.broadcast %76 : vector<1x128xf32> to vector<8x128xf32>
    %79 = arith.mulf %77, %78 : vector<8x128xf32>
    %80 = vector.extract_strided_slice %72 {offsets = [0, 1], sizes = [8, 1], strides = [1, 1]} : vector<8x3xf32> to vector<8x1xf32>
    %81 = vector.extract_strided_slice %73 {offsets = [1, 0], sizes = [1, 128], strides = [1, 1]} : vector<3x128xf32> to vector<1x128xf32>
    %82 = vector.broadcast %80 : vector<8x1xf32> to vector<8x128xf32>
    %83 = vector.broadcast %81 : vector<1x128xf32> to vector<8x128xf32>
    %84 = arith.mulf %82, %83 : vector<8x128xf32>
    %85 = arith.addf %79, %84 : vector<8x128xf32>
    %86 = vector.extract_strided_slice %72 {offsets = [0, 2], sizes = [8, 1], strides = [1, 1]} : vector<8x3xf32> to vector<8x1xf32>
    %87 = vector.extract_strided_slice %73 {offsets = [2, 0], sizes = [1, 128], strides = [1, 1]} : vector<3x128xf32> to vector<1x128xf32>
    %88 = vector.broadcast %86 : vector<8x1xf32> to vector<8x128xf32>
    %89 = vector.broadcast %87 : vector<1x128xf32> to vector<8x128xf32>
    %90 = arith.mulf %88, %89 : vector<8x128xf32>
    %91 = arith.addf %85, %90 : vector<8x128xf32>
    %92 = vector.broadcast %74 : vector<1x128xf32> to vector<8x128xf32>
    %93 = arith.addf %91, %92 : vector<8x128xf32>
    %cst_25 = arith.constant 5.000000e-01 : f32
    %94 = vector.broadcast %cst_25 : f32 to vector<8x128xf32>
    %95 = arith.mulf %94, %93 : vector<8x128xf32>
    %cst_26 = arith.constant 4.471500e-02 : f32
    %96 = vector.broadcast %cst_26 : f32 to vector<8x128xf32>
    %97 = arith.mulf %96, %93 : vector<8x128xf32>
    %98 = arith.mulf %97, %93 : vector<8x128xf32>
    %99 = arith.mulf %98, %93 : vector<8x128xf32>
    %100 = arith.addf %93, %99 : vector<8x128xf32>
    %cst_27 = arith.constant 0.797884583 : f32
    %101 = vector.broadcast %cst_27 : f32 to vector<8x128xf32>
    %102 = arith.mulf %101, %100 : vector<8x128xf32>
    %103 = math.tanh %102 : vector<8x128xf32>
    %cst_28 = arith.constant 1.000000e+00 : f32
    %104 = vector.broadcast %cst_28 : f32 to vector<8x128xf32>
    %105 = arith.addf %104, %103 : vector<8x128xf32>
    %106 = arith.mulf %95, %105 : vector<8x128xf32>
    %107 = arith.truncf %106 : vector<8x128xf32> to vector<8x128xbf16>
    %c0_29 = arith.constant 0 : index
    %c0_30 = arith.constant 0 : index
    %108 = vector.load %arg13[%c0_29, %c0_30] : memref<128x64xbf16, #tpu.memory_space<vmem>>, vector<128x64xbf16>
    %cst_31 = arith.constant dense<0.000000e+00> : vector<8x64xf32>
    %109 = tpu.matmul %107, %108, %cst_31 {dimension_numbers = #tpu.dot_dimension_numbers<[1], [0], [0], [1], [0, 0, 1, 1], [], []>} : vector<8x128xbf16>, vector<128x64xbf16>, vector<8x64xf32> -> vector<8x64xf32>
    %c0_32 = arith.constant 0 : index
    %c0_33 = arith.constant 0 : index
    %110 = vector.load %arg14[%c0_32, %c0_33] : memref<1x64xf32, #tpu.memory_space<vmem>>, vector<1x64xf32>
    %111 = vector.broadcast %110 : vector<1x64xf32> to vector<8x64xf32>
    %112 = arith.addf %109, %111 : vector<8x64xf32>
    %cst_34 = arith.constant 0.000000e+00 : f32
    %113 = vector.broadcast %cst_34 : f32 to vector<7x64xf32>
    %c0_35 = arith.constant 0 : index
    %c0_36 = arith.constant 0 : index
    %114 = vector.load %arg9[%c0_35, %c0_36] : memref<1x64xf32, #tpu.memory_space<vmem>>, vector<1x64xf32>
    %115 = tpu.concatenate %114, %113 in 0 : vector<1x64xf32>, vector<7x64xf32> -> vector<8x64xf32>
    %c0_37 = arith.constant 0 : index
    %c0_38 = arith.constant 0 : index
    %116 = vector.load %arg10[%c0_37, %c0_38] : memref<1x64xf32, #tpu.memory_space<vmem>>, vector<1x64xf32>
    %117 = tpu.concatenate %116, %113 in 0 : vector<1x64xf32>, vector<7x64xf32> -> vector<8x64xf32>
    %118 = vector.shape_cast %115 : vector<8x64xf32> to vector<1x8x64xf32>
    %119 = vector.shape_cast %71 : vector<8x64xf32> to vector<1x8x64xf32>
    %120 = tpu.concatenate %118, %119 in 1 : vector<1x8x64xf32>, vector<1x8x64xf32> -> vector<1x16x64xf32>
    %121 = vector.shape_cast %120 : vector<1x16x64xf32> to vector<16x64xf32>
    %122 = vector.shape_cast %117 : vector<8x64xf32> to vector<1x8x64xf32>
    %123 = vector.shape_cast %112 : vector<8x64xf32> to vector<1x8x64xf32>
    %124 = tpu.concatenate %122, %123 in 1 : vector<1x8x64xf32>, vector<1x8x64xf32> -> vector<1x16x64xf32>
    %125 = vector.shape_cast %124 : vector<1x16x64xf32> to vector<16x64xf32>
    %126 = tpu.iota {dimensions = array<i32: 0>} : vector<16x16xi32>
    %127 = tpu.iota {dimensions = array<i32: 1>} : vector<16x16xi32>
    %c4_i32 = arith.constant 4 : i32
    %128 = vector.broadcast %c4_i32 : i32 to vector<16x16xi32>
    %129 = arith.shrsi %126, %128 : vector<16x16xi32>
    %c4_i32_39 = arith.constant 4 : i32
    %130 = vector.broadcast %c4_i32_39 : i32 to vector<16x16xi32>
    %131 = arith.shrsi %127, %130 : vector<16x16xi32>
    %132 = arith.cmpi eq, %129, %131 : vector<16x16xi32>
    %c15_i32 = arith.constant 15 : i32
    %133 = vector.broadcast %c15_i32 : i32 to vector<16x16xi32>
    %134 = arith.andi %127, %133 : vector<16x16xi32>
    %c0_i32 = arith.constant 0 : i32
    %135 = vector.broadcast %c0_i32 : i32 to vector<16x16xi32>
    %136 = arith.cmpi eq, %134, %135 : vector<16x16xi32>
    %c8_i32 = arith.constant 8 : i32
    %137 = vector.broadcast %c8_i32 : i32 to vector<16x16xi32>
    %138 = arith.cmpi sge, %134, %137 : vector<16x16xi32>
    %139 = arith.ori %136, %138 : vector<16x16xi1>
    %140 = arith.andi %132, %139 : vector<16x16xi1>
    %cst_40 = arith.constant 0.000000e+00 : f32
    %cst_41 = arith.constant -1.000000e+30 : f32
    %141 = vector.broadcast %cst_40 : f32 to vector<16x16xf32>
    %142 = vector.broadcast %cst_41 : f32 to vector<16x16xf32>
    %143 = arith.select %140, %141, %142 : vector<16x16xi1>, vector<16x16xf32>
    %144 = arith.addf %121, %125 : vector<16x64xf32>
    %c0_42 = arith.constant 0 : index
    %c0_43 = arith.constant 0 : index
    %145 = vector.load %arg15[%c0_42, %c0_43] : memref<2x64xf32, #tpu.memory_space<vmem>>, vector<1x64xf32>
    %c0_44 = arith.constant 0 : index
    %c0_45 = arith.constant 0 : index
    %146 = vector.load %arg16[%c0_44, %c0_45] : memref<2x64xf32, #tpu.memory_space<vmem>>, vector<1x64xf32>
    %cst_46 = arith.constant dense<0.000000e+00> : vector<16xf32>
    %147 = vector.multi_reduction <add>, %144, %cst_46 [1] : vector<16x64xf32> to vector<16xf32>
    %148 = vector.shape_cast %147 : vector<16xf32> to vector<16x1xf32>
    %cst_47 = arith.constant 6.400000e+01 : f32
    %149 = vector.broadcast %cst_47 : f32 to vector<16x1xf32>
    %150 = arith.divf %148, %149 : vector<16x1xf32>
    %151 = vector.broadcast %150 : vector<16x1xf32> to vector<16x64xf32>
    %152 = arith.subf %144, %151 : vector<16x64xf32>
    %153 = arith.mulf %152, %152 : vector<16x64xf32>
    %cst_48 = arith.constant dense<0.000000e+00> : vector<16xf32>
    %154 = vector.multi_reduction <add>, %153, %cst_48 [1] : vector<16x64xf32> to vector<16xf32>
    %155 = vector.shape_cast %154 : vector<16xf32> to vector<16x1xf32>
    %cst_49 = arith.constant 6.400000e+01 : f32
    %156 = vector.broadcast %cst_49 : f32 to vector<16x1xf32>
    %157 = arith.divf %155, %156 : vector<16x1xf32>
    %cst_50 = arith.constant 9.99999974E-6 : f32
    %158 = vector.broadcast %cst_50 : f32 to vector<16x1xf32>
    %159 = arith.addf %157, %158 : vector<16x1xf32>
    %160 = math.rsqrt %159 : vector<16x1xf32>
    %161 = vector.broadcast %160 : vector<16x1xf32> to vector<16x64xf32>
    %162 = arith.mulf %152, %161 : vector<16x64xf32>
    %163 = vector.broadcast %145 : vector<1x64xf32> to vector<16x64xf32>
    %164 = arith.mulf %162, %163 : vector<16x64xf32>
    %165 = vector.broadcast %146 : vector<1x64xf32> to vector<16x64xf32>
    %166 = arith.addf %164, %165 : vector<16x64xf32>
    %167 = arith.truncf %166 : vector<16x64xf32> to vector<16x64xbf16>
    %c0_51 = arith.constant 0 : index
    %c0_52 = arith.constant 0 : index
    %c0_53 = arith.constant 0 : index
    %168 = vector.load %arg17[%c0_51, %c0_52, %c0_53] : memref<2x64x192xbf16, #tpu.memory_space<vmem>>, vector<1x64x192xbf16>
    %169 = vector.shape_cast %168 : vector<1x64x192xbf16> to vector<64x192xbf16>
    %cst_54 = arith.constant dense<0.000000e+00> : vector<16x192xf32>
    %170 = tpu.matmul %167, %169, %cst_54 {dimension_numbers = #tpu.dot_dimension_numbers<[1], [0], [0], [1], [0, 0, 1, 1], [], []>} : vector<16x64xbf16>, vector<64x192xbf16>, vector<16x192xf32> -> vector<16x192xf32>
    %c0_55 = arith.constant 0 : index
    %c0_56 = arith.constant 0 : index
    %171 = vector.load %arg18[%c0_55, %c0_56] : memref<2x192xf32, #tpu.memory_space<vmem>>, vector<1x192xf32>
    %172 = vector.broadcast %171 : vector<1x192xf32> to vector<16x192xf32>
    %173 = arith.addf %170, %172 : vector<16x192xf32>
    %c0_57 = arith.constant 0 : index
    %c0_58 = arith.constant 0 : index
    %c0_59 = arith.constant 0 : index
    %174 = vector.load %arg19[%c0_57, %c0_58, %c0_59] : memref<2x64x64xbf16, #tpu.memory_space<vmem>>, vector<1x64x64xbf16>
    %175 = vector.shape_cast %174 : vector<1x64x64xbf16> to vector<64x64xbf16>
    %176 = arith.truncf %173 : vector<16x192xf32> to vector<16x192xbf16>
    %177 = vector.extract_strided_slice %176 {offsets = [0, 0], sizes = [16, 16], strides = [1, 1]} : vector<16x192xbf16> to vector<16x16xbf16>
    %178 = vector.extract_strided_slice %176 {offsets = [0, 64], sizes = [16, 16], strides = [1, 1]} : vector<16x192xbf16> to vector<16x16xbf16>
    %179 = vector.extract_strided_slice %176 {offsets = [0, 128], sizes = [16, 16], strides = [1, 1]} : vector<16x192xbf16> to vector<16x16xbf16>
    %cst_60 = arith.constant dense<0.000000e+00> : vector<16x16xf32>
    %180 = tpu.matmul %177, %178, %cst_60 {dimension_numbers = #tpu.dot_dimension_numbers<[1], [1], [0], [0], [0, 0, 1, 0], [], []>} : vector<16x16xbf16>, vector<16x16xbf16>, vector<16x16xf32> -> vector<16x16xf32>
    %cst_61 = arith.constant 2.500000e-01 : f32
    %181 = vector.broadcast %cst_61 : f32 to vector<16x16xf32>
    %182 = arith.mulf %180, %181 : vector<16x16xf32>
    %183 = arith.addf %182, %143 : vector<16x16xf32>
    %cst_62 = arith.constant dense<0xFF800000> : vector<16xf32>
    %184 = vector.multi_reduction <maximumf>, %183, %cst_62 [1] : vector<16x16xf32> to vector<16xf32>
    %185 = vector.shape_cast %184 : vector<16xf32> to vector<16x1xf32>
    %186 = vector.broadcast %185 : vector<16x1xf32> to vector<16x16xf32>
    %187 = arith.subf %183, %186 : vector<16x16xf32>
    %188 = math.exp %187 : vector<16x16xf32>
    %cst_63 = arith.constant dense<0.000000e+00> : vector<16xf32>
    %189 = vector.multi_reduction <add>, %188, %cst_63 [1] : vector<16x16xf32> to vector<16xf32>
    %190 = vector.shape_cast %189 : vector<16xf32> to vector<16x1xf32>
    %191 = tpu.reciprocal %190 {approx = true} : vector<16x1xf32> -> vector<16x1xf32>
    %192 = vector.broadcast %191 : vector<16x1xf32> to vector<16x16xf32>
    %193 = arith.mulf %188, %192 : vector<16x16xf32>
    %194 = arith.truncf %193 : vector<16x16xf32> to vector<16x16xbf16>
    %cst_64 = arith.constant dense<0.000000e+00> : vector<16x16xf32>
    %195 = tpu.matmul %194, %179, %cst_64 {dimension_numbers = #tpu.dot_dimension_numbers<[1], [0], [0], [1], [0, 0, 1, 1], [], []>} : vector<16x16xbf16>, vector<16x16xbf16>, vector<16x16xf32> -> vector<16x16xf32>
    %196 = arith.truncf %195 : vector<16x16xf32> to vector<16x16xbf16>
    %197 = vector.extract_strided_slice %175 {offsets = [0, 0], sizes = [16, 64], strides = [1, 1]} : vector<64x64xbf16> to vector<16x64xbf16>
    %cst_65 = arith.constant dense<0.000000e+00> : vector<16x64xf32>
    %198 = tpu.matmul %196, %197, %cst_65 {dimension_numbers = #tpu.dot_dimension_numbers<[1], [0], [0], [1], [0, 0, 1, 1], [], []>} : vector<16x16xbf16>, vector<16x64xbf16>, vector<16x64xf32> -> vector<16x64xf32>
    %199 = vector.extract_strided_slice %176 {offsets = [0, 16], sizes = [16, 16], strides = [1, 1]} : vector<16x192xbf16> to vector<16x16xbf16>
    %200 = vector.extract_strided_slice %176 {offsets = [0, 80], sizes = [16, 16], strides = [1, 1]} : vector<16x192xbf16> to vector<16x16xbf16>
    %201 = vector.extract_strided_slice %176 {offsets = [0, 144], sizes = [16, 16], strides = [1, 1]} : vector<16x192xbf16> to vector<16x16xbf16>
    %cst_66 = arith.constant dense<0.000000e+00> : vector<16x16xf32>
    %202 = tpu.matmul %199, %200, %cst_66 {dimension_numbers = #tpu.dot_dimension_numbers<[1], [1], [0], [0], [0, 0, 1, 0], [], []>} : vector<16x16xbf16>, vector<16x16xbf16>, vector<16x16xf32> -> vector<16x16xf32>
    %cst_67 = arith.constant 2.500000e-01 : f32
    %203 = vector.broadcast %cst_67 : f32 to vector<16x16xf32>
    %204 = arith.mulf %202, %203 : vector<16x16xf32>
    %205 = arith.addf %204, %143 : vector<16x16xf32>
    %cst_68 = arith.constant dense<0xFF800000> : vector<16xf32>
    %206 = vector.multi_reduction <maximumf>, %205, %cst_68 [1] : vector<16x16xf32> to vector<16xf32>
    %207 = vector.shape_cast %206 : vector<16xf32> to vector<16x1xf32>
    %208 = vector.broadcast %207 : vector<16x1xf32> to vector<16x16xf32>
    %209 = arith.subf %205, %208 : vector<16x16xf32>
    %210 = math.exp %209 : vector<16x16xf32>
    %cst_69 = arith.constant dense<0.000000e+00> : vector<16xf32>
    %211 = vector.multi_reduction <add>, %210, %cst_69 [1] : vector<16x16xf32> to vector<16xf32>
    %212 = vector.shape_cast %211 : vector<16xf32> to vector<16x1xf32>
    %213 = tpu.reciprocal %212 {approx = true} : vector<16x1xf32> -> vector<16x1xf32>
    %214 = vector.broadcast %213 : vector<16x1xf32> to vector<16x16xf32>
    %215 = arith.mulf %210, %214 : vector<16x16xf32>
    %216 = arith.truncf %215 : vector<16x16xf32> to vector<16x16xbf16>
    %cst_70 = arith.constant dense<0.000000e+00> : vector<16x16xf32>
    %217 = tpu.matmul %216, %201, %cst_70 {dimension_numbers = #tpu.dot_dimension_numbers<[1], [0], [0], [1], [0, 0, 1, 1], [], []>} : vector<16x16xbf16>, vector<16x16xbf16>, vector<16x16xf32> -> vector<16x16xf32>
    %218 = arith.truncf %217 : vector<16x16xf32> to vector<16x16xbf16>
    %219 = vector.extract_strided_slice %175 {offsets = [16, 0], sizes = [16, 64], strides = [1, 1]} : vector<64x64xbf16> to vector<16x64xbf16>
    %cst_71 = arith.constant dense<0.000000e+00> : vector<16x64xf32>
    %220 = tpu.matmul %218, %219, %cst_71 {dimension_numbers = #tpu.dot_dimension_numbers<[1], [0], [0], [1], [0, 0, 1, 1], [], []>} : vector<16x16xbf16>, vector<16x64xbf16>, vector<16x64xf32> -> vector<16x64xf32>
    %221 = arith.addf %198, %220 : vector<16x64xf32>
    %222 = vector.extract_strided_slice %176 {offsets = [0, 32], sizes = [16, 16], strides = [1, 1]} : vector<16x192xbf16> to vector<16x16xbf16>
    %223 = vector.extract_strided_slice %176 {offsets = [0, 96], sizes = [16, 16], strides = [1, 1]} : vector<16x192xbf16> to vector<16x16xbf16>
    %224 = vector.extract_strided_slice %176 {offsets = [0, 160], sizes = [16, 16], strides = [1, 1]} : vector<16x192xbf16> to vector<16x16xbf16>
    %cst_72 = arith.constant dense<0.000000e+00> : vector<16x16xf32>
    %225 = tpu.matmul %222, %223, %cst_72 {dimension_numbers = #tpu.dot_dimension_numbers<[1], [1], [0], [0], [0, 0, 1, 0], [], []>} : vector<16x16xbf16>, vector<16x16xbf16>, vector<16x16xf32> -> vector<16x16xf32>
    %cst_73 = arith.constant 2.500000e-01 : f32
    %226 = vector.broadcast %cst_73 : f32 to vector<16x16xf32>
    %227 = arith.mulf %225, %226 : vector<16x16xf32>
    %228 = arith.addf %227, %143 : vector<16x16xf32>
    %cst_74 = arith.constant dense<0xFF800000> : vector<16xf32>
    %229 = vector.multi_reduction <maximumf>, %228, %cst_74 [1] : vector<16x16xf32> to vector<16xf32>
    %230 = vector.shape_cast %229 : vector<16xf32> to vector<16x1xf32>
    %231 = vector.broadcast %230 : vector<16x1xf32> to vector<16x16xf32>
    %232 = arith.subf %228, %231 : vector<16x16xf32>
    %233 = math.exp %232 : vector<16x16xf32>
    %cst_75 = arith.constant dense<0.000000e+00> : vector<16xf32>
    %234 = vector.multi_reduction <add>, %233, %cst_75 [1] : vector<16x16xf32> to vector<16xf32>
    %235 = vector.shape_cast %234 : vector<16xf32> to vector<16x1xf32>
    %236 = tpu.reciprocal %235 {approx = true} : vector<16x1xf32> -> vector<16x1xf32>
    %237 = vector.broadcast %236 : vector<16x1xf32> to vector<16x16xf32>
    %238 = arith.mulf %233, %237 : vector<16x16xf32>
    %239 = arith.truncf %238 : vector<16x16xf32> to vector<16x16xbf16>
    %cst_76 = arith.constant dense<0.000000e+00> : vector<16x16xf32>
    %240 = tpu.matmul %239, %224, %cst_76 {dimension_numbers = #tpu.dot_dimension_numbers<[1], [0], [0], [1], [0, 0, 1, 1], [], []>} : vector<16x16xbf16>, vector<16x16xbf16>, vector<16x16xf32> -> vector<16x16xf32>
    %241 = arith.truncf %240 : vector<16x16xf32> to vector<16x16xbf16>
    %242 = vector.extract_strided_slice %175 {offsets = [32, 0], sizes = [16, 64], strides = [1, 1]} : vector<64x64xbf16> to vector<16x64xbf16>
    %cst_77 = arith.constant dense<0.000000e+00> : vector<16x64xf32>
    %243 = tpu.matmul %241, %242, %cst_77 {dimension_numbers = #tpu.dot_dimension_numbers<[1], [0], [0], [1], [0, 0, 1, 1], [], []>} : vector<16x16xbf16>, vector<16x64xbf16>, vector<16x64xf32> -> vector<16x64xf32>
    %244 = arith.addf %221, %243 : vector<16x64xf32>
    %245 = vector.extract_strided_slice %176 {offsets = [0, 48], sizes = [16, 16], strides = [1, 1]} : vector<16x192xbf16> to vector<16x16xbf16>
    %246 = vector.extract_strided_slice %176 {offsets = [0, 112], sizes = [16, 16], strides = [1, 1]} : vector<16x192xbf16> to vector<16x16xbf16>
    %247 = vector.extract_strided_slice %176 {offsets = [0, 176], sizes = [16, 16], strides = [1, 1]} : vector<16x192xbf16> to vector<16x16xbf16>
    %cst_78 = arith.constant dense<0.000000e+00> : vector<16x16xf32>
    %248 = tpu.matmul %245, %246, %cst_78 {dimension_numbers = #tpu.dot_dimension_numbers<[1], [1], [0], [0], [0, 0, 1, 0], [], []>} : vector<16x16xbf16>, vector<16x16xbf16>, vector<16x16xf32> -> vector<16x16xf32>
    %cst_79 = arith.constant 2.500000e-01 : f32
    %249 = vector.broadcast %cst_79 : f32 to vector<16x16xf32>
    %250 = arith.mulf %248, %249 : vector<16x16xf32>
    %251 = arith.addf %250, %143 : vector<16x16xf32>
    %cst_80 = arith.constant dense<0xFF800000> : vector<16xf32>
    %252 = vector.multi_reduction <maximumf>, %251, %cst_80 [1] : vector<16x16xf32> to vector<16xf32>
    %253 = vector.shape_cast %252 : vector<16xf32> to vector<16x1xf32>
    %254 = vector.broadcast %253 : vector<16x1xf32> to vector<16x16xf32>
    %255 = arith.subf %251, %254 : vector<16x16xf32>
    %256 = math.exp %255 : vector<16x16xf32>
    %cst_81 = arith.constant dense<0.000000e+00> : vector<16xf32>
    %257 = vector.multi_reduction <add>, %256, %cst_81 [1] : vector<16x16xf32> to vector<16xf32>
    %258 = vector.shape_cast %257 : vector<16xf32> to vector<16x1xf32>
    %259 = tpu.reciprocal %258 {approx = true} : vector<16x1xf32> -> vector<16x1xf32>
    %260 = vector.broadcast %259 : vector<16x1xf32> to vector<16x16xf32>
    %261 = arith.mulf %256, %260 : vector<16x16xf32>
    %262 = arith.truncf %261 : vector<16x16xf32> to vector<16x16xbf16>
    %cst_82 = arith.constant dense<0.000000e+00> : vector<16x16xf32>
    %263 = tpu.matmul %262, %247, %cst_82 {dimension_numbers = #tpu.dot_dimension_numbers<[1], [0], [0], [1], [0, 0, 1, 1], [], []>} : vector<16x16xbf16>, vector<16x16xbf16>, vector<16x16xf32> -> vector<16x16xf32>
    %264 = arith.truncf %263 : vector<16x16xf32> to vector<16x16xbf16>
    %265 = vector.extract_strided_slice %175 {offsets = [48, 0], sizes = [16, 64], strides = [1, 1]} : vector<64x64xbf16> to vector<16x64xbf16>
    %cst_83 = arith.constant dense<0.000000e+00> : vector<16x64xf32>
    %266 = tpu.matmul %264, %265, %cst_83 {dimension_numbers = #tpu.dot_dimension_numbers<[1], [0], [0], [1], [0, 0, 1, 1], [], []>} : vector<16x16xbf16>, vector<16x64xbf16>, vector<16x64xf32> -> vector<16x64xf32>
    %267 = arith.addf %244, %266 : vector<16x64xf32>
    %268 = arith.addf %144, %267 : vector<16x64xf32>
    %c0_84 = arith.constant 0 : index
    %c0_85 = arith.constant 0 : index
    %269 = vector.load %arg20[%c0_84, %c0_85] : memref<2x64xf32, #tpu.memory_space<vmem>>, vector<1x64xf32>
    %270 = vector.broadcast %269 : vector<1x64xf32> to vector<16x64xf32>
    %271 = arith.addf %268, %270 : vector<16x64xf32>
    %c0_86 = arith.constant 0 : index
    %c0_87 = arith.constant 0 : index
    %272 = vector.load %arg21[%c0_86, %c0_87] : memref<2x64xf32, #tpu.memory_space<vmem>>, vector<1x64xf32>
    %c0_88 = arith.constant 0 : index
    %c0_89 = arith.constant 0 : index
    %273 = vector.load %arg22[%c0_88, %c0_89] : memref<2x64xf32, #tpu.memory_space<vmem>>, vector<1x64xf32>
    %cst_90 = arith.constant dense<0.000000e+00> : vector<16xf32>
    %274 = vector.multi_reduction <add>, %271, %cst_90 [1] : vector<16x64xf32> to vector<16xf32>
    %275 = vector.shape_cast %274 : vector<16xf32> to vector<16x1xf32>
    %cst_91 = arith.constant 6.400000e+01 : f32
    %276 = vector.broadcast %cst_91 : f32 to vector<16x1xf32>
    %277 = arith.divf %275, %276 : vector<16x1xf32>
    %278 = vector.broadcast %277 : vector<16x1xf32> to vector<16x64xf32>
    %279 = arith.subf %271, %278 : vector<16x64xf32>
    %280 = arith.mulf %279, %279 : vector<16x64xf32>
    %cst_92 = arith.constant dense<0.000000e+00> : vector<16xf32>
    %281 = vector.multi_reduction <add>, %280, %cst_92 [1] : vector<16x64xf32> to vector<16xf32>
    %282 = vector.shape_cast %281 : vector<16xf32> to vector<16x1xf32>
    %cst_93 = arith.constant 6.400000e+01 : f32
    %283 = vector.broadcast %cst_93 : f32 to vector<16x1xf32>
    %284 = arith.divf %282, %283 : vector<16x1xf32>
    %cst_94 = arith.constant 9.99999974E-6 : f32
    %285 = vector.broadcast %cst_94 : f32 to vector<16x1xf32>
    %286 = arith.addf %284, %285 : vector<16x1xf32>
    %287 = math.rsqrt %286 : vector<16x1xf32>
    %288 = vector.broadcast %287 : vector<16x1xf32> to vector<16x64xf32>
    %289 = arith.mulf %279, %288 : vector<16x64xf32>
    %290 = vector.broadcast %272 : vector<1x64xf32> to vector<16x64xf32>
    %291 = arith.mulf %289, %290 : vector<16x64xf32>
    %292 = vector.broadcast %273 : vector<1x64xf32> to vector<16x64xf32>
    %293 = arith.addf %291, %292 : vector<16x64xf32>
    %294 = arith.truncf %293 : vector<16x64xf32> to vector<16x64xbf16>
    %c0_95 = arith.constant 0 : index
    %c0_96 = arith.constant 0 : index
    %c0_97 = arith.constant 0 : index
    %295 = vector.load %arg23[%c0_95, %c0_96, %c0_97] : memref<2x64x256xbf16, #tpu.memory_space<vmem>>, vector<1x64x256xbf16>
    %296 = vector.shape_cast %295 : vector<1x64x256xbf16> to vector<64x256xbf16>
    %cst_98 = arith.constant dense<0.000000e+00> : vector<16x256xf32>
    %297 = tpu.matmul %294, %296, %cst_98 {dimension_numbers = #tpu.dot_dimension_numbers<[1], [0], [0], [1], [0, 0, 1, 1], [], []>} : vector<16x64xbf16>, vector<64x256xbf16>, vector<16x256xf32> -> vector<16x256xf32>
    %c0_99 = arith.constant 0 : index
    %c0_100 = arith.constant 0 : index
    %298 = vector.load %arg24[%c0_99, %c0_100] : memref<2x256xf32, #tpu.memory_space<vmem>>, vector<1x256xf32>
    %299 = vector.broadcast %298 : vector<1x256xf32> to vector<16x256xf32>
    %300 = arith.addf %297, %299 : vector<16x256xf32>
    %cst_101 = arith.constant 5.000000e-01 : f32
    %301 = vector.broadcast %cst_101 : f32 to vector<16x256xf32>
    %302 = arith.mulf %301, %300 : vector<16x256xf32>
    %cst_102 = arith.constant 4.471500e-02 : f32
    %303 = vector.broadcast %cst_102 : f32 to vector<16x256xf32>
    %304 = arith.mulf %303, %300 : vector<16x256xf32>
    %305 = arith.mulf %304, %300 : vector<16x256xf32>
    %306 = arith.mulf %305, %300 : vector<16x256xf32>
    %307 = arith.addf %300, %306 : vector<16x256xf32>
    %cst_103 = arith.constant 0.797884583 : f32
    %308 = vector.broadcast %cst_103 : f32 to vector<16x256xf32>
    %309 = arith.mulf %308, %307 : vector<16x256xf32>
    %310 = math.tanh %309 : vector<16x256xf32>
    %cst_104 = arith.constant 1.000000e+00 : f32
    %311 = vector.broadcast %cst_104 : f32 to vector<16x256xf32>
    %312 = arith.addf %311, %310 : vector<16x256xf32>
    %313 = arith.mulf %302, %312 : vector<16x256xf32>
    %314 = arith.truncf %313 : vector<16x256xf32> to vector<16x256xbf16>
    %c0_105 = arith.constant 0 : index
    %c0_106 = arith.constant 0 : index
    %c0_107 = arith.constant 0 : index
    %315 = vector.load %arg25[%c0_105, %c0_106, %c0_107] : memref<2x256x64xbf16, #tpu.memory_space<vmem>>, vector<1x256x64xbf16>
    %316 = vector.shape_cast %315 : vector<1x256x64xbf16> to vector<256x64xbf16>
    %cst_108 = arith.constant dense<0.000000e+00> : vector<16x64xf32>
    %317 = tpu.matmul %314, %316, %cst_108 {dimension_numbers = #tpu.dot_dimension_numbers<[1], [0], [0], [1], [0, 0, 1, 1], [], []>} : vector<16x256xbf16>, vector<256x64xbf16>, vector<16x64xf32> -> vector<16x64xf32>
    %c0_109 = arith.constant 0 : index
    %c0_110 = arith.constant 0 : index
    %318 = vector.load %arg26[%c0_109, %c0_110] : memref<2x64xf32, #tpu.memory_space<vmem>>, vector<1x64xf32>
    %319 = vector.broadcast %318 : vector<1x64xf32> to vector<16x64xf32>
    %320 = arith.addf %317, %319 : vector<16x64xf32>
    %321 = arith.addf %271, %320 : vector<16x64xf32>
    %322 = arith.addf %321, %125 : vector<16x64xf32>
    %c1 = arith.constant 1 : index
    %c0_111 = arith.constant 0 : index
    %323 = vector.load %arg15[%c1, %c0_111] : memref<2x64xf32, #tpu.memory_space<vmem>>, vector<1x64xf32>
    %c1_112 = arith.constant 1 : index
    %c0_113 = arith.constant 0 : index
    %324 = vector.load %arg16[%c1_112, %c0_113] : memref<2x64xf32, #tpu.memory_space<vmem>>, vector<1x64xf32>
    %cst_114 = arith.constant dense<0.000000e+00> : vector<16xf32>
    %325 = vector.multi_reduction <add>, %322, %cst_114 [1] : vector<16x64xf32> to vector<16xf32>
    %326 = vector.shape_cast %325 : vector<16xf32> to vector<16x1xf32>
    %cst_115 = arith.constant 6.400000e+01 : f32
    %327 = vector.broadcast %cst_115 : f32 to vector<16x1xf32>
    %328 = arith.divf %326, %327 : vector<16x1xf32>
    %329 = vector.broadcast %328 : vector<16x1xf32> to vector<16x64xf32>
    %330 = arith.subf %322, %329 : vector<16x64xf32>
    %331 = arith.mulf %330, %330 : vector<16x64xf32>
    %cst_116 = arith.constant dense<0.000000e+00> : vector<16xf32>
    %332 = vector.multi_reduction <add>, %331, %cst_116 [1] : vector<16x64xf32> to vector<16xf32>
    %333 = vector.shape_cast %332 : vector<16xf32> to vector<16x1xf32>
    %cst_117 = arith.constant 6.400000e+01 : f32
    %334 = vector.broadcast %cst_117 : f32 to vector<16x1xf32>
    %335 = arith.divf %333, %334 : vector<16x1xf32>
    %cst_118 = arith.constant 9.99999974E-6 : f32
    %336 = vector.broadcast %cst_118 : f32 to vector<16x1xf32>
    %337 = arith.addf %335, %336 : vector<16x1xf32>
    %338 = math.rsqrt %337 : vector<16x1xf32>
    %339 = vector.broadcast %338 : vector<16x1xf32> to vector<16x64xf32>
    %340 = arith.mulf %330, %339 : vector<16x64xf32>
    %341 = vector.broadcast %323 : vector<1x64xf32> to vector<16x64xf32>
    %342 = arith.mulf %340, %341 : vector<16x64xf32>
    %343 = vector.broadcast %324 : vector<1x64xf32> to vector<16x64xf32>
    %344 = arith.addf %342, %343 : vector<16x64xf32>
    %345 = arith.truncf %344 : vector<16x64xf32> to vector<16x64xbf16>
    %c1_119 = arith.constant 1 : index
    %c0_120 = arith.constant 0 : index
    %c0_121 = arith.constant 0 : index
    %346 = vector.load %arg17[%c1_119, %c0_120, %c0_121] : memref<2x64x192xbf16, #tpu.memory_space<vmem>>, vector<1x64x192xbf16>
    %347 = vector.shape_cast %346 : vector<1x64x192xbf16> to vector<64x192xbf16>
    %cst_122 = arith.constant dense<0.000000e+00> : vector<16x192xf32>
    %348 = tpu.matmul %345, %347, %cst_122 {dimension_numbers = #tpu.dot_dimension_numbers<[1], [0], [0], [1], [0, 0, 1, 1], [], []>} : vector<16x64xbf16>, vector<64x192xbf16>, vector<16x192xf32> -> vector<16x192xf32>
    %c1_123 = arith.constant 1 : index
    %c0_124 = arith.constant 0 : index
    %349 = vector.load %arg18[%c1_123, %c0_124] : memref<2x192xf32, #tpu.memory_space<vmem>>, vector<1x192xf32>
    %350 = vector.broadcast %349 : vector<1x192xf32> to vector<16x192xf32>
    %351 = arith.addf %348, %350 : vector<16x192xf32>
    %c1_125 = arith.constant 1 : index
    %c0_126 = arith.constant 0 : index
    %c0_127 = arith.constant 0 : index
    %352 = vector.load %arg19[%c1_125, %c0_126, %c0_127] : memref<2x64x64xbf16, #tpu.memory_space<vmem>>, vector<1x64x64xbf16>
    %353 = vector.shape_cast %352 : vector<1x64x64xbf16> to vector<64x64xbf16>
    %354 = arith.truncf %351 : vector<16x192xf32> to vector<16x192xbf16>
    %355 = vector.extract_strided_slice %354 {offsets = [0, 0], sizes = [16, 16], strides = [1, 1]} : vector<16x192xbf16> to vector<16x16xbf16>
    %356 = vector.extract_strided_slice %354 {offsets = [0, 64], sizes = [16, 16], strides = [1, 1]} : vector<16x192xbf16> to vector<16x16xbf16>
    %357 = vector.extract_strided_slice %354 {offsets = [0, 128], sizes = [16, 16], strides = [1, 1]} : vector<16x192xbf16> to vector<16x16xbf16>
    %cst_128 = arith.constant dense<0.000000e+00> : vector<16x16xf32>
    %358 = tpu.matmul %355, %356, %cst_128 {dimension_numbers = #tpu.dot_dimension_numbers<[1], [1], [0], [0], [0, 0, 1, 0], [], []>} : vector<16x16xbf16>, vector<16x16xbf16>, vector<16x16xf32> -> vector<16x16xf32>
    %cst_129 = arith.constant 2.500000e-01 : f32
    %359 = vector.broadcast %cst_129 : f32 to vector<16x16xf32>
    %360 = arith.mulf %358, %359 : vector<16x16xf32>
    %361 = arith.addf %360, %143 : vector<16x16xf32>
    %cst_130 = arith.constant dense<0xFF800000> : vector<16xf32>
    %362 = vector.multi_reduction <maximumf>, %361, %cst_130 [1] : vector<16x16xf32> to vector<16xf32>
    %363 = vector.shape_cast %362 : vector<16xf32> to vector<16x1xf32>
    %364 = vector.broadcast %363 : vector<16x1xf32> to vector<16x16xf32>
    %365 = arith.subf %361, %364 : vector<16x16xf32>
    %366 = math.exp %365 : vector<16x16xf32>
    %cst_131 = arith.constant dense<0.000000e+00> : vector<16xf32>
    %367 = vector.multi_reduction <add>, %366, %cst_131 [1] : vector<16x16xf32> to vector<16xf32>
    %368 = vector.shape_cast %367 : vector<16xf32> to vector<16x1xf32>
    %369 = tpu.reciprocal %368 {approx = true} : vector<16x1xf32> -> vector<16x1xf32>
    %370 = vector.broadcast %369 : vector<16x1xf32> to vector<16x16xf32>
    %371 = arith.mulf %366, %370 : vector<16x16xf32>
    %372 = arith.truncf %371 : vector<16x16xf32> to vector<16x16xbf16>
    %cst_132 = arith.constant dense<0.000000e+00> : vector<16x16xf32>
    %373 = tpu.matmul %372, %357, %cst_132 {dimension_numbers = #tpu.dot_dimension_numbers<[1], [0], [0], [1], [0, 0, 1, 1], [], []>} : vector<16x16xbf16>, vector<16x16xbf16>, vector<16x16xf32> -> vector<16x16xf32>
    %374 = arith.truncf %373 : vector<16x16xf32> to vector<16x16xbf16>
    %375 = vector.extract_strided_slice %353 {offsets = [0, 0], sizes = [16, 64], strides = [1, 1]} : vector<64x64xbf16> to vector<16x64xbf16>
    %cst_133 = arith.constant dense<0.000000e+00> : vector<16x64xf32>
    %376 = tpu.matmul %374, %375, %cst_133 {dimension_numbers = #tpu.dot_dimension_numbers<[1], [0], [0], [1], [0, 0, 1, 1], [], []>} : vector<16x16xbf16>, vector<16x64xbf16>, vector<16x64xf32> -> vector<16x64xf32>
    %377 = vector.extract_strided_slice %354 {offsets = [0, 16], sizes = [16, 16], strides = [1, 1]} : vector<16x192xbf16> to vector<16x16xbf16>
    %378 = vector.extract_strided_slice %354 {offsets = [0, 80], sizes = [16, 16], strides = [1, 1]} : vector<16x192xbf16> to vector<16x16xbf16>
    %379 = vector.extract_strided_slice %354 {offsets = [0, 144], sizes = [16, 16], strides = [1, 1]} : vector<16x192xbf16> to vector<16x16xbf16>
    %cst_134 = arith.constant dense<0.000000e+00> : vector<16x16xf32>
    %380 = tpu.matmul %377, %378, %cst_134 {dimension_numbers = #tpu.dot_dimension_numbers<[1], [1], [0], [0], [0, 0, 1, 0], [], []>} : vector<16x16xbf16>, vector<16x16xbf16>, vector<16x16xf32> -> vector<16x16xf32>
    %cst_135 = arith.constant 2.500000e-01 : f32
    %381 = vector.broadcast %cst_135 : f32 to vector<16x16xf32>
    %382 = arith.mulf %380, %381 : vector<16x16xf32>
    %383 = arith.addf %382, %143 : vector<16x16xf32>
    %cst_136 = arith.constant dense<0xFF800000> : vector<16xf32>
    %384 = vector.multi_reduction <maximumf>, %383, %cst_136 [1] : vector<16x16xf32> to vector<16xf32>
    %385 = vector.shape_cast %384 : vector<16xf32> to vector<16x1xf32>
    %386 = vector.broadcast %385 : vector<16x1xf32> to vector<16x16xf32>
    %387 = arith.subf %383, %386 : vector<16x16xf32>
    %388 = math.exp %387 : vector<16x16xf32>
    %cst_137 = arith.constant dense<0.000000e+00> : vector<16xf32>
    %389 = vector.multi_reduction <add>, %388, %cst_137 [1] : vector<16x16xf32> to vector<16xf32>
    %390 = vector.shape_cast %389 : vector<16xf32> to vector<16x1xf32>
    %391 = tpu.reciprocal %390 {approx = true} : vector<16x1xf32> -> vector<16x1xf32>
    %392 = vector.broadcast %391 : vector<16x1xf32> to vector<16x16xf32>
    %393 = arith.mulf %388, %392 : vector<16x16xf32>
    %394 = arith.truncf %393 : vector<16x16xf32> to vector<16x16xbf16>
    %cst_138 = arith.constant dense<0.000000e+00> : vector<16x16xf32>
    %395 = tpu.matmul %394, %379, %cst_138 {dimension_numbers = #tpu.dot_dimension_numbers<[1], [0], [0], [1], [0, 0, 1, 1], [], []>} : vector<16x16xbf16>, vector<16x16xbf16>, vector<16x16xf32> -> vector<16x16xf32>
    %396 = arith.truncf %395 : vector<16x16xf32> to vector<16x16xbf16>
    %397 = vector.extract_strided_slice %353 {offsets = [16, 0], sizes = [16, 64], strides = [1, 1]} : vector<64x64xbf16> to vector<16x64xbf16>
    %cst_139 = arith.constant dense<0.000000e+00> : vector<16x64xf32>
    %398 = tpu.matmul %396, %397, %cst_139 {dimension_numbers = #tpu.dot_dimension_numbers<[1], [0], [0], [1], [0, 0, 1, 1], [], []>} : vector<16x16xbf16>, vector<16x64xbf16>, vector<16x64xf32> -> vector<16x64xf32>
    %399 = arith.addf %376, %398 : vector<16x64xf32>
    %400 = vector.extract_strided_slice %354 {offsets = [0, 32], sizes = [16, 16], strides = [1, 1]} : vector<16x192xbf16> to vector<16x16xbf16>
    %401 = vector.extract_strided_slice %354 {offsets = [0, 96], sizes = [16, 16], strides = [1, 1]} : vector<16x192xbf16> to vector<16x16xbf16>
    %402 = vector.extract_strided_slice %354 {offsets = [0, 160], sizes = [16, 16], strides = [1, 1]} : vector<16x192xbf16> to vector<16x16xbf16>
    %cst_140 = arith.constant dense<0.000000e+00> : vector<16x16xf32>
    %403 = tpu.matmul %400, %401, %cst_140 {dimension_numbers = #tpu.dot_dimension_numbers<[1], [1], [0], [0], [0, 0, 1, 0], [], []>} : vector<16x16xbf16>, vector<16x16xbf16>, vector<16x16xf32> -> vector<16x16xf32>
    %cst_141 = arith.constant 2.500000e-01 : f32
    %404 = vector.broadcast %cst_141 : f32 to vector<16x16xf32>
    %405 = arith.mulf %403, %404 : vector<16x16xf32>
    %406 = arith.addf %405, %143 : vector<16x16xf32>
    %cst_142 = arith.constant dense<0xFF800000> : vector<16xf32>
    %407 = vector.multi_reduction <maximumf>, %406, %cst_142 [1] : vector<16x16xf32> to vector<16xf32>
    %408 = vector.shape_cast %407 : vector<16xf32> to vector<16x1xf32>
    %409 = vector.broadcast %408 : vector<16x1xf32> to vector<16x16xf32>
    %410 = arith.subf %406, %409 : vector<16x16xf32>
    %411 = math.exp %410 : vector<16x16xf32>
    %cst_143 = arith.constant dense<0.000000e+00> : vector<16xf32>
    %412 = vector.multi_reduction <add>, %411, %cst_143 [1] : vector<16x16xf32> to vector<16xf32>
    %413 = vector.shape_cast %412 : vector<16xf32> to vector<16x1xf32>
    %414 = tpu.reciprocal %413 {approx = true} : vector<16x1xf32> -> vector<16x1xf32>
    %415 = vector.broadcast %414 : vector<16x1xf32> to vector<16x16xf32>
    %416 = arith.mulf %411, %415 : vector<16x16xf32>
    %417 = arith.truncf %416 : vector<16x16xf32> to vector<16x16xbf16>
    %cst_144 = arith.constant dense<0.000000e+00> : vector<16x16xf32>
    %418 = tpu.matmul %417, %402, %cst_144 {dimension_numbers = #tpu.dot_dimension_numbers<[1], [0], [0], [1], [0, 0, 1, 1], [], []>} : vector<16x16xbf16>, vector<16x16xbf16>, vector<16x16xf32> -> vector<16x16xf32>
    %419 = arith.truncf %418 : vector<16x16xf32> to vector<16x16xbf16>
    %420 = vector.extract_strided_slice %353 {offsets = [32, 0], sizes = [16, 64], strides = [1, 1]} : vector<64x64xbf16> to vector<16x64xbf16>
    %cst_145 = arith.constant dense<0.000000e+00> : vector<16x64xf32>
    %421 = tpu.matmul %419, %420, %cst_145 {dimension_numbers = #tpu.dot_dimension_numbers<[1], [0], [0], [1], [0, 0, 1, 1], [], []>} : vector<16x16xbf16>, vector<16x64xbf16>, vector<16x64xf32> -> vector<16x64xf32>
    %422 = arith.addf %399, %421 : vector<16x64xf32>
    %423 = vector.extract_strided_slice %354 {offsets = [0, 48], sizes = [16, 16], strides = [1, 1]} : vector<16x192xbf16> to vector<16x16xbf16>
    %424 = vector.extract_strided_slice %354 {offsets = [0, 112], sizes = [16, 16], strides = [1, 1]} : vector<16x192xbf16> to vector<16x16xbf16>
    %425 = vector.extract_strided_slice %354 {offsets = [0, 176], sizes = [16, 16], strides = [1, 1]} : vector<16x192xbf16> to vector<16x16xbf16>
    %cst_146 = arith.constant dense<0.000000e+00> : vector<16x16xf32>
    %426 = tpu.matmul %423, %424, %cst_146 {dimension_numbers = #tpu.dot_dimension_numbers<[1], [1], [0], [0], [0, 0, 1, 0], [], []>} : vector<16x16xbf16>, vector<16x16xbf16>, vector<16x16xf32> -> vector<16x16xf32>
    %cst_147 = arith.constant 2.500000e-01 : f32
    %427 = vector.broadcast %cst_147 : f32 to vector<16x16xf32>
    %428 = arith.mulf %426, %427 : vector<16x16xf32>
    %429 = arith.addf %428, %143 : vector<16x16xf32>
    %cst_148 = arith.constant dense<0xFF800000> : vector<16xf32>
    %430 = vector.multi_reduction <maximumf>, %429, %cst_148 [1] : vector<16x16xf32> to vector<16xf32>
    %431 = vector.shape_cast %430 : vector<16xf32> to vector<16x1xf32>
    %432 = vector.broadcast %431 : vector<16x1xf32> to vector<16x16xf32>
    %433 = arith.subf %429, %432 : vector<16x16xf32>
    %434 = math.exp %433 : vector<16x16xf32>
    %cst_149 = arith.constant dense<0.000000e+00> : vector<16xf32>
    %435 = vector.multi_reduction <add>, %434, %cst_149 [1] : vector<16x16xf32> to vector<16xf32>
    %436 = vector.shape_cast %435 : vector<16xf32> to vector<16x1xf32>
    %437 = tpu.reciprocal %436 {approx = true} : vector<16x1xf32> -> vector<16x1xf32>
    %438 = vector.broadcast %437 : vector<16x1xf32> to vector<16x16xf32>
    %439 = arith.mulf %434, %438 : vector<16x16xf32>
    %440 = arith.truncf %439 : vector<16x16xf32> to vector<16x16xbf16>
    %cst_150 = arith.constant dense<0.000000e+00> : vector<16x16xf32>
    %441 = tpu.matmul %440, %425, %cst_150 {dimension_numbers = #tpu.dot_dimension_numbers<[1], [0], [0], [1], [0, 0, 1, 1], [], []>} : vector<16x16xbf16>, vector<16x16xbf16>, vector<16x16xf32> -> vector<16x16xf32>
    %442 = arith.truncf %441 : vector<16x16xf32> to vector<16x16xbf16>
    %443 = vector.extract_strided_slice %353 {offsets = [48, 0], sizes = [16, 64], strides = [1, 1]} : vector<64x64xbf16> to vector<16x64xbf16>
    %cst_151 = arith.constant dense<0.000000e+00> : vector<16x64xf32>
    %444 = tpu.matmul %442, %443, %cst_151 {dimension_numbers = #tpu.dot_dimension_numbers<[1], [0], [0], [1], [0, 0, 1, 1], [], []>} : vector<16x16xbf16>, vector<16x64xbf16>, vector<16x64xf32> -> vector<16x64xf32>
    %445 = arith.addf %422, %444 : vector<16x64xf32>
    %446 = arith.addf %322, %445 : vector<16x64xf32>
    %c1_152 = arith.constant 1 : index
    %c0_153 = arith.constant 0 : index
    %447 = vector.load %arg20[%c1_152, %c0_153] : memref<2x64xf32, #tpu.memory_space<vmem>>, vector<1x64xf32>
    %448 = vector.broadcast %447 : vector<1x64xf32> to vector<16x64xf32>
    %449 = arith.addf %446, %448 : vector<16x64xf32>
    %c1_154 = arith.constant 1 : index
    %c0_155 = arith.constant 0 : index
    %450 = vector.load %arg21[%c1_154, %c0_155] : memref<2x64xf32, #tpu.memory_space<vmem>>, vector<1x64xf32>
    %c1_156 = arith.constant 1 : index
    %c0_157 = arith.constant 0 : index
    %451 = vector.load %arg22[%c1_156, %c0_157] : memref<2x64xf32, #tpu.memory_space<vmem>>, vector<1x64xf32>
    %cst_158 = arith.constant dense<0.000000e+00> : vector<16xf32>
    %452 = vector.multi_reduction <add>, %449, %cst_158 [1] : vector<16x64xf32> to vector<16xf32>
    %453 = vector.shape_cast %452 : vector<16xf32> to vector<16x1xf32>
    %cst_159 = arith.constant 6.400000e+01 : f32
    %454 = vector.broadcast %cst_159 : f32 to vector<16x1xf32>
    %455 = arith.divf %453, %454 : vector<16x1xf32>
    %456 = vector.broadcast %455 : vector<16x1xf32> to vector<16x64xf32>
    %457 = arith.subf %449, %456 : vector<16x64xf32>
    %458 = arith.mulf %457, %457 : vector<16x64xf32>
    %cst_160 = arith.constant dense<0.000000e+00> : vector<16xf32>
    %459 = vector.multi_reduction <add>, %458, %cst_160 [1] : vector<16x64xf32> to vector<16xf32>
    %460 = vector.shape_cast %459 : vector<16xf32> to vector<16x1xf32>
    %cst_161 = arith.constant 6.400000e+01 : f32
    %461 = vector.broadcast %cst_161 : f32 to vector<16x1xf32>
    %462 = arith.divf %460, %461 : vector<16x1xf32>
    %cst_162 = arith.constant 9.99999974E-6 : f32
    %463 = vector.broadcast %cst_162 : f32 to vector<16x1xf32>
    %464 = arith.addf %462, %463 : vector<16x1xf32>
    %465 = math.rsqrt %464 : vector<16x1xf32>
    %466 = vector.broadcast %465 : vector<16x1xf32> to vector<16x64xf32>
    %467 = arith.mulf %457, %466 : vector<16x64xf32>
    %468 = vector.broadcast %450 : vector<1x64xf32> to vector<16x64xf32>
    %469 = arith.mulf %467, %468 : vector<16x64xf32>
    %470 = vector.broadcast %451 : vector<1x64xf32> to vector<16x64xf32>
    %471 = arith.addf %469, %470 : vector<16x64xf32>
    %472 = arith.truncf %471 : vector<16x64xf32> to vector<16x64xbf16>
    %c1_163 = arith.constant 1 : index
    %c0_164 = arith.constant 0 : index
    %c0_165 = arith.constant 0 : index
    %473 = vector.load %arg23[%c1_163, %c0_164, %c0_165] : memref<2x64x256xbf16, #tpu.memory_space<vmem>>, vector<1x64x256xbf16>
    %474 = vector.shape_cast %473 : vector<1x64x256xbf16> to vector<64x256xbf16>
    %cst_166 = arith.constant dense<0.000000e+00> : vector<16x256xf32>
    %475 = tpu.matmul %472, %474, %cst_166 {dimension_numbers = #tpu.dot_dimension_numbers<[1], [0], [0], [1], [0, 0, 1, 1], [], []>} : vector<16x64xbf16>, vector<64x256xbf16>, vector<16x256xf32> -> vector<16x256xf32>
    %c1_167 = arith.constant 1 : index
    %c0_168 = arith.constant 0 : index
    %476 = vector.load %arg24[%c1_167, %c0_168] : memref<2x256xf32, #tpu.memory_space<vmem>>, vector<1x256xf32>
    %477 = vector.broadcast %476 : vector<1x256xf32> to vector<16x256xf32>
    %478 = arith.addf %475, %477 : vector<16x256xf32>
    %cst_169 = arith.constant 5.000000e-01 : f32
    %479 = vector.broadcast %cst_169 : f32 to vector<16x256xf32>
    %480 = arith.mulf %479, %478 : vector<16x256xf32>
    %cst_170 = arith.constant 4.471500e-02 : f32
    %481 = vector.broadcast %cst_170 : f32 to vector<16x256xf32>
    %482 = arith.mulf %481, %478 : vector<16x256xf32>
    %483 = arith.mulf %482, %478 : vector<16x256xf32>
    %484 = arith.mulf %483, %478 : vector<16x256xf32>
    %485 = arith.addf %478, %484 : vector<16x256xf32>
    %cst_171 = arith.constant 0.797884583 : f32
    %486 = vector.broadcast %cst_171 : f32 to vector<16x256xf32>
    %487 = arith.mulf %486, %485 : vector<16x256xf32>
    %488 = math.tanh %487 : vector<16x256xf32>
    %cst_172 = arith.constant 1.000000e+00 : f32
    %489 = vector.broadcast %cst_172 : f32 to vector<16x256xf32>
    %490 = arith.addf %489, %488 : vector<16x256xf32>
    %491 = arith.mulf %480, %490 : vector<16x256xf32>
    %492 = arith.truncf %491 : vector<16x256xf32> to vector<16x256xbf16>
    %c1_173 = arith.constant 1 : index
    %c0_174 = arith.constant 0 : index
    %c0_175 = arith.constant 0 : index
    %493 = vector.load %arg25[%c1_173, %c0_174, %c0_175] : memref<2x256x64xbf16, #tpu.memory_space<vmem>>, vector<1x256x64xbf16>
    %494 = vector.shape_cast %493 : vector<1x256x64xbf16> to vector<256x64xbf16>
    %cst_176 = arith.constant dense<0.000000e+00> : vector<16x64xf32>
    %495 = tpu.matmul %492, %494, %cst_176 {dimension_numbers = #tpu.dot_dimension_numbers<[1], [0], [0], [1], [0, 0, 1, 1], [], []>} : vector<16x256xbf16>, vector<256x64xbf16>, vector<16x64xf32> -> vector<16x64xf32>
    %c1_177 = arith.constant 1 : index
    %c0_178 = arith.constant 0 : index
    %496 = vector.load %arg26[%c1_177, %c0_178] : memref<2x64xf32, #tpu.memory_space<vmem>>, vector<1x64xf32>
    %497 = vector.broadcast %496 : vector<1x64xf32> to vector<16x64xf32>
    %498 = arith.addf %495, %497 : vector<16x64xf32>
    %499 = arith.addf %449, %498 : vector<16x64xf32>
    %c0_179 = arith.constant 0 : index
    %c0_180 = arith.constant 0 : index
    %500 = vector.load %arg27[%c0_179, %c0_180] : memref<1x64xf32, #tpu.memory_space<vmem>>, vector<1x64xf32>
    %c0_181 = arith.constant 0 : index
    %c0_182 = arith.constant 0 : index
    %501 = vector.load %arg28[%c0_181, %c0_182] : memref<1x64xf32, #tpu.memory_space<vmem>>, vector<1x64xf32>
    %cst_183 = arith.constant dense<0.000000e+00> : vector<16xf32>
    %502 = vector.multi_reduction <add>, %499, %cst_183 [1] : vector<16x64xf32> to vector<16xf32>
    %503 = vector.shape_cast %502 : vector<16xf32> to vector<16x1xf32>
    %cst_184 = arith.constant 6.400000e+01 : f32
    %504 = vector.broadcast %cst_184 : f32 to vector<16x1xf32>
    %505 = arith.divf %503, %504 : vector<16x1xf32>
    %506 = vector.broadcast %505 : vector<16x1xf32> to vector<16x64xf32>
    %507 = arith.subf %499, %506 : vector<16x64xf32>
    %508 = arith.mulf %507, %507 : vector<16x64xf32>
    %cst_185 = arith.constant dense<0.000000e+00> : vector<16xf32>
    %509 = vector.multi_reduction <add>, %508, %cst_185 [1] : vector<16x64xf32> to vector<16xf32>
    %510 = vector.shape_cast %509 : vector<16xf32> to vector<16x1xf32>
    %cst_186 = arith.constant 6.400000e+01 : f32
    %511 = vector.broadcast %cst_186 : f32 to vector<16x1xf32>
    %512 = arith.divf %510, %511 : vector<16x1xf32>
    %cst_187 = arith.constant 9.99999997E-7 : f32
    %513 = vector.broadcast %cst_187 : f32 to vector<16x1xf32>
    %514 = arith.addf %512, %513 : vector<16x1xf32>
    %515 = math.rsqrt %514 : vector<16x1xf32>
    %516 = vector.broadcast %515 : vector<16x1xf32> to vector<16x64xf32>
    %517 = arith.mulf %507, %516 : vector<16x64xf32>
    %518 = vector.broadcast %500 : vector<1x64xf32> to vector<16x64xf32>
    %519 = arith.mulf %517, %518 : vector<16x64xf32>
    %520 = vector.broadcast %501 : vector<1x64xf32> to vector<16x64xf32>
    %521 = arith.addf %519, %520 : vector<16x64xf32>
    %c0_188 = arith.constant 0 : index
    %c0_189 = arith.constant 0 : index
    %522 = vector.load %arg29[%c0_188, %c0_189] : memref<16x64xf32, #tpu.memory_space<vmem>>, vector<16x64xf32>
    tpu.vector_store %arg29[%c0_188, %c0_189], %521 {strides = array<i32>} : memref<16x64xf32, #tpu.memory_space<vmem>>, vector<16x64xf32>,
    return
  }
  func.func @transform_0(%arg0: i32) -> (i32, i32, i32) {
    %c0_i32 = arith.constant 0 : i32
    %c0_i32_0 = arith.constant 0 : i32
    %c0_i32_1 = arith.constant 0 : i32
    return %c0_i32, %arg0, %c0_i32_0 : i32, i32, i32
  }
  func.func @transform_1(%arg0: i32) -> (i32, i32) {
    %c0_i32 = arith.constant 0 : i32
    %c0_i32_0 = arith.constant 0 : i32
    return %arg0, %c0_i32 : i32, i32
  }
  func.func @transform_2(%arg0: i32) -> (i32, i32) {
    %c0_i32 = arith.constant 0 : i32
    %c0_i32_0 = arith.constant 0 : i32
    %c0_i32_1 = arith.constant 0 : i32
    return %c0_i32, %c0_i32_0 : i32, i32
  }
  func.func @transform_3(%arg0: i32) -> (i32, i32) {
    %c0_i32 = arith.constant 0 : i32
    %c0_i32_0 = arith.constant 0 : i32
    %c0_i32_1 = arith.constant 0 : i32
    return %c0_i32, %c0_i32_0 : i32, i32
  }
  func.func @transform_4(%arg0: i32) -> (i32, i32) {
    %c0_i32 = arith.constant 0 : i32
    %c0_i32_0 = arith.constant 0 : i32
    %c0_i32_1 = arith.constant 0 : i32
    return %c0_i32, %c0_i32_0 : i32, i32
  }
  func.func @transform_5(%arg0: i32) -> (i32, i32) {
    %c0_i32 = arith.constant 0 : i32
    %c0_i32_0 = arith.constant 0 : i32
    %c0_i32_1 = arith.constant 0 : i32
    return %c0_i32, %c0_i32_0 : i32, i32
  }
  func.func @transform_6(%arg0: i32) -> (i32, i32) {
    %c0_i32 = arith.constant 0 : i32
    %c0_i32_0 = arith.constant 0 : i32
    %c0_i32_1 = arith.constant 0 : i32
    return %c0_i32, %c0_i32_0 : i32, i32
  }
  func.func @transform_7(%arg0: i32) -> (i32, i32) {
    %c0_i32 = arith.constant 0 : i32
    %c0_i32_0 = arith.constant 0 : i32
    %c0_i32_1 = arith.constant 0 : i32
    return %c0_i32, %c0_i32_0 : i32, i32
  }
  func.func @transform_8(%arg0: i32) -> (i32, i32) {
    %c0_i32 = arith.constant 0 : i32
    %c0_i32_0 = arith.constant 0 : i32
    %c0_i32_1 = arith.constant 0 : i32
    return %c0_i32, %c0_i32_0 : i32, i32
  }
  func.func @transform_9(%arg0: i32) -> (i32, i32) {
    %c0_i32 = arith.constant 0 : i32
    %c0_i32_0 = arith.constant 0 : i32
    %c0_i32_1 = arith.constant 0 : i32
    return %c0_i32, %c0_i32_0 : i32, i32
  }
  func.func @transform_10(%arg0: i32) -> (i32, i32) {
    %c0_i32 = arith.constant 0 : i32
    %c0_i32_0 = arith.constant 0 : i32
    %c0_i32_1 = arith.constant 0 : i32
    return %c0_i32, %c0_i32_0 : i32, i32
  }
  func.func @transform_11(%arg0: i32) -> (i32, i32) {
    %c0_i32 = arith.constant 0 : i32
    %c0_i32_0 = arith.constant 0 : i32
    %c0_i32_1 = arith.constant 0 : i32
    return %c0_i32, %c0_i32_0 : i32, i32
  }
  func.func @transform_12(%arg0: i32) -> (i32, i32) {
    %c0_i32 = arith.constant 0 : i32
    %c0_i32_0 = arith.constant 0 : i32
    %c0_i32_1 = arith.constant 0 : i32
    return %c0_i32, %c0_i32_0 : i32, i32
  }
  func.func @transform_13(%arg0: i32) -> (i32, i32) {
    %c0_i32 = arith.constant 0 : i32
    %c0_i32_0 = arith.constant 0 : i32
    %c0_i32_1 = arith.constant 0 : i32
    return %c0_i32, %c0_i32_0 : i32, i32
  }
  func.func @transform_14(%arg0: i32) -> (i32, i32) {
    %c0_i32 = arith.constant 0 : i32
    %c0_i32_0 = arith.constant 0 : i32
    %c0_i32_1 = arith.constant 0 : i32
    return %c0_i32, %c0_i32_0 : i32, i32
  }
  func.func @transform_15(%arg0: i32) -> (i32, i32) {
    %c0_i32 = arith.constant 0 : i32
    %c0_i32_0 = arith.constant 0 : i32
    %c0_i32_1 = arith.constant 0 : i32
    return %c0_i32, %c0_i32_0 : i32, i32
  }
  func.func @transform_16(%arg0: i32) -> (i32, i32, i32) {
    %c0_i32 = arith.constant 0 : i32
    %c0_i32_0 = arith.constant 0 : i32
    %c0_i32_1 = arith.constant 0 : i32
    %c0_i32_2 = arith.constant 0 : i32
    return %c0_i32, %c0_i32_0, %c0_i32_1 : i32, i32, i32
  }
  func.func @transform_17(%arg0: i32) -> (i32, i32) {
    %c0_i32 = arith.constant 0 : i32
    %c0_i32_0 = arith.constant 0 : i32
    %c0_i32_1 = arith.constant 0 : i32
    return %c0_i32, %c0_i32_0 : i32, i32
  }
  func.func @transform_18(%arg0: i32) -> (i32, i32, i32) {
    %c0_i32 = arith.constant 0 : i32
    %c0_i32_0 = arith.constant 0 : i32
    %c0_i32_1 = arith.constant 0 : i32
    %c0_i32_2 = arith.constant 0 : i32
    return %c0_i32, %c0_i32_0, %c0_i32_1 : i32, i32, i32
  }
  func.func @transform_19(%arg0: i32) -> (i32, i32) {
    %c0_i32 = arith.constant 0 : i32
    %c0_i32_0 = arith.constant 0 : i32
    %c0_i32_1 = arith.constant 0 : i32
    return %c0_i32, %c0_i32_0 : i32, i32
  }
  func.func @transform_20(%arg0: i32) -> (i32, i32) {
    %c0_i32 = arith.constant 0 : i32
    %c0_i32_0 = arith.constant 0 : i32
    %c0_i32_1 = arith.constant 0 : i32
    return %c0_i32, %c0_i32_0 : i32, i32
  }
  func.func @transform_21(%arg0: i32) -> (i32, i32) {
    %c0_i32 = arith.constant 0 : i32
    %c0_i32_0 = arith.constant 0 : i32
    %c0_i32_1 = arith.constant 0 : i32
    return %c0_i32, %c0_i32_0 : i32, i32
  }
  func.func @transform_22(%arg0: i32) -> (i32, i32, i32) {
    %c0_i32 = arith.constant 0 : i32
    %c0_i32_0 = arith.constant 0 : i32
    %c0_i32_1 = arith.constant 0 : i32
    %c0_i32_2 = arith.constant 0 : i32
    return %c0_i32, %c0_i32_0, %c0_i32_1 : i32, i32, i32
  }
  func.func @transform_23(%arg0: i32) -> (i32, i32) {
    %c0_i32 = arith.constant 0 : i32
    %c0_i32_0 = arith.constant 0 : i32
    %c0_i32_1 = arith.constant 0 : i32
    return %c0_i32, %c0_i32_0 : i32, i32
  }
  func.func @transform_24(%arg0: i32) -> (i32, i32, i32) {
    %c0_i32 = arith.constant 0 : i32
    %c0_i32_0 = arith.constant 0 : i32
    %c0_i32_1 = arith.constant 0 : i32
    %c0_i32_2 = arith.constant 0 : i32
    return %c0_i32, %c0_i32_0, %c0_i32_1 : i32, i32, i32
  }
  func.func @transform_25(%arg0: i32) -> (i32, i32) {
    %c0_i32 = arith.constant 0 : i32
    %c0_i32_0 = arith.constant 0 : i32
    %c0_i32_1 = arith.constant 0 : i32
    return %c0_i32, %c0_i32_0 : i32, i32
  }
  func.func @transform_26(%arg0: i32) -> (i32, i32) {
    %c0_i32 = arith.constant 0 : i32
    %c0_i32_0 = arith.constant 0 : i32
    %c0_i32_1 = arith.constant 0 : i32
    return %c0_i32, %c0_i32_0 : i32, i32
  }
  func.func @transform_27(%arg0: i32) -> (i32, i32) {
    %c0_i32 = arith.constant 0 : i32
    %c0_i32_0 = arith.constant 0 : i32
    %c0_i32_1 = arith.constant 0 : i32
    return %c0_i32, %c0_i32_0 : i32, i32
  }
  func.func @transform_28(%arg0: i32) -> (i32, i32) {
    %c0_i32 = arith.constant 0 : i32
    %c0_i32_0 = arith.constant 0 : i32
    return %arg0, %c0_i32 : i32, i32
  }
}

</mosaic_0001>

<bundles_post_ra>
// kernel: neg.1
= control target key start
LH: loop header
LB: loop body
LE: loop exit
PB: predicated region body
PF: predicated region fallthrough
CT: control target
= control target key end

     0   :  { %s40_s0 = inlined_call_operand.vmem [shape: f32[2,8,64], index: 0, kind: input, shape index: {}]   ;;  %s41_s1 = inlined_call_operand.vmem [shape: f32[2,8,64], index: 1, kind: output, shape index: {}]  }
   0x1   :  { %v2_v0 = vld [vmem:[%s40_s0] sm:$0xff]  ;;  %v16_v1 = vld [vmem:[%s40_s0 + $0x8] sm:$0xff] }
   0x2   :  { %v5_v2 = vxor.u32 2147483648, %v2_v0  ;;  %v12_v3 = vxor.u32 2147483648, %v16_v1 }
   0x4   :  { %7 = vst [vmem:[%s41_s1] sm:$0xff] %v5_v2  ;;  %17 = vst [vmem:[%s41_s1 + $0x8] sm:$0xff] %v12_v3 }

// kernel: sub.12
= control target key start
LH: loop header
LB: loop body
LE: loop exit
PB: predicated region body
PF: predicated region fallthrough
CT: control target
= control target key end

     0   :  { %s874_s0 = inlined_call_operand.vmem [shape: f32[2,64,3], index: 0, kind: input, shape index: {}]   ;;  %s875_s1 = inlined_call_operand.vmem [shape: f32[2,8,64,3], index: 1, kind: output, shape index: {}]  }
   0x1   :  { %v4_v0 = vld [vmem:[%s874_s0] sm:$0xff]  ;;  %v306_v2 = vld [vmem:[%s874_s0 + $0x8] sm:$0xff]  ;;  %v324_v4 = vld [vmem:[%s874_s0 + $0x10] sm:$0xff] }
   0x2   :  { %v290_v1 = vld [vmem:[%s874_s0 + $0x40] sm:$0xff]  ;;  %5 = vst [vmem:[%s875_s1] sm:$0xff] %v4_v0  ;;  %292 = vst [vmem:[%s875_s1 + $0x40] sm:$0xff] %v4_v0  ;;  %v308_v3 = vld [vmem:[%s874_s0 + $0x48] sm:$0xff] }
   0x3   :  { %291 = vst [vmem:[%s875_s1 + $0x200] sm:$0xff] %v290_v1  ;;  %293 = vst [vmem:[%s875_s1 + $0x240] sm:$0xff] %v290_v1  ;;  %v326_v5 = vld [vmem:[%s874_s0 + $0x50] sm:$0xff]  ;;  %v342_v6 = vld [vmem:[%s874_s0 + $0x18] sm:$0xff] }
   0x4   :  { %294 = vst [vmem:[%s875_s1 + $0x80] sm:$0xff] %v4_v0  ;;  %295 = vst [vmem:[%s875_s1 + $0x280] sm:$0xff] %v290_v1  ;;  %v344_v7 = vld [vmem:[%s874_s0 + $0x58] sm:$0xff]  ;;  %v360_v8 = vld [vmem:[%s874_s0 + $0x20] sm:$0xff] }
   0x5   :  { %296 = vst [vmem:[%s875_s1 + $0xc0] sm:$0xff] %v4_v0  ;;  %297 = vst [vmem:[%s875_s1 + $0x2c0] sm:$0xff] %v290_v1  ;;  %v362_v9 = vld [vmem:[%s874_s0 + $0x60] sm:$0xff]  ;;  %v378_v10 = vld [vmem:[%s874_s0 + $0x28] sm:$0xff] }
   0x6   :  { %298 = vst [vmem:[%s875_s1 + $0x100] sm:$0xff] %v4_v0  ;;  %299 = vst [vmem:[%s875_s1 + $0x300] sm:$0xff] %v290_v1  ;;  %v380_v11 = vld [vmem:[%s874_s0 + $0x68] sm:$0xff]  ;;  %v396_v12 = vld [vmem:[%s874_s0 + $0x30] sm:$0xff] }
   0x7   :  { %300 = vst [vmem:[%s875_s1 + $0x140] sm:$0xff] %v4_v0  ;;  %301 = vst [vmem:[%s875_s1 + $0x340] sm:$0xff] %v290_v1  ;;  %v398_v13 = vld [vmem:[%s874_s0 + $0x70] sm:$0xff]  ;;  %v414_v14 = vld [vmem:[%s874_s0 + $0x38] sm:$0xff] }
   0x8   :  { %302 = vst [vmem:[%s875_s1 + $0x180] sm:$0xff] %v4_v0  ;;  %303 = vst [vmem:[%s875_s1 + $0x380] sm:$0xff] %v290_v1  ;;  %v416_v15 = vld [vmem:[%s874_s0 + $0x78] sm:$0xff] }
   0x9   :  { %304 = vst [vmem:[%s875_s1 + $0x1c0] sm:$0xff] %v4_v0  ;;  %305 = vst [vmem:[%s875_s1 + $0x3c0] sm:$0xff] %v290_v1 }
   0xa   :  { %307 = vst [vmem:[%s875_s1 + $0x8] sm:$0xff] %v306_v2  ;;  %310 = vst [vmem:[%s875_s1 + $0x48] sm:$0xff] %v306_v2 }
   0xb   :  { %312 = vst [vmem:[%s875_s1 + $0x88] sm:$0xff] %v306_v2  ;;  %314 = vst [vmem:[%s875_s1 + $0xc8] sm:$0xff] %v306_v2 }
   0xc   :  { %316 = vst [vmem:[%s875_s1 + $0x108] sm:$0xff] %v306_v2  ;;  %318 = vst [vmem:[%s875_s1 + $0x148] sm:$0xff] %v306_v2 }
   0xd   :  { %320 = vst [vmem:[%s875_s1 + $0x188] sm:$0xff] %v306_v2  ;;  %322 = vst [vmem:[%s875_s1 + $0x1c8] sm:$0xff] %v306_v2 }
   0xe   :  { %309 = vst [vmem:[%s875_s1 + $0x208] sm:$0xff] %v308_v3  ;;  %311 = vst [vmem:[%s875_s1 + $0x248] sm:$0xff] %v308_v3 }
   0xf   :  { %313 = vst [vmem:[%s875_s1 + $0x288] sm:$0xff] %v308_v3  ;;  %315 = vst [vmem:[%s875_s1 + $0x2c8] sm:$0xff] %v308_v3 }
  0x10   :  { %317 = vst [vmem:[%s875_s1 + $0x308] sm:$0xff] %v308_v3  ;;  %319 = vst [vmem:[%s875_s1 + $0x348] sm:$0xff] %v308_v3 }
  0x11   :  { %321 = vst [vmem:[%s875_s1 + $0x388] sm:$0xff] %v308_v3  ;;  %323 = vst [vmem:[%s875_s1 + $0x3c8] sm:$0xff] %v308_v3 }
  0x12   :  { %325 = vst [vmem:[%s875_s1 + $0x10] sm:$0xff] %v324_v4  ;;  %327 = vst [vmem:[%s875_s1 + $0x210] sm:$0xff] %v326_v5 }
  0x13   :  { %328 = vst [vmem:[%s875_s1 + $0x50] sm:$0xff] %v324_v4  ;;  %329 = vst [vmem:[%s875_s1 + $0x250] sm:$0xff] %v326_v5 }
  0x14   :  { %330 = vst [vmem:[%s875_s1 + $0x90] sm:$0xff] %v324_v4  ;;  %331 = vst [vmem:[%s875_s1 + $0x290] sm:$0xff] %v326_v5 }
  0x15   :  { %332 = vst [vmem:[%s875_s1 + $0xd0] sm:$0xff] %v324_v4  ;;  %333 = vst [vmem:[%s875_s1 + $0x2d0] sm:$0xff] %v326_v5 }
  0x16   :  { %334 = vst [vmem:[%s875_s1 + $0x110] sm:$0xff] %v324_v4  ;;  %335 = vst [vmem:[%s875_s1 + $0x310] sm:$0xff] %v326_v5 }
  0x17   :  { %336 = vst [vmem:[%s875_s1 + $0x150] sm:$0xff] %v324_v4  ;;  %337 = vst [vmem:[%s875_s1 + $0x350] sm:$0xff] %v326_v5 }
  0x18   :  { %338 = vst [vmem:[%s875_s1 + $0x190] sm:$0xff] %v324_v4  ;;  %339 = vst [vmem:[%s875_s1 + $0x390] sm:$0xff] %v326_v5 }
  0x19   :  { %340 = vst [vmem:[%s875_s1 + $0x1d0] sm:$0xff] %v324_v4  ;;  %341 = vst [vmem:[%s875_s1 + $0x3d0] sm:$0xff] %v326_v5 }
  0x1a   :  { %343 = vst [vmem:[%s875_s1 + $0x18] sm:$0xff] %v342_v6  ;;  %345 = vst [vmem:[%s875_s1 + $0x218] sm:$0xff] %v344_v7 }
  0x1b   :  { %346 = vst [vmem:[%s875_s1 + $0x58] sm:$0xff] %v342_v6  ;;  %347 = vst [vmem:[%s875_s1 + $0x258] sm:$0xff] %v344_v7 }
  0x1c   :  { %348 = vst [vmem:[%s875_s1 + $0x98] sm:$0xff] %v342_v6  ;;  %349 = vst [vmem:[%s875_s1 + $0x298] sm:$0xff] %v344_v7 }
  0x1d   :  { %350 = vst [vmem:[%s875_s1 + $0xd8] sm:$0xff] %v342_v6  ;;  %351 = vst [vmem:[%s875_s1 + $0x2d8] sm:$0xff] %v344_v7 }
  0x1e   :  { %352 = vst [vmem:[%s875_s1 + $0x118] sm:$0xff] %v342_v6  ;;  %353 = vst [vmem:[%s875_s1 + $0x318] sm:$0xff] %v344_v7 }
  0x1f   :  { %354 = vst [vmem:[%s875_s1 + $0x158] sm:$0xff] %v342_v6  ;;  %355 = vst [vmem:[%s875_s1 + $0x358] sm:$0xff] %v344_v7 }
  0x20   :  { %356 = vst [vmem:[%s875_s1 + $0x198] sm:$0xff] %v342_v6  ;;  %357 = vst [vmem:[%s875_s1 + $0x398] sm:$0xff] %v344_v7 }
  0x21   :  { %358 = vst [vmem:[%s875_s1 + $0x1d8] sm:$0xff] %v342_v6  ;;  %359 = vst [vmem:[%s875_s1 + $0x3d8] sm:$0xff] %v344_v7 }
  0x22   :  { %361 = vst [vmem:[%s875_s1 + $0x20] sm:$0xff] %v360_v8  ;;  %364 = vst [vmem:[%s875_s1 + $0x60] sm:$0xff] %v360_v8 }
  0x23   :  { %366 = vst [vmem:[%s875_s1 + $0xa0] sm:$0xff] %v360_v8  ;;  %368 = vst [vmem:[%s875_s1 + $0xe0] sm:$0xff] %v360_v8 }
  0x24   :  { %370 = vst [vmem:[%s875_s1 + $0x120] sm:$0xff] %v360_v8  ;;  %372 = vst [vmem:[%s875_s1 + $0x160] sm:$0xff] %v360_v8 }
  0x25   :  { %374 = vst [vmem:[%s875_s1 + $0x1a0] sm:$0xff] %v360_v8  ;;  %376 = vst [vmem:[%s875_s1 + $0x1e0] sm:$0xff] %v360_v8 }
  0x26   :  { %363 = vst [vmem:[%s875_s1 + $0x220] sm:$0xff] %v362_v9  ;;  %365 = vst [vmem:[%s875_s1 + $0x260] sm:$0xff] %v362_v9 }
  0x27   :  { %367 = vst [vmem:[%s875_s1 + $0x2a0] sm:$0xff] %v362_v9  ;;  %369 = vst [vmem:[%s875_s1 + $0x2e0] sm:$0xff] %v362_v9 }
  0x28   :  { %371 = vst [vmem:[%s875_s1 + $0x320] sm:$0xff] %v362_v9  ;;  %373 = vst [vmem:[%s875_s1 + $0x360] sm:$0xff] %v362_v9 }
  0x29   :  { %375 = vst [vmem:[%s875_s1 + $0x3a0] sm:$0xff] %v362_v9  ;;  %377 = vst [vmem:[%s875_s1 + $0x3e0] sm:$0xff] %v362_v9 }
  0x2a   :  { %379 = vst [vmem:[%s875_s1 + $0x28] sm:$0xff] %v378_v10  ;;  %381 = vst [vmem:[%s875_s1 + $0x228] sm:$0xff] %v380_v11 }
  0x2b   :  { %382 = vst [vmem:[%s875_s1 + $0x68] sm:$0xff] %v378_v10  ;;  %383 = vst [vmem:[%s875_s1 + $0x268] sm:$0xff] %v380_v11 }
  0x2c   :  { %384 = vst [vmem:[%s875_s1 + $0xa8] sm:$0xff] %v378_v10  ;;  %385 = vst [vmem:[%s875_s1 + $0x2a8] sm:$0xff] %v380_v11 }
  0x2d   :  { %386 = vst [vmem:[%s875_s1 + $0xe8] sm:$0xff] %v378_v10  ;;  %387 = vst [vmem:[%s875_s1 + $0x2e8] sm:$0xff] %v380_v11 }
  0x2e   :  { %388 = vst [vmem:[%s875_s1 + $0x128] sm:$0xff] %v378_v10  ;;  %389 = vst [vmem:[%s875_s1 + $0x328] sm:$0xff] %v380_v11 }
  0x2f   :  { %390 = vst [vmem:[%s875_s1 + $0x168] sm:$0xff] %v378_v10  ;;  %391 = vst [vmem:[%s875_s1 + $0x368] sm:$0xff] %v380_v11 }
  0x30   :  { %392 = vst [vmem:[%s875_s1 + $0x1a8] sm:$0xff] %v378_v10  ;;  %393 = vst [vmem:[%s875_s1 + $0x3a8] sm:$0xff] %v380_v11 }
  0x31   :  { %394 = vst [vmem:[%s875_s1 + $0x1e8] sm:$0xff] %v378_v10  ;;  %395 = vst [vmem:[%s875_s1 + $0x3e8] sm:$0xff] %v380_v11 }
  0x32   :  { %397 = vst [vmem:[%s875_s1 + $0x30] sm:$0xff] %v396_v12  ;;  %399 = vst [vmem:[%s875_s1 + $0x230] sm:$0xff] %v398_v13 }
  0x33   :  { %400 = vst [vmem:[%s875_s1 + $0x70] sm:$0xff] %v396_v12  ;;  %401 = vst [vmem:[%s875_s1 + $0x270] sm:$0xff] %v398_v13 }
  0x34   :  { %402 = vst [vmem:[%s875_s1 + $0xb0] sm:$0xff] %v396_v12  ;;  %403 = vst [vmem:[%s875_s1 + $0x2b0] sm:$0xff] %v398_v13 }
  0x35   :  { %404 = vst [vmem:[%s875_s1 + $0xf0] sm:$0xff] %v396_v12  ;;  %405 = vst [vmem:[%s875_s1 + $0x2f0] sm:$0xff] %v398_v13 }
  0x36   :  { %406 = vst [vmem:[%s875_s1 + $0x130] sm:$0xff] %v396_v12  ;;  %407 = vst [vmem:[%s875_s1 + $0x330] sm:$0xff] %v398_v13 }
  0x37   :  { %408 = vst [vmem:[%s875_s1 + $0x170] sm:$0xff] %v396_v12  ;;  %409 = vst [vmem:[%s875_s1 + $0x370] sm:$0xff] %v398_v13 }
  0x38   :  { %410 = vst [vmem:[%s875_s1 + $0x1b0] sm:$0xff] %v396_v12  ;;  %411 = vst [vmem:[%s875_s1 + $0x3b0] sm:$0xff] %v398_v13 }
  0x39   :  { %412 = vst [vmem:[%s875_s1 + $0x1f0] sm:$0xff] %v396_v12  ;;  %413 = vst [vmem:[%s875_s1 + $0x3f0] sm:$0xff] %v398_v13 }
  0x3a   :  { %415 = vst [vmem:[%s875_s1 + $0x38] sm:$0xff] %v414_v14  ;;  %418 = vst [vmem:[%s875_s1 + $0x78] sm:$0xff] %v414_v14 }
  0x3b   :  { %420 = vst [vmem:[%s875_s1 + $0xb8] sm:$0xff] %v414_v14  ;;  %422 = vst [vmem:[%s875_s1 + $0xf8] sm:$0xff] %v414_v14 }
  0x3c   :  { %424 = vst [vmem:[%s875_s1 + $0x138] sm:$0xff] %v414_v14  ;;  %426 = vst [vmem:[%s875_s1 + $0x178] sm:$0xff] %v414_v14 }
  0x3d   :  { %428 = vst [vmem:[%s875_s1 + $0x1b8] sm:$0xff] %v414_v14  ;;  %430 = vst [vmem:[%s875_s1 + $0x1f8] sm:$0xff] %v414_v14 }
  0x3e   :  { %417 = vst [vmem:[%s875_s1 + $0x238] sm:$0xff] %v416_v15  ;;  %419 = vst [vmem:[%s875_s1 + $0x278] sm:$0xff] %v416_v15 }
  0x3f   :  { %421 = vst [vmem:[%s875_s1 + $0x2b8] sm:$0xff] %v416_v15  ;;  %423 = vst [vmem:[%s875_s1 + $0x2f8] sm:$0xff] %v416_v15 }
  0x40   :  { %425 = vst [vmem:[%s875_s1 + $0x338] sm:$0xff] %v416_v15  ;;  %427 = vst [vmem:[%s875_s1 + $0x378] sm:$0xff] %v416_v15 }
  0x41   :  { %429 = vst [vmem:[%s875_s1 + $0x3b8] sm:$0xff] %v416_v15  ;;  %431 = vst [vmem:[%s875_s1 + $0x3f8] sm:$0xff] %v416_v15 }

// kernel: meta_transformer_forward.1
= control target key start
LH: loop header
LB: loop body
LE: loop exit
PB: predicated region body
PF: predicated region fallthrough
CT: control target
= control target key end

     0   :  { %s5906_s0 = inlined_call_operand.vmem [shape: f32[8,16,3], index: 0, kind: input, shape index: {}]   ;;  %s5907_s1 = inlined_call_operand.vmem [shape: f32[16,3], index: 1, kind: input, shape index: {}]   ;;  %s5908_s2 = inlined_call_operand.vmem [shape: f32[3,32], index: 2, kind: input, shape index: {}]   ;;  %s5909_s3 = inlined_call_operand.vmem [shape: f32[1,32], index: 3, kind: input, shape index: {}]   ;;  %s5910_s4 = inlined_call_operand.vmem [shape: bf16[32,32], index: 4, kind: input, shape index: {}]   ;;  %s5911_s5 = inlined_call_operand.vmem [shape: f32[1,32], index: 5, kind: input, shape index: {}]   ;;  %s5912_s6 = inlined_call_operand.vmem [shape: bf16[32,64], index: 6, kind: input, shape index: {}]   ;;  %s5913_s7 = inlined_call_operand.vmem [shape: f32[1,64], index: 7, kind: input, shape index: {}]   ;;  %s5914_s8 = inlined_call_operand.vmem [shape: f32[1,64], index: 8, kind: input, shape index: {}]   ;;  %s5915_s9 = inlined_call_operand.vmem [shape: f32[1,64], index: 9, kind: input, shape index: {}]   ;;  %s5916_s10 = inlined_call_operand.vmem [shape: f32[3,128], index: 10, kind: input, shape index: {}]   ;;  %s5917_s11 = inlined_call_operand.vmem [shape: f32[1,128], index: 11, kind: input, shape index: {}]   ;;  %s5918_s12 = inlined_call_operand.vmem [shape: bf16[128,64], index: 12, kind: input, shape index: {}]   ;;  %s5919_s13 = inlined_call_operand.vmem [shape: f32[1,64], index: 13, kind: input, shape index: {}]   ;;  %s5920_s14 = inlined_call_operand.vmem [shape: f32[2,64], index: 14, kind: input, shape index: {}]   ;;  %s5921_s15 = inlined_call_operand.vmem [shape: f32[2,64], index: 15, kind: input, shape index: {}]   ;;  %s5922_s16 = inlined_call_operand.vmem [shape: bf16[2,64,192], index: 16, kind: input, shape index: {}]   ;;  %s5923_s17 = inlined_call_operand.vmem [shape: f32[2,192], index: 17, kind: input, shape index: {}]   ;;  %s5924_s18 = inlined_call_operand.vmem [shape: bf16[2,64,64], index: 18, kind: input, shape index: {}]   ;;  %s5925_s19 = inlined_call_operand.vmem [shape: f32[2,64], index: 19, kind: input, shape index: {}]   ;;  %s5926_s20 = inlined_call_operand.vmem [shape: f32[2,64], index: 20, kind: input, shape index: {}]   ;;  %s5927_s21 = inlined_call_operand.vmem [shape: f32[2,64], index: 21, kind: input, shape index: {}]   ;;  %s5928_s22 = inlined_call_operand.vmem [shape: bf16[2,64,256], index: 22, kind: input, shape index: {}]   ;;  %s5929_s23 = inlined_call_operand.vmem [shape: f32[2,256], index: 23, kind: input, shape index: {}]   ;;  %s5930_s24 = inlined_call_operand.vmem [shape: bf16[2,256,64], index: 24, kind: input, shape index: {}]   ;;  %s5931_s25 = inlined_call_operand.vmem [shape: f32[2,64], index: 25, kind: input, shape index: {}]   ;;  %s5932_s26 = inlined_call_operand.vmem [shape: f32[1,64], index: 26, kind: input, shape index: {}]   ;;  %s5933_s27 = inlined_call_operand.vmem [shape: f32[1,64], index: 27, kind: input, shape index: {}]   ;;  %s5934_s28 = inlined_call_operand.vmem [shape: f32[32,64], index: 28, kind: output, shape index: {}]  }
   0x1   :  { %5950 = sst [smem:[#allocation3_spill]] %s5906_s0 }
   0x2   :  { %5951 = sst [smem:[#allocation4_spill]] %s5907_s1 }
   0x3   :  { %5952 = sst [smem:[#allocation5_spill]] %s5908_s2 }
   0x4   :  { %5953 = sst [smem:[#allocation6_spill]] %s5909_s3 }
   0x5   :  { %5954 = sst [smem:[#allocation7_spill]] %s5910_s4 }
   0x6   :  { %5955 = sst [smem:[#allocation8_spill]] %s5911_s5 }
   0x7   :  { %5956 = sst [smem:[#allocation9_spill]] %s5912_s6 }
   0x8   :  { %5957 = sst [smem:[#allocation10_spill]] %s5913_s7 }
   0x9   :  { %5958 = sst [smem:[#allocation11_spill]] %s5914_s8 }
   0xa   :  { %5959 = sst [smem:[#allocation12_spill]] %s5915_s9 }
   0xb   :  { %5960 = sst [smem:[#allocation13_spill]] %s5916_s10 }
   0xc   :  { %5961 = sst [smem:[#allocation14_spill]] %s5917_s11 }
   0xd   :  { %5962 = sst [smem:[#allocation15_spill]] %s5918_s12 }
   0xe   :  { %s5094_s8 = smov 0   ;;  %s5096_s5 = smov 0  }
   0xf   :  { %s5098_s9 = smov 0  }
  0x10 LB: > { %s5110_s30 = sadd.s32 4294967295, %s4934_s9   ;;  %s5113_s3 = sadd.s32 1, %s4934_s9   ;;  %s4934_s9 = sphi %s5098_s9, %s5985_s9   ;;  %s4930_s5 = sphi %s5096_s5, %s5984_s5   ;;  %s4926_s8 = sphi %s5094_s8, %s5983_s8  }
  0x11   : > { %s42_s6 = ssub.s32 %s4934_s9, %s5113_s3  ;;  %s45_s10 = sadd.s32 1, %s4930_s5 }
  0x12   : > { %p43_p0 = scmp.eq.s32.totalorder %s42_s6, 0  ;;  %p52_p1 = scmp.ne.s32.totalorder %s4930_s5, %s4926_s8 }
  0x13   : > { %p53_p2 = scmp.eq.s32.totalorder %s4934_s9, 0  ;;  %p4142_p4 = scmp.ge.s32.totalorder %s4934_s9, 2 }
  0x14   : > { %s5122_s0 = scalar_select %p43_p0, %s4930_s5, %s45_s10  }
  0x15   : > { %p54_p3 = por %p53_p2, %p52_p1  ;;  %754 = sbr.rel (%p4142_p4) target bundleno = 42 (0x2a), region = 120 }
  0x1c   : > { %757 = sbr.rel (!%p54_p3) target bundleno = 42 (0x2a), region = 124  ;;  %s759_s11 = sand.u32 (%p54_p3), 1, %s4930_s5  }
  0x1d   : > { %s4144_s29 = sshll.u32 (%p54_p3), %s4934_s9, 3  ;;  %s4143_s2 = sshll.u32 (%p54_p3), %s759_s11, 6 }
  0x1e   : > { %s5963_s1 = sld [smem:[#allocation3_spill]] (%p54_p3)  ;;  %s761_s6 = scalar_lea.vmem (%p54_p3), [#allocation2], %s4143_s2 }
  0x24   : > { %s763_s4 = scalar_lea.vmem %s5963_s1, %s4144_s29 }
  0x25   : > { %v805_v0 = vld [vmem:[%s763_s4] sm:$0xff]  ;;  %v807_v1 = vld [vmem:[%s763_s4 + $0x10] sm:$0xff] }
  0x26   : > { %v809_v2 = vld [vmem:[%s763_s4 + $0x20] sm:$0xff]  ;;  %806 = vst [vmem:[%s761_s6] sm:$0xff] %v805_v0  ;;  %808 = vst [vmem:[%s761_s6 + $0x8] sm:$0xff] %v807_v1  ;;  %v811_v3 = vld [vmem:[%s763_s4 + $0x30] sm:$0xff] }
  0x27   : > { %810 = vst [vmem:[%s761_s6 + $0x10] sm:$0xff] %v809_v2  ;;  %v813_v4 = vld [vmem:[%s763_s4 + $0x40] sm:$0xff]  ;;  %v815_v5 = vld [vmem:[%s763_s4 + $0x50] sm:$0xff]  ;;  %812 = vst [vmem:[%s761_s6 + $0x18] sm:$0xff] %v811_v3 }
  0x28   : > { %814 = vst [vmem:[%s761_s6 + $0x20] sm:$0xff] %v813_v4  ;;  %816 = vst [vmem:[%s761_s6 + $0x28] sm:$0xff] %v815_v5  ;;  %v817_v6 = vld [vmem:[%s763_s4 + $0x60] sm:$0xff]  ;;  %v819_v7 = vld [vmem:[%s763_s4 + $0x70] sm:$0xff] }
  0x29   : > { %818 = vst [vmem:[%s761_s6 + $0x30] sm:$0xff] %v817_v6  ;;  %820 = vst [vmem:[%s761_s6 + $0x38] sm:$0xff] %v819_v7 }
  0x2a PF: > { %p4145_p5 = scmp.ge.s32.totalorder %s4934_s9, 1  ;;  %p832_p6 = scmp.lt.s32.totalorder %s4934_s9, 3 }
  0x2c   : > { %p833_p7 = pnand %p4145_p5, %p832_p6 }
  0x2d   : > { %s839_s10 = sand.u32 (!%p833_p7), 1, %s4926_s8   ;;  %v4936_v8 = vmov (!%p833_p7), 2   ;;  %v4937_v9 = vmov (!%p833_p7), 1   ;;  %v4938_v12 = vmov (!%p833_p7), 0   ;;  %s5964_s2 = sld [smem:[#allocation7_spill]] (!%p833_p7)  ;;  %v4939_v22 = vmov (!%p833_p7), 0.0  }
  0x2e   : > { %836 = sbr.rel (%p833_p7) target bundleno = 8473 (0x2119), region = 166  ;;  %4681 = vset.pattern.permute.xlu0 (!%p833_p7), %v4936_v8  ;;  %4677 = vset.pattern.permute.xlu1 (!%p833_p7), %v4937_v9  ;;  %s4146_s11 = sshll.u32 (!%p833_p7), %s839_s10, 6  ;;  %v977_v23 = vlaneseq (!%p833_p7)  ;;  %vm1206_vm0 = vcmask (!%p833_p7), 261120   ;;  %vm4940_vm1 = vmmov (!%p833_p7), 0   ;;  %vm1520_vm2 = vcmask (!%p833_p7), 1040384  }
  0x2f   : > { %s5134_s29 = scalar_lea.vmem (!%p833_p7), [#allocation2], %s4146_s11  ;;  %p916_p8 = scmp.lt.s32.totalorder (!%p833_p7), %s5110_s30, 1  ;;  %4468 = vmatprep.subr.bf16.mxu1 (!%p833_p7), %v4939_v22  ;;  %4472 = vmatprep.mubr.msk.bf16.mxu1 (!%p833_p7), %vm4940_vm1, %v4939_v22  ;;  %vm1546_vm3 = vcmask (!%p833_p7), 523264   ;;  %vm1706_vm4 = vcmask (!%p833_p7), 130048  }
  0x30   : > { %v928_v10 = vld [vmem:[%s5134_s29 + $0x8] sm:$0xff] (!%p833_p7)  ;;  %v927_v11 = vld [vmem:[%s5134_s29] sm:$0xff] (!%p833_p7)  ;;  %v930_v13 = vld [vmem:[%s5134_s29 + $0x18] sm:$0xff] (!%p833_p7)  ;;  %s5965_s11 = sld [smem:[#allocation4_spill]] (!%p833_p7)  ;;  %v5168_v24 = vshrl.u32 (!%p833_p7), %v977_v23, 7  ;;  %s5966_s7 = sld [smem:[#allocation5_spill]] (!%p833_p7) }
  0x31   : > { %1046 = vperm.xlu0 (!%p833_p7), %4681, %v928_v10   ;;  %990 = vperm.xlu1 (!%p833_p7), %4677, %v927_v11   ;;  %v929_v14 = vld [vmem:[%s5134_s29 + $0x10] sm:$0xff] (!%p833_p7)  ;;  %v931_v15 = vld [vmem:[%s5134_s29 + $0x20] sm:$0xff] (!%p833_p7)  ;;  %v932_v16 = vld [vmem:[%s5134_s29 + $0x28] sm:$0xff] (!%p833_p7)  ;;  %s5971_s12 = sld [smem:[#allocation9_spill]] (!%p833_p7)  ;;  %s5975_s10 = sld [smem:[#allocation10_spill]] (!%p833_p7) }
  0x32   : > { %v933_v17 = vld [vmem:[%s5134_s29 + $0x30] sm:$0xff] (!%p833_p7)  ;;  %v934_v18 = vld [vmem:[%s5134_s29 + $0x38] sm:$0xff] (!%p833_p7)  ;;  %v1075_v27 = vsub.s32 (!%p833_p7), 2, %v5168_v24  ;;  %v5172_v28 = vsub.s32 (!%p833_p7), 1, %v5168_v24  ;;  %v5175_v30 = vsub.s32 (!%p833_p7), 0, %v5168_v24  ;;  %s5946_s9 = smov (!%p833_p7), 48  }
  0x33   : > { %v4694_v19 = vld [vmem:[%s5964_s2] sm:$0xff] (!%p833_p7)   ;;  %v4695_v20 = vld [vmem:[%s5964_s2 + $0x8] sm:$0xff] (!%p833_p7)   ;;  %s5943_s2 = smov (!%p833_p7), 96   ;;  %s5940_s8 = smov (!%p833_p7), 16  }
  0x34   : > { %4456 = vmatprep.subr.bf16.mxu0 (!%p833_p7), %v4694_v19  ;;  %s5978_s6 = smov (!%p833_p7), 48  }
  0x35   : > { %4682 = vset.pattern.permute.xlu0 %v4938_v12  ;;  %994 = vperm.xlu1 %4677, %v928_v10   ;;  %s917_s1 = scalar_select %p916_p8, %s5110_s30, 1 }
  0x36   : > { %939 = vperm.xlu0 %4682, %v927_v11   ;;  %4457 = vmatpush3.bf16.msra.mxu0 %v4694_v19  ;;  %v935_v31 = vld [vmem:[%s5966_s7] sm:$0x7]  ;;  %s5947_s7 = smov 64  }
  0x37   : > { %4458 = vmatprep.subr.bf16.mxu0 %v4695_v20  ;;  %s4147_s4 = sshll.u32 %s917_s1, 3  ;;  %v5182_v33 = vrot.slane %v935_v31, %v1075_v27  ;;  %v5185_v34 = vrot.slane %v935_v31, %v5172_v28  ;;  %v5188_v35 = vrot.slane %v935_v31, %v5175_v30  ;;  %s5974_s1 = sld [smem:[#allocation8_spill]] }
  0x38   : > { %s919_s29 = scalar_lea.vmem %s5965_s11, %s4147_s4  ;;  %s5967_s4 = sld [smem:[#allocation6_spill]] }
  0x39   : > { %4678 = vset.pattern.permute.xlu1 %v4938_v12  ;;  %v1358_v21 = vld [vmem:[%s919_s29] sm:$0xff]  ;;  %s5968_s11 = sld [smem:[#allocation15_spill]]  ;;  %s5970_s29 = sld [smem:[#allocation14_spill]] }
  0x3a   : > { %944 = vperm.xlu0 %4682, %v928_v10   ;;  %954 = vperm.xlu1 %4678, %v930_v13  }
  0x3b   : > { %4459 = vmatpush3.bf16.msra.mxu0 %v4695_v20 }
  0x3c   : > { %4476 = vmatprep.subr.bf16.mxu0 %v4939_v22 }
  0x3e   : > { %949 = vperm.xlu0 %4682, %v929_v14   ;;  %4679 = vset.pattern.permute.xlu1 %v4937_v9  ;;  %v5196_v42 = vld [vmem:[%s5967_s4] ss:$0 sm:$0xff]  ;;  %s5969_s4 = sld [smem:[#allocation13_spill]] }
  0x3f   : > { %1002 = vperm.xlu1 %4679, %v930_v13  }
  0x42   : > { %959 = vperm.xlu0 %4682, %v931_v15  }
  0x43   : > { %4680 = vset.pattern.permute.xlu1 %v4936_v8 }
  0x44   : > { %1042 = vperm.xlu1 %4680, %v927_v11  }
  0x46   : > { %4683 = vset.pattern.permute.xlu0 %v4937_v9 }
  0x47   : > { %998 = vperm.xlu0 %4683, %v929_v14  }
  0x48   : > { %1050 = vperm.xlu1 %4680, %v929_v14  }
  0x4b   : > { %1010 = vperm.xlu0 %4683, %v932_v16  }
  0x4c   : > { %1054 = vperm.xlu1 %4680, %v930_v13  }
  0x4f   : > { %1014 = vperm.xlu0 %4683, %v933_v17  }
  0x50   : > { %4684 = vset.pattern.permute.xlu1 %v4938_v12 }
  0x51   : > { %964 = vperm.xlu1 %4684, %v932_v16  }
  0x53   : > { %4688 = vset.pattern.permute.xlu0 %v4936_v8 }
  0x54   : > { %1058 = vperm.xlu0 %4688, %v931_v15  }
  0x55   : > { %4685 = vset.pattern.permute.xlu1 %v4937_v9 }
  0x56   : > { %1006 = vperm.xlu1 %4685, %v931_v15  }
  0x58   : > { %1070 = vperm.xlu0 %4688, %v934_v18  }
  0x5a   : > { %4686 = vset.pattern.permute.xlu1 %v4938_v12 }
  0x5b   : > { %969 = vperm.xlu1 %4686, %v933_v17  }
  0x5c   : > { %4691 = vset.pattern.permute.xlu0 %v4937_v9 }
  0x5d   : > { %1372 = vperm.xlu0 %4691, %v1358_v21  }
  0x5f   : > { %974 = vperm.xlu1 %4686, %v934_v18  }
  0x61   : > { %4693 = vset.pattern.permute.xlu0 %v4936_v8 }
  0x63   : > { %4687 = vset.pattern.permute.xlu1 %v4937_v9 }
  0x64   : > { %1018 = vperm.xlu1 %4687, %v934_v18  }
  0x68   : > { %4689 = vset.pattern.permute.xlu1 %v4936_v8 }
  0x69   : > { %1062 = vperm.xlu1 %4689, %v932_v16  }
  0x6d   : > { %1066 = vperm.xlu1 %4689, %v933_v17  }
  0x71   : > { %4690 = vset.pattern.permute.xlu1 %v4938_v12 }
  0x72   : > { %1363 = vperm.xlu1 %4690, %v1358_v21  }
  0x76   : > { %4692 = vset.pattern.permute.xlu1 %v4936_v8 }
  0x77   : > { %1382 = vperm.xlu1 %4692, %v1358_v21  }
  0xb0   : > { %v991_v25 = vpop.permute.xlu1 %990  ;;  %v1047_v26 = vpop.permute.xlu0 %1046 }
  0xb1   : > { %v1078_v38 = vmul.f32 %v5182_v33, %v1047_v26  ;;  %v1025_v49 = vmul.f32 %v5185_v34, %v991_v25 }
  0xb4   : > { %v995_v29 = vpop.permute.xlu1 %994 }
  0xb5   : > { %v940_v32 = vpop.permute.xlu0 %939  ;;  %v1026_v39 = vmul.f32 %v5185_v34, %v995_v29 }
  0xb6   : > { %v981_v46 = vmul.f32 %v5188_v35, %v940_v32 }
  0xb8   : > { %v1033_v52 = vadd.f32 %v1025_v49, %v981_v46 }
  0xb9   : > { %v945_v36 = vpop.permute.xlu0 %944  ;;  %v955_v37 = vpop.permute.xlu1 %954 }
  0xba   : > { %v982_v40 = vmul.f32 %v5188_v35, %v945_v36  ;;  %v984_v2 = vmul.f32 %v5188_v35, %v955_v37 }
  0xbc   : > { %v1034_v41 = vadd.f32 %v1026_v39, %v982_v40 }
  0xbd   : > { %v950_v43 = vpop.permute.xlu0 %949 }
  0xbe   : > { %v1086_v44 = vadd.f32 %v1078_v38, %v1034_v41  ;;  %v1003_v45 = vpop.permute.xlu1 %1002  ;;  %v983_v55 = vmul.f32 %v5188_v35, %v950_v43 }
  0xbf   : > { %v1028_v61 = vmul.f32 %v5185_v34, %v1003_v45 }
  0xc0   : > { %v5200_v47 = vadd.f32 %v5196_v42, %v1086_v44 }
  0xc1   : > { %v960_v48 = vpop.permute.xlu0 %959  ;;  %v1036_v7 = vadd.f32 %v1028_v61, %v984_v2 }
  0xc2   : > { %v1116_v50 = vmul.f32 0.044715, %v5200_v47  ;;  %v985_v37 = vmul.f32 %v5188_v35, %v960_v48 }
  0xc3   : > { %v1043_v51 = vpop.permute.xlu1 %1042 }
  0xc4   : > { %v1077_v53 = vmul.f32 %v5182_v33, %v1043_v51  ;;  %v1124_v54 = vmul.f32 %v1116_v50, %v5200_v47 }
  0xc6   : > { %v1085_v56 = vadd.f32 %v1077_v53, %v1033_v52  ;;  %v999_v57 = vpop.permute.xlu0 %998  ;;  %v1132_v58 = vmul.f32 %v1124_v54, %v5200_v47 }
  0xc7   : > { %v1027_v59 = vmul.f32 %v5185_v34, %v999_v57  ;;  %v1051_v60 = vpop.permute.xlu1 %1050 }
  0xc8   : > { %v1099_v62 = vadd.f32 %v5196_v42, %v1085_v56  ;;  %v1079_v63 = vmul.f32 %v5182_v33, %v1051_v60  ;;  %v1140_v0 = vadd.f32 %v1132_v58, %v5200_v47 }
  0xc9   : > { %v1035_v1 = vadd.f32 %v1027_v59, %v983_v55  ;;  %v1108_v55 = vmul.f32 0.5, %v5200_v47 }
  0xca   : > { %v1011_v3 = vpop.permute.xlu0 %1010  ;;  %v1115_v4 = vmul.f32 0.044715, %v1099_v62  ;;  %v1148_v10 = vmul.f32 0.7978846, %v1140_v0  ;;  %v1107_v54 = vmul.f32 0.5, %v1099_v62 }
  0xcb   : > { %v1087_v5 = vadd.f32 %v1079_v63, %v1035_v1  ;;  %v1055_v6 = vpop.permute.xlu1 %1054  ;;  %v1030_v63 = vmul.f32 %v5185_v34, %v1011_v3 }
  0xcc   : > { %v1080_v8 = vmul.f32 %v5182_v33, %v1055_v6  ;;  %v1123_v9 = vmul.f32 %v1115_v4, %v1099_v62  ;;  %4794 = vtanh.f32 %v1148_v10 }
  0xcd   : > { %v1101_v11 = vadd.f32 %v5196_v42, %v1087_v5 }
  0xce   : > { %v1088_v13 = vadd.f32 %v1080_v8, %v1036_v7  ;;  %v1015_v14 = vpop.permute.xlu0 %1014  ;;  %v1131_v15 = vmul.f32 %v1123_v9, %v1099_v62 }
  0xcf   : > { %v1117_v16 = vmul.f32 0.044715, %v1101_v11  ;;  %v1109_v9 = vmul.f32 0.5, %v1101_v11 }
  0xd0   : > { %v1102_v17 = vadd.f32 %v5196_v42, %v1088_v13  ;;  %v965_v18 = vpop.permute.xlu1 %964  ;;  %v1139_v19 = vadd.f32 %v1131_v15, %v1099_v62  ;;  %v1031_v15 = vmul.f32 %v5185_v34, %v1015_v14 }
  0xd1   : > { %v1125_v20 = vmul.f32 %v1117_v16, %v1101_v11  ;;  %v986_v2 = vmul.f32 %v5188_v35, %v965_v18 }
  0xd2   : > { %v1118_v21 = vmul.f32 0.044715, %v1102_v17  ;;  %v1147_v25 = vmul.f32 0.7978846, %v1139_v19  ;;  %v1110_v10 = vmul.f32 0.5, %v1102_v17 }
  0xd3   : > { %v1133_v26 = vmul.f32 %v1125_v20, %v1101_v11  ;;  %v1059_v29 = vpop.permute.xlu0 %1058  ;;  %v1038_v13 = vadd.f32 %v1030_v63, %v986_v2 }
  0xd4   : > { %v1126_v31 = vmul.f32 %v1118_v21, %v1102_v17  ;;  %4796 = vtanh.f32 %v1147_v25  ;;  %v1081_v40 = vmul.f32 %v5182_v33, %v1059_v29 }
  0xd5   : > { %v1007_v32 = vpop.permute.xlu1 %1006  ;;  %v1141_v36 = vadd.f32 %v1133_v26, %v1101_v11  ;;  %v4696_v11 = vld [vmem:[%s5968_s11] sm:$0xff]  }
  0xd6   : > { %v1134_v38 = vmul.f32 %v1126_v31, %v1102_v17  ;;  %v1029_v39 = vmul.f32 %v5185_v34, %v1007_v32  ;;  %v4795_v45 = vpop.eup %4794 }
  0xd7   : > { %v1149_v41 = vmul.f32 0.7978846, %v1141_v36  ;;  %v1164_v52 = vadd.f32 1.0, %v4795_v45  ;;  %v1071_v58 = vpop.permute.xlu0 %1070 }
  0xd8   : > { %v1037_v43 = vadd.f32 %v1029_v39, %v985_v37  ;;  %v1142_v44 = vadd.f32 %v1134_v38, %v1102_v17  ;;  %v1084_v47 = vmul.f32 %v5182_v33, %v1071_v58  ;;  %v4697_v39 = vld [vmem:[%s5968_s11 + $0x8] sm:$0xff]  }
  0xd9   : > { %4798 = vtanh.f32 %v1149_v41  ;;  %v1172_v60 = vmul.f32 %v1164_v52, %v1108_v55 }
  0xda   : > { %v1089_v46 = vadd.f32 %v1081_v40, %v1037_v43  ;;  %v970_v49 = vpop.permute.xlu1 %969  ;;  %v1150_v50 = vmul.f32 0.7978846, %v1142_v44 }
  0xdb   : > { %v987_v16 = vmul.f32 %v5188_v35, %v970_v49  ;;  %v4698_v49 = vld [vmem:[%s5968_s11 + $0x10] sm:$0xff]  }
  0xdc   : > { %4800 = vtanh.f32 %v1150_v50  ;;  %v5221_v51 = vadd.f32 %v5196_v42, %v1089_v46 }
  0xdd   : > { %v1039_v14 = vadd.f32 %v1031_v15, %v987_v16 }
  0xde   : > { %v4797_v53 = vpop.eup %4796  ;;  %v975_v48 = vpop.permute.xlu1 %974  ;;  %v1119_v57 = vmul.f32 0.044715, %v5221_v51  ;;  %v1111_v63 = vmul.f32 0.5, %v5221_v51 }
  0xdf   : > { %v1163_v56 = vadd.f32 1.0, %v4797_v53  ;;  %v988_v4 = vmul.f32 %v5188_v35, %v975_v48 }
  0xe0   : > { %v1127_v5 = vmul.f32 %v1119_v57, %v5221_v51 }
  0xe1   : > { %v1171_v59 = vmul.f32 %v1163_v56, %v1107_v54 }
  0xe2   : > { %v1135_v20 = vmul.f32 %v1127_v5, %v5221_v51 }
  0xe3   : > { %v4799_v61 = vpop.eup %4798  ;;  %v1019_v0 = vpop.permute.xlu1 %1018  ;;  %v1179_v1 = vpack.c.bf16 %v1172_v60, %v1171_v59 }
  0xe4   : > { %v1032_v62 = vmul.f32 %v5185_v34, %v1019_v0  ;;  %v1165_v6 = vadd.f32 1.0, %v4799_v61  ;;  %v1143_v37 = vadd.f32 %v1135_v20, %v5221_v51  ;;  %v1359_v51 = vld [vmem:[%s5969_s4] sm:$0x7]  ;;  %s5941_s4 = smov 80  }
  0xe5   : > { %4460 = vmatprep.mubr.msk.bf16.mxu0 %vm1206_vm0, %v1179_v1  ;;  %v1369_v15 = vrot.slane %v1359_v51, %v5175_v30  ;;  %v1378_v16 = vrot.slane %v1359_v51, %v5172_v28 }
  0xe6   : > { %v4801_v7 = vpop.eup %4800  ;;  %v1040_v8 = vadd.f32 %v1032_v62, %v988_v4  ;;  %v1173_v25 = vmul.f32 %v1165_v6, %v1109_v9  ;;  %v1151_v46 = vmul.f32 0.7978846, %v1143_v37  ;;  %v4699_v37 = vld [vmem:[%s5968_s11 + $0x18] sm:$0xff]  }
  0xe7   : > { %v1166_v3 = vadd.f32 1.0, %v4801_v7 }
  0xe8   : > { %v1092_v18 = vadd.f32 %v1084_v47, %v1040_v8  ;;  %v1063_v19 = vpop.permute.xlu1 %1062  ;;  %4802 = vtanh.f32 %v1151_v46 }
  0xe9   : > { %v1082_v21 = vmul.f32 %v5182_v33, %v1063_v19  ;;  %v1174_v26 = vmul.f32 %v1166_v3, %v1110_v10 }
  0xea   : > { %v1106_v29 = vadd.f32 %v5196_v42, %v1092_v18  ;;  %v1373_v18 = vpop.permute.xlu0 %1372 }
  0xeb   : > { %v1090_v17 = vadd.f32 %v1082_v21, %v1038_v13  ;;  %v1180_v31 = vpack.c.bf16 %v1174_v26, %v1173_v25  ;;  %v1379_v20 = vmul.f32 %v1378_v16, %v1373_v18  ;;  %v1388_v21 = vrot.slane %v1359_v51, %v1075_v27  ;;  %v4700_v27 = vld [vmem:[%s5968_s11 + $0x20] sm:$0xff]  }
  0xec   : > { %v1122_v32 = vmul.f32 0.044715, %v1106_v29  ;;  %v1067_v34 = vpop.permute.xlu1 %1066  ;;  %v1114_v7 = vmul.f32 0.5, %v1106_v29 }
  0xed   : > { %v1104_v35 = vadd.f32 %v5196_v42, %v1090_v17  ;;  %v1083_v36 = vmul.f32 %v5182_v33, %v1067_v34  ;;  %4461 = vmatmul.mubr.msk.bf16.vlgmr.msra.gmra.mrb[0].mxu0 %vm1206_vm0, %v1180_v31  ;;  %v4162_v17 = vld [vmem:[%s5970_s29] ss:$0 sm:$0xff]  ;;  %s5972_s29 = sld [smem:[#allocation11_spill]] }
  0xee   : > { %v1130_v38 = vmul.f32 %v1122_v32, %v1106_v29  ;;  %4477 = vmatpush3.bf16.msra.mxu0 %v4696_v11 }
  0xef   : > { %v1120_v40 = vmul.f32 0.044715, %v1104_v35  ;;  %v1091_v41 = vadd.f32 %v1083_v36, %v1039_v14  ;;  %4478 = vmatprep.subr.bf16.mxu0 %v4939_v22  ;;  %v1112_v0 = vmul.f32 0.5, %v1104_v35 }
  0xf0   : > { %v1138_v43 = vmul.f32 %v1130_v38, %v1106_v29  ;;  %v4701_v38 = vld [vmem:[%s5968_s11 + $0x28] sm:$0xff]  }
  0xf1   : > { %v1128_v44 = vmul.f32 %v1120_v40, %v1104_v35  ;;  %v1105_v45 = vadd.f32 %v5196_v42, %v1091_v41  ;;  %v1364_v13 = vpop.permute.xlu1 %1363 }
  0xf2   : > { %v1146_v33 = vadd.f32 %v1138_v43, %v1106_v29  ;;  %4479 = vmatpush3.bf16.msra.mxu0 %v4697_v39  ;;  %v4803_v58 = vpop.eup %4802  ;;  %v1370_v19 = vmul.f32 %v1369_v15, %v1364_v13  ;;  %v4702_v39 = vld [vmem:[%s5968_s11 + $0x30] sm:$0xff]   ;;  %v4703_v43 = vld [vmem:[%s5968_s11 + $0x38] sm:$0xff]   ;;  %s5973_s11 = sld [smem:[#allocation12_spill]] }
  0xf3   : > { %v1136_v50 = vmul.f32 %v1128_v44, %v1104_v35  ;;  %v1121_v52 = vmul.f32 0.044715, %v1105_v45  ;;  %4480 = vmatprep.subr.bf16.mxu0 %v4939_v22  ;;  %v1167_v60 = vadd.f32 1.0, %v4803_v58  ;;  %v1113_v6 = vmul.f32 0.5, %v1105_v45 }
  0xf4   : > { %v1154_v53 = vmul.f32 0.7978846, %v1146_v33  ;;  %v1380_v26 = vadd.f32 %v1379_v20, %v1370_v19  ;;  %v4704_v33 = vld [vmem:[%s5971_s12] sm:$0xff]  }
  0xf5   : > { %v1129_v48 = vmul.f32 %v1121_v52, %v1105_v45  ;;  %v1144_v54 = vadd.f32 %v1136_v50, %v1104_v35  ;;  %v1175_v2 = vmul.f32 %v1167_v60, %v1111_v63  ;;  %4469 = vmatpush3.bf16.msra.mxu1 %v4704_v33  ;;  %v1519_v50 = vld [vmem:[%s5972_s29] sm:$0x1] }
  0xf6   : > { %4481 = vmatpush3.bf16.msra.mxu0 %v4698_v49  ;;  %4804 = vtanh.f32 %v1154_v53  ;;  %v1383_v25 = vpop.permute.xlu1 %1382  ;;  %4470 = vmatprep.subr.bf16.mxu1 %v4939_v22  ;;  %v4705_v49 = vld [vmem:[%s5971_s12 + $0x8] sm:$0xff]   ;;  %v1521_v53 = vsel %vm1520_vm2, %v1519_v50, 0.0  ;;  %v4709_v50 = vld [vmem:[%s5922_s16 + $0x10] ss:$8 sps:$4 sm:$0xff]  }
  0xf7   : > { %v1137_v55 = vmul.f32 %v1129_v48, %v1105_v45  ;;  %v1152_v56 = vmul.f32 0.7978846, %v1144_v54  ;;  %4482 = vmatprep.subr.bf16.mxu0 %v4939_v22  ;;  %v1389_v29 = vmul.f32 %v1388_v21, %v1383_v25  ;;  %v4706_v33 = vld [vmem:[%s5922_s16] ss:$8 sps:$4 sm:$0xff]  }
  0xf8   : > { %v1522_v52 = vld [vmem:[%s5973_s11] sm:$0x1]  ;;  %s5945_s11 = smov 32  }
  0xf9   : > { %4806 = vtanh.f32 %v1152_v56  ;;  %v1145_v42 = vadd.f32 %v1137_v55, %v1105_v45  ;;  %v1390_v11 = vadd.f32 %v1389_v29, %v1380_v26  ;;  %4471 = vmatpush3.bf16.msra.mxu1 %v4705_v49  ;;  %v5306_v48 = vsel %vm1520_vm2, %v1522_v52, 0.0  ;;  %v4163_v29 = vld [vmem:[%s5919_s13] ss:$0 sm:$0xff]  ;;  %v4711_v49 = vld [vmem:[%s5922_s16 + $0x14] ss:$8 sps:$4 sm:$0xff]  }
  0xfa   : > { %4483 = vmatpush3.bf16.msra.mxu0 %v4699_v37  ;;  %v5309_v54 = vadd.f32 %v5306_v48, %v1521_v53  ;;  %v4714_v52 = vld [vmem:[%s5922_s16 + $0x24] ss:$8 sps:$4 sm:$0xff]   ;;  %v4712_v53 = vld [vmem:[%s5922_s16 + $0x20] ss:$8 sps:$4 sm:$0xff]  }
  0xfb   : > { %v1153_v57 = vmul.f32 0.7978846, %v1145_v42  ;;  %v1397_v31 = vadd.f32 %v4162_v17, %v1390_v11  ;;  %4484 = vmatprep.subr.bf16.mxu0 %v4939_v22  ;;  %v4151_v42 = vld [vmem:[%s5974_s1] ss:$0 sm:$0xff]  ;;  %s5948_s1 = smov 112  }
  0xfc   : > { %v1547_v55 = vsel %vm1546_vm3, %v5309_v54, 0.0  ;;  %v4158_v11 = vld [vmem:[%s5975_s10] ss:$0 sm:$0xff]  ;;  %s5979_s10 = smov 32  }
  0xfd   : > { %4808 = vtanh.f32 %v1153_v57  ;;  %v1399_v32 = vmul.f32 0.044715, %v1397_v31  ;;  %v1398_v40 = vmul.f32 0.5, %v1397_v31  ;;  %1548 = vadd.xlane.f32.xlu1 %v1547_v55  ;;  %v4715_v55 = vld [vmem:[%s5922_s16 + $0x30] ss:$8 sps:$4 sm:$0xff]  }
  0xfe   : > { %4485 = vmatpush3.bf16.msra.mxu0 %v4700_v27 }
  0xff   : > { %v1400_v34 = vmul.f32 %v1399_v32, %v1397_v31  ;;  %4486 = vmatprep.subr.bf16.mxu0 %v4939_v22 }
 0x100   : > { %v4805_v59 = vpop.eup %4804 }
 0x101   : > { %v1170_v62 = vadd.f32 1.0, %v4805_v59  ;;  %v1401_v14 = vmul.f32 %v1400_v34, %v1397_v31 }
 0x102   : > { %4487 = vmatpush3.bf16.msra.mxu0 %v4701_v38 }
 0x103   : > { %v4807_v61 = vpop.eup %4806  ;;  %v1178_v10 = vmul.f32 %v1170_v62, %v1114_v7  ;;  %v1402_v35 = vadd.f32 %v1401_v14, %v1397_v31  ;;  %4488 = vmatprep.subr.bf16.mxu0 %v4939_v22 }
 0x104   : > { %v1168_v1 = vadd.f32 1.0, %v4807_v61 }
 0x105   : > { %v1403_v36 = vmul.f32 0.7978846, %v1402_v35 }
 0x106   : > { %v1176_v4 = vmul.f32 %v1168_v1, %v1112_v0  ;;  %4489 = vmatpush3.bf16.msra.mxu0 %v4702_v39 }
 0x107   : > { %v4809_v47 = vpop.eup %4808  ;;  %4810 = vtanh.f32 %v1403_v36  ;;  %4490 = vmatprep.subr.bf16.mxu0 %v4939_v22 }
 0x108   : > { %v1181_v5 = vpack.c.bf16 %v1176_v4, %v1175_v2  ;;  %v1169_v8 = vadd.f32 1.0, %v4809_v47 }
 0x10a   : > { %4464 = vmatprep.mubr.msk.bf16.mxu0 %vm1206_vm0, %v1181_v5  ;;  %v1177_v9 = vmul.f32 %v1169_v8, %v1113_v6  ;;  %4491 = vmatpush3.bf16.msra.mxu0 %v4703_v43 }
 0x10b   : > { %4496 = vmatprep.subr.bf16.mxu0 %v4939_v22 }
 0x10c   : > { %v1182_v3 = vpack.c.bf16 %v1178_v10, %v1177_v9 }
 0x10e   : > { %4465 = vmatmul.mubr.msk.bf16.gmra.mrb[4].mxu0 %vm1206_vm0, %v1182_v3 }
 0x10f   : > { %4492 = vmatprep.mubr.msk.bf16.mxu0 %vm4940_vm1, %v4939_v22 }
 0x111   : > { %v4811_v41 = vpop.eup %4810 }
 0x112   : > { %v1405_v44 = vadd.f32 1.0, %v4811_v41 }
 0x114   : > { %v1406_v45 = vmul.f32 %v1405_v44, %v1398_v40 }
 0x116   : > { %v1407_v46 = vpack.c.bf16 %v1406_v45, %v1406_v45 }
 0x118   : > { %4493 = vmatmul.mubr.bf16.vlgmr.msra.gmra.mrb[8].mxu0 %v1407_v46  ;;  %v4708_v46 = vld [vmem:[%s5922_s16 + $0x4] ss:$8 sps:$4 sm:$0xff]  }
 0x119   : > { %4498 = vmatprep.mubr.msk.bf16.mxu0 %vm4940_vm1, %v4939_v22  ;;  %1650 = vmatprep.subr.bf16.mxu1 %v4708_v46 }
 0x18a   : > { %v1549_v25 = vpop.xlane.xlu1 %1548 }
 0x18b   : > { %v1554_v26 = vmul.f32 0.015625, %v1549_v25 }
 0x18d   : > { %v1556_v17 = vsub.f32 %v5309_v54, %v1554_v26 }
 0x18f   : > { %v1558_v27 = vmul.f32 %v1556_v17, %v1556_v17 }
 0x191   : > { %v1560_v39 = vsel %vm1546_vm3, %v1558_v27, 0.0  ;;  %v1529_v27 = vshra.s32 %v5168_v24, 4 }
 0x1c0   : > { %v4462_v56 = vpop.f32.mrb[0].mxu0 }
 0x1c1   : > { %v1253_v57 = vpop.f32.mrb[1].mxu0  ;;  %v1262_v63 = vadd.f32 %v4462_v56, %v4151_v42  ;;  %v4717_v56 = vld [vmem:[%s5922_s16 + $0x34] ss:$8 sps:$4 sm:$0xff]  }
 0x1c2   : > { %v4463_v58 = vpop.f32.mrb[2].mxu0  ;;  %v1254_v60 = vadd.f32 %v4151_v42, %v1253_v57 }
 0x1c3   : > { %v1256_v59 = vpop.f32.mrb[3].mxu0  ;;  %v1265_v1 = vadd.f32 %v4463_v58, %v4151_v42 }
 0x1c4   : > { %v1257_v61 = vadd.f32 %v4151_v42, %v1256_v59 }
 0x1c6   : > { %v1284_v0 = vmax.f32 %v1254_v60, %v1257_v61 }
 0x1c8   : > { %v1285_v2 = vmax.f32 %v1284_v0, %v1262_v63 }
 0x1ca   : > { %v1286_v4 = vmax.f32 %v1285_v2, %v1265_v1  ;;  %v4172_v1 = vld [vmem:[%s5920_s14] ss:$0 sm:$0xff] }
 0x1e1   : > { %v4466_v62 = vpop.f32.mrb[4].mxu0 }
 0x1e2   : > { %v1269_v47 = vpop.f32.mrb[5].mxu0  ;;  %v1278_v10 = vadd.f32 %v4466_v62, %v4151_v42 }
 0x1e3   : > { %v1270_v5 = vadd.f32 %v4151_v42, %v1269_v47  ;;  %v4467_v6 = vpop.f32.mrb[6].mxu0  ;;  %v4173_v47 = vld [vmem:[%s5921_s15] ss:$0 sm:$0xff] }
 0x1e4   : > { %v1272_v7 = vpop.f32.mrb[7].mxu0  ;;  %v1281_v51 = vadd.f32 %v4467_v6, %v4151_v42 }
 0x1e5   : > { %v1287_v8 = vmax.f32 %v1286_v4, %v1270_v5  ;;  %v1273_v9 = vadd.f32 %v4151_v42, %v1272_v7 }
 0x1e7   : > { %v1288_v3 = vmax.f32 %v1287_v8, %v1273_v9  ;;  %v1595_v9 = vld [vmem:[%s5923_s17] ss:$2 sm:$0x3] }
 0x1e9   : > { %v1289_v13 = vmax.f32 %v1288_v3, %v1278_v10  ;;  %v1600_v10 = vrot.slane %v1595_v9, %v5175_v30 }
 0x1eb   : > { %v1290_v15 = vmax.f32 %v1289_v13, %v1281_v51  ;;  %v1513_v18 = vpop.f32.mrb[8].mxu0  ;;  %v1604_v51 = vrot.slane %v1595_v9, %v5172_v28 }
 0x1ec   : > { %v4494_v19 = vpop.f32.mrb[9].mxu0  ;;  %v5325_v32 = vadd.f32 %v4163_v29, %v1513_v18 }
 0x1ed   : > { %v1291_v16 = vpack.c.bf16 %v1290_v15, %v1290_v15  ;;  %v1516_v20 = vpop.f32.mrb[10].mxu0 }
 0x1ee   : > { %v4495_v21 = vpop.f32.mrb[11].mxu0 }
 0x1ef   : > { %4473 = vmatmul.mubr.msk.bf16.vlgmr.msra.gmra.mrb[0].mxu1 %vm1206_vm0, %v1291_v16 }
 0x1f0   : > { %1682 = vmatprep.mubr.bf16.mxu1 %v4938_v12  ;;  %1651 = vmatpush1.bf16.msra.mxu1 %v4706_v33 }
 0x1f1   : > { %1652 = vmatprep.subr.bf16.mxu1 %v4711_v49 }
 0x1f4   : > { %1653 = vmatpush1.bf16.msra.mxu1 %v4709_v50 }
 0x1f5   : > { %1654 = vmatprep.subr.bf16.mxu1 %v4714_v52 }
 0x1f8   : > { %1655 = vmatpush1.bf16.msra.mxu1 %v4712_v53 }
 0x1f9   : > { %1656 = vmatprep.subr.bf16.mxu1 %v4717_v56 }
 0x1fc   : > { %1657 = vmatpush1.bf16.msra.mxu1 %v4715_v55 }
 0x1fd   : > { %4502 = vmatprep.subr.bf16.mxu1 %v4939_v22 }
 0x2c2   : > { %v1352_v31 = vpop.f32.mrb[0].mxu1 }
 0x2c3   : > { %v1353_v34 = vadd.f32 %v4158_v11, %v1352_v31  ;;  %v4474_v14 = vpop.f32.mrb[1].mxu1 }
 0x2c4   : > { %v1355_v35 = vpop.f32.mrb[2].mxu1  ;;  %v1528_v14 = vand.u32 127, %v977_v23 }
 0x2c5   : > { %v5328_v36 = vadd.f32 %v5325_v32, %v1353_v34  ;;  %v4475_v37 = vpop.f32.mrb[3].mxu1 }
 0x2c6   : > { %v1534_v35 = vand.u32 15, %v1528_v14  ;;  %v1526_v37 = vadd.s32 8, %v5168_v24 }
 0x2c7   : > { %v1550_v38 = vsel %vm1546_vm3, %v5328_v36, 0.0 }
 0x2c8   : > { %1551 = vadd.xlane.f32.xlu0 %v1550_v38  ;;  %v1531_v38 = vshra.s32 %v1528_v14, 4  ;;  %vm1535_vm5 = vcmp.eq.s32.totalorder %v1534_v35, 0  ;;  %vm1536_vm6 = vcmp.ge.s32.totalorder %v1534_v35, 8 }
 0x2c9   : > { %vm1537_vm8 = vmor %vm1535_vm5, %vm1536_vm6 }
 0x2ca   : > { %vm1532_vm7 = vcmp.eq.s32.totalorder %v1529_v27, %v1531_v38 }
 0x2cb   : > { %vm1538_vm10 = vmand %vm1532_vm7, %vm1537_vm8 }
 0x2cc   : > { %1561 = vadd.xlane.f32.xlu0 %v1560_v39  ;;  %v1530_v39 = vshra.s32 %v1526_v37, 4 }
 0x2ce   : > { %vm1533_vm9 = vcmp.eq.s32.totalorder %v1530_v39, %v1531_v38 }
 0x2cf   : > { %vm1539_vm11 = vmand %vm1533_vm9, %vm1537_vm8 }
 0x355   : > { %v1552_v40 = vpop.xlane.xlu0 %1551 }
 0x356   : > { %v1555_v41 = vmul.f32 0.015625, %v1552_v40 }
 0x358   : > { %v1557_v43 = vsub.f32 %v5328_v36, %v1555_v41  ;;  %v4944_v41 = vmov -1e+30  }
 0x359   : > { %v1562_v42 = vpop.xlane.xlu0 %1561  ;;  %v5402_v46 = vsel %vm1539_vm11, 0.0, %v4944_v41 }
 0x35a   : > { %v1559_v44 = vmul.f32 %v1557_v43, %v1557_v43  ;;  %v1566_v57 = vmul.f32 0.015625, %v1562_v42 }
 0x35c   : > { %v1563_v45 = vsel %vm1546_vm3, %v1559_v44, 0.0  ;;  %v1568_v58 = vadd.f32 1e-05, %v1566_v57 }
 0x35d   : > { %1564 = vadd.xlane.f32.xlu1 %v1563_v45 }
 0x35e   : > { %4812 = vrsqrt.f32 %v1568_v58 }
 0x368   : > { %v4813_v63 = vpop.eup %4812 }
 0x369   : > { %v1572_v0 = vmul.f32 %v4813_v63, %v1556_v17 }
 0x36b   : > { %v1578_v4 = vmul.f32 %v4172_v1, %v1572_v0 }
 0x36d   : > { %v1584_v6 = vadd.f32 %v4173_v47, %v1578_v4 }
 0x3ea   : > { %v1565_v59 = vpop.xlane.xlu1 %1564 }
 0x3eb   : > { %v1567_v60 = vmul.f32 0.015625, %v1565_v59 }
 0x3ed   : > { %v1569_v61 = vadd.f32 1e-05, %v1567_v60 }
 0x3ef   : > { %4814 = vrsqrt.f32 %v1569_v61 }
 0x3f9   : > { %v4815_v2 = vpop.eup %4814 }
 0x3fa   : > { %v1573_v62 = vmul.f32 %v4815_v2, %v1557_v43  ;;  %v5400_v43 = vsel %vm1538_vm10, 0.0, %v4944_v41 }
 0x3fc   : > { %v1579_v5 = vmul.f32 %v4172_v1, %v1573_v62 }
 0x3fe   : > { %v1585_v7 = vadd.f32 %v4173_v47, %v1579_v5 }
 0x400   : > { %v1586_v8 = vpack.c.bf16 %v1585_v7, %v1584_v6 }
 0x402   : > { %4182 = vmatmul.mubr.msk.bf16.vlgmr.msra.gmra.mrb[4].mxu1 %vm1546_vm3, %v1586_v8 }
 0x403   : > { %4504 = vmatprep.mubr.msk.bf16.mxu1 %vm4940_vm1, %v4939_v22 }
 0x4d5   : > { %v1684_v3 = vpop.f32.mrb[4].mxu1 }
 0x4d6   : > { %v1686_v13 = vpop.f32.mrb[5].mxu1  ;;  %v1685_v16 = vadd.f32 %v1684_v3, %v1600_v10 }
 0x4d7   : > { %v1688_v15 = vpop.f32.mrb[6].mxu1  ;;  %v1687_v20 = vadd.f32 %v1686_v13, %v1604_v51 }
 0x4d8   : > { %v1689_v18 = vadd.f32 %v1688_v15, %v1600_v10  ;;  %v1690_v19 = vpop.f32.mrb[7].mxu1 }
 0x4d9   : > { %v1691_v21 = vadd.f32 %v1690_v19, %v1604_v51 }
 0x4da   : > { %v5374_v25 = vpack.c.bf16 %v1689_v18, %v1685_v16 }
 0x4db   : > { %v5376_v26 = vpack.c.bf16 %v1691_v21, %v1687_v20 }
 0x4dc   : > { %1828 = vrot.lane.b32.xlu1 %v5374_v25, %s5946_s9  ;;  %1704 = vrot.lane.b32.xlu0 %v5374_v25, %s5947_s7  ;;  %s5981_s7 = smov 80  }
 0x4dd   : > { %4503 = vmatpush3.bf16.msra.mxu1 %v5376_v26 }
 0x4de   : > { %4514 = vmatprep.subr.bf16.mxu1 %v4939_v22 }
 0x4e0   : > { %1826 = vrot.lane.b32.xlu1 %v5374_v25, %s5948_s1 }
 0x54e   : > { %v1705_v29 = vpop.permute.xlu0 %1704  ;;  %v1829_v17 = vpop.permute.xlu1 %1828 }
 0x54f   : > { %v1711_v11 = vsel %vm1706_vm4, %v1705_v29, 0  ;;  %v1834_v31 = vsel %vm1706_vm4, %v1829_v17, 0 }
 0x550   : > { %4497 = vmatpush3.bf16.xpose.msra.mxu0 %v1711_v11 }
 0x551   : > { %4508 = vmatprep.subr.bf16.mxu0 %v4939_v22 }
 0x552   : > { %v1827_v34 = vpop.permute.xlu1 %1826 }
 0x557   : > { %4499 = vmatmul.mubr.msk.bf16.vlgmr.msra.gmra.mrb[12].mxu0 %vm1706_vm4, %v5374_v25 }
 0x558   : > { %4509 = vmatpush3.bf16.xpose.msra.mxu0 %v1834_v31  ;;  %4510 = vmatprep.mubr.msk.bf16.mxu0 %vm4940_vm1, %v4939_v22 }
 0x559   : > { %4520 = vmatprep.subr.bf16.mxu0 %v4939_v22 }
 0x55f   : > { %4511 = vmatmul.mubr.msk.bf16.vlgmr.msra.gmra.mrb[16].mxu0 %vm1706_vm4, %v1827_v34 }
 0x560   : > { %4522 = vmatprep.mubr.msk.bf16.mxu0 %vm4940_vm1, %v4939_v22 }
 0x62a   : > { %v1747_v40 = vpop.f32.mrb[12].mxu0 }
 0x62b   : > { %v1754_v44 = vmul.f32 0.25, %v1747_v40  ;;  %v4500_v23 = vpop.f32.mrb[13].mxu0 }
 0x62c   : > { %v1750_v45 = vpop.f32.mrb[14].mxu0 }
 0x62d   : > { %v1755_v33 = vmul.f32 0.25, %v1750_v45  ;;  %v4501_v24 = vpop.f32.mrb[15].mxu0  ;;  %v1756_v49 = vadd.f32 %v1754_v44, %v5400_v43  ;;  %v4718_v45 = vld [vmem:[%s5924_s18] sm:$0xff]  }
 0x62f   : > { %v1758_v50 = vsel %vm1706_vm4, %v1756_v49, -inf  ;;  %v1757_v52 = vadd.f32 %v1755_v33, %v5402_v46  ;;  %v4719_v33 = vld [vmem:[%s5924_s18 + $0x8] sm:$0xff]  }
 0x630   : > { %1759 = vmax.xlane.f32.xlu0 %v1758_v50  ;;  %4521 = vmatpush3.bf16.msra.mxu0 %v4719_v33 }
 0x631   : > { %v1761_v53 = vsel %vm1706_vm4, %v1757_v52, -inf  ;;  %4532 = vmatprep.subr.bf16.mxu0 %v4939_v22 }
 0x632   : > { %1762 = vmax.xlane.f32.xlu1 %v1761_v53  ;;  %v1870_v55 = vpop.f32.mrb[16].mxu0 }
 0x633   : > { %v1877_v56 = vmul.f32 0.25, %v1870_v55  ;;  %v4512_v42 = vpop.f32.mrb[17].mxu0 }
 0x634   : > { %v1873_v57 = vpop.f32.mrb[18].mxu0 }
 0x635   : > { %v1878_v58 = vmul.f32 0.25, %v1873_v57  ;;  %v4513_v59 = vpop.f32.mrb[19].mxu0  ;;  %v1879_v60 = vadd.f32 %v1877_v56, %v5400_v43 }
 0x637   : > { %v1881_v61 = vsel %vm1706_vm4, %v1879_v60, -inf  ;;  %v1880_v63 = vadd.f32 %v1878_v58, %v5402_v46 }
 0x638   : > { %1882 = vmax.xlane.f32.xlu0 %v1881_v61 }
 0x639   : > { %v1884_v0 = vsel %vm1706_vm4, %v1880_v63, -inf }
 0x63c   : > { %1885 = vmax.xlane.f32.xlu0 %v1884_v0 }
 0x6bd   : > { %v1760_v1 = vpop.xlane.xlu0 %1759 }
 0x6be   : > { %v1764_v2 = vsub.f32 %v1756_v49, %v1760_v1 }
 0x6bf   : > { %v1763_v4 = vpop.xlane.xlu1 %1762 }
 0x6c0   : > { %v1766_v62 = vmul.f32 1.442695, %v1764_v2  ;;  %v1765_v47 = vsub.f32 %v1757_v52, %v1763_v4 }
 0x6c2   : > { %4816 = vpow2.f32 %v1766_v62  ;;  %v1768_v5 = vmul.f32 1.442695, %v1765_v47 }
 0x6c4   : > { %4818 = vpow2.f32 %v1768_v5 }
 0x6c5   : > { %v1883_v6 = vpop.xlane.xlu0 %1882 }
 0x6c6   : > { %v1887_v7 = vsub.f32 %v1879_v60, %v1883_v6 }
 0x6c8   : > { %v1889_v8 = vmul.f32 1.442695, %v1887_v7 }
 0x6c9   : > { %v1886_v9 = vpop.xlane.xlu0 %1885 }
 0x6ca   : > { %4820 = vpow2.f32 %v1889_v8  ;;  %v1888_v10 = vsub.f32 %v1880_v63, %v1886_v9 }
 0x6cc   : > { %v4817_v3 = vpop.eup %4816  ;;  %v1891_v51 = vmul.f32 1.442695, %v1888_v10 }
 0x6cd   : > { %v1770_v13 = vsel %vm1706_vm4, %v4817_v3, 0.0 }
 0x6ce   : > { %v4819_v15 = vpop.eup %4818  ;;  %4822 = vpow2.f32 %v1891_v51  ;;  %1771 = vadd.xlane.f32.xlu1 %v1770_v13 }
 0x6cf   : > { %v1773_v16 = vsel %vm1706_vm4, %v4819_v15, 0.0 }
 0x6d0   : > { %1774 = vadd.xlane.f32.xlu0 %v1773_v16 }
 0x6d4   : > { %v4821_v18 = vpop.eup %4820 }
 0x6d5   : > { %v1893_v19 = vsel %vm1706_vm4, %v4821_v18, 0.0 }
 0x6d6   : > { %1894 = vadd.xlane.f32.xlu1 %v1893_v19 }
 0x6d8   : > { %v4823_v20 = vpop.eup %4822 }
 0x6d9   : > { %v1896_v21 = vsel %vm1706_vm4, %v4823_v20, 0.0 }
 0x6da   : > { %1897 = vadd.xlane.f32.xlu0 %v1896_v21 }
 0x6e7   : > { %1905 = vrot.lane.b32.xlu1 %v5376_v26, %s5948_s1  ;;  %s5976_s1 = smov 112  }
 0x6eb   : > { %2053 = vrot.lane.b32.xlu1 %v5374_v25, %s5943_s2 }
 0x6f0   : > { %2055 = vrot.lane.b32.xlu0 %v5374_v25, %s5945_s11  ;;  %s5977_s11 = smov 64  }
 0x75b   : > { %v1772_v29 = vpop.xlane.xlu1 %1771 }
 0x75c   : > { %4824 = vrcp.f32 %v1772_v29 }
 0x75d   : > { %v1775_v11 = vpop.xlane.xlu0 %1774 }
 0x75e   : > { %4826 = vrcp.f32 %v1775_v11 }
 0x763   : > { %v1895_v17 = vpop.xlane.xlu1 %1894 }
 0x764   : > { %4828 = vrcp.f32 %v1895_v17 }
 0x766   : > { %v4825_v31 = vpop.eup %4824 }
 0x767   : > { %v1898_v34 = vpop.xlane.xlu0 %1897  ;;  %v1778_v35 = vmul.f32 %v4825_v31, %v4817_v3  ;;  %v1906_v38 = vpop.permute.xlu1 %1905 }
 0x768   : > { %v4827_v14 = vpop.eup %4826  ;;  %4830 = vrcp.f32 %v1898_v34 }
 0x769   : > { %v1779_v37 = vmul.f32 %v4827_v14, %v4819_v15 }
 0x76b   : > { %v1780_v27 = vpack.c.bf16 %v1779_v37, %v1778_v35  ;;  %v2056_v42 = vpop.permute.xlu0 %2055  ;;  %v2054_v61 = vpop.permute.xlu1 %2053 }
 0x76c   : > { %v2061_v60 = vsel %vm1706_vm4, %v2056_v42, 0 }
 0x76d   : > { %4505 = vmatmul.mubr.msk.bf16.vlgmr.msra.gmra.mrb[8].mxu1 %vm1706_vm4, %v1780_v27 }
 0x76e   : > { %4515 = vmatpush3.bf16.msra.mxu1 %v1906_v38  ;;  %4516 = vmatprep.mubr.msk.bf16.mxu1 %vm4940_vm1, %v4939_v22  ;;  %v4829_v39 = vpop.eup %4828 }
 0x76f   : > { %4526 = vmatprep.subr.bf16.mxu1 %v4939_v22  ;;  %v1901_v41 = vmul.f32 %v4829_v39, %v4821_v18 }
 0x772   : > { %v4831_v40 = vpop.eup %4830 }
 0x773   : > { %v1902_v44 = vmul.f32 %v4831_v40, %v4823_v20 }
 0x775   : > { %v1903_v23 = vpack.c.bf16 %v1902_v44, %v1901_v41 }
 0x777   : > { %4517 = vmatmul.mubr.msk.bf16.vlgmr.msra.gmra.mrb[12].mxu1 %vm1706_vm4, %v1903_v23 }
 0x778   : > { %4528 = vmatprep.mubr.msk.bf16.mxu1 %vm4940_vm1, %v4939_v22  ;;  %4527 = vmatpush3.bf16.msra.mxu1 %v4718_v45 }
 0x779   : > { %4538 = vmatprep.subr.bf16.mxu1 %v4939_v22 }
 0x840   : > { %v1818_v24 = vpop.f32.mrb[8].mxu1 }
 0x841   : > { %v4506_v49 = vpop.f32.mrb[9].mxu1 }
 0x842   : > { %v1821_v50 = vpop.f32.mrb[10].mxu1  ;;  %v4720_v49 = vld [vmem:[%s5924_s18 + $0x10] sm:$0xff]  }
 0x843   : > { %v1825_v52 = vpack.c.bf16 %v1821_v50, %v1818_v24  ;;  %v4507_v53 = vpop.f32.mrb[11].mxu1 }
 0x845   : > { %4529 = vmatmul.mubr.msk.bf16.vlgmr.msra.gmra.mrb[16].mxu1 %vm1706_vm4, %v1825_v52 }
 0x846   : > { %4540 = vmatprep.mubr.msk.bf16.mxu1 %vm4940_vm1, %v4939_v22 }
 0x84a   : > { %v1945_v55 = vpop.f32.mrb[12].mxu1 }
 0x84b   : > { %v4518_v56 = vpop.f32.mrb[13].mxu1 }
 0x84c   : > { %v1948_v57 = vpop.f32.mrb[14].mxu1 }
 0x84d   : > { %v1952_v58 = vpack.c.bf16 %v1948_v57, %v1945_v55  ;;  %v4519_v59 = vpop.f32.mrb[15].mxu1 }
 0x84f   : > { %4523 = vmatmul.mubr.msk.bf16.vlgmr.msra.gmra.mrb[20].mxu0 %vm1706_vm4, %v1952_v58 }
 0x850   : > { %4533 = vmatpush3.bf16.xpose.msra.mxu0 %v2061_v60  ;;  %4534 = vmatprep.mubr.msk.bf16.mxu0 %vm4940_vm1, %v4939_v22 }
 0x851   : > { %4544 = vmatprep.subr.bf16.mxu0 %v4939_v22 }
 0x857   : > { %4535 = vmatmul.mubr.msk.bf16.vlgmr.msra.gmra.mrb[24].mxu0 %vm1706_vm4, %v2054_v61 }
 0x858   : > { %4546 = vmatprep.mubr.msk.bf16.mxu0 %vm4940_vm1, %v4939_v22  ;;  %4545 = vmatpush3.bf16.msra.mxu0 %v4720_v49 }
 0x859   : > { %4556 = vmatprep.subr.bf16.mxu0 %v4939_v22 }
 0x918   : > { %v2046_v63 = vpop.f32.mrb[16].mxu1 }
 0x919   : > { %v4530_v0 = vpop.f32.mrb[17].mxu1 }
 0x91a   : > { %v2049_v1 = vpop.f32.mrb[18].mxu1 }
 0x91b   : > { %v4531_v2 = vpop.f32.mrb[19].mxu1 }
 0x922   : > { %v1996_v4 = vpop.f32.mrb[20].mxu0 }
 0x923   : > { %v5448_v62 = vadd.f32 %v2046_v63, %v1996_v4  ;;  %v4524_v47 = vpop.f32.mrb[21].mxu0 }
 0x924   : > { %v1999_v5 = vpop.f32.mrb[22].mxu0 }
 0x925   : > { %v5450_v6 = vadd.f32 %v2049_v1, %v1999_v5  ;;  %v4525_v7 = vpop.f32.mrb[23].mxu0 }
 0x92a   : > { %v2097_v8 = vpop.f32.mrb[24].mxu0 }
 0x92b   : > { %v2104_v9 = vmul.f32 0.25, %v2097_v8  ;;  %v4536_v10 = vpop.f32.mrb[25].mxu0 }
 0x92c   : > { %v2100_v3 = vpop.f32.mrb[26].mxu0 }
 0x92d   : > { %v2105_v51 = vmul.f32 0.25, %v2100_v3  ;;  %v4537_v13 = vpop.f32.mrb[27].mxu0  ;;  %v2106_v15 = vadd.f32 %v2104_v9, %v5400_v43 }
 0x92f   : > { %v2108_v16 = vsel %vm1706_vm4, %v2106_v15, -inf  ;;  %v2107_v18 = vadd.f32 %v2105_v51, %v5402_v46 }
 0x930   : > { %2109 = vmax.xlane.f32.xlu1 %v2108_v16 }
 0x931   : > { %v2111_v19 = vsel %vm1706_vm4, %v2107_v18, -inf }
 0x932   : > { %2112 = vmax.xlane.f32.xlu0 %v2111_v19 }
 0x9bd   : > { %v2110_v20 = vpop.xlane.xlu1 %2109 }
 0x9be   : > { %v2114_v21 = vsub.f32 %v2106_v15, %v2110_v20 }
 0x9bf   : > { %v2113_v29 = vpop.xlane.xlu0 %2112 }
 0x9c0   : > { %v2116_v11 = vmul.f32 1.442695, %v2114_v21  ;;  %v2115_v17 = vsub.f32 %v2107_v18, %v2113_v29 }
 0x9c2   : > { %4832 = vpow2.f32 %v2116_v11  ;;  %v2118_v31 = vmul.f32 1.442695, %v2115_v17 }
 0x9c4   : > { %4834 = vpow2.f32 %v2118_v31 }
 0x9cc   : > { %v4833_v34 = vpop.eup %4832 }
 0x9cd   : > { %v2120_v14 = vsel %vm1706_vm4, %v4833_v34, 0.0 }
 0x9ce   : > { %v4835_v35 = vpop.eup %4834  ;;  %2121 = vadd.xlane.f32.xlu0 %v2120_v14 }
 0x9cf   : > { %v2123_v37 = vsel %vm1706_vm4, %v4835_v35, 0.0 }
 0x9d0   : > { %2124 = vadd.xlane.f32.xlu1 %v2123_v37 }
 0x9e1   : > { %2233 = vrot.lane.b32.xlu1 %v5374_v25, %s5940_s8  ;;  %s5980_s8 = smov 96  }
 0x9e4   : > { %2131 = vrot.lane.b32.xlu0 %v5376_v26, %s5943_s2 }
 0x9e5   : > { %2231 = vrot.lane.b32.xlu1 %v5374_v25, %s5941_s4 }
 0xa5b   : > { %v2122_v27 = vpop.xlane.xlu0 %2121 }
 0xa5c   : > { %4836 = vrcp.f32 %v2122_v27 }
 0xa5d   : > { %v2125_v38 = vpop.xlane.xlu1 %2124 }
 0xa5e   : > { %4838 = vrcp.f32 %v2125_v38 }
 0xa5f   : > { %v2132_v39 = vpop.permute.xlu0 %2131 }
 0xa60   : > { %4539 = vmatpush3.bf16.msra.mxu1 %v2132_v39 }
 0xa61   : > { %4550 = vmatprep.subr.bf16.mxu1 %v4939_v22  ;;  %v2234_v45 = vpop.permute.xlu1 %2233 }
 0xa62   : > { %v2239_v24 = vsel %vm1706_vm4, %v2234_v45, 0 }
 0xa65   : > { %v2232_v25 = vpop.permute.xlu1 %2231 }
 0xa66   : > { %v4837_v40 = vpop.eup %4836 }
 0xa67   : > { %v2128_v44 = vmul.f32 %v4837_v40, %v4833_v34 }
 0xa68   : > { %v4839_v41 = vpop.eup %4838 }
 0xa69   : > { %v2129_v23 = vmul.f32 %v4839_v41, %v4835_v35 }
 0xa6b   : > { %v2130_v33 = vpack.c.bf16 %v2129_v23, %v2128_v44  ;;  %v4199_v23 = vld [vmem:[%s5925_s19] ss:$0 sm:$0xff] }
 0xa6d   : > { %4541 = vmatmul.mubr.msk.bf16.vlgmr.msra.gmra.mrb[20].mxu1 %vm1706_vm4, %v2130_v33 }
 0xa6e   : > { %4551 = vmatpush3.bf16.xpose.msra.mxu1 %v2239_v24  ;;  %4552 = vmatprep.mubr.msk.bf16.mxu1 %vm4940_vm1, %v4939_v22 }
 0xa6f   : > { %4562 = vmatprep.subr.bf16.mxu1 %v4939_v22 }
 0xa75   : > { %4553 = vmatmul.mubr.msk.bf16.vlgmr.msra.gmra.mrb[24].mxu1 %vm1706_vm4, %v2232_v25 }
 0xa76   : > { %4564 = vmatprep.mubr.msk.bf16.mxu1 %vm4940_vm1, %v4939_v22 }
 0xb40   : > { %v2171_v50 = vpop.f32.mrb[20].mxu1 }
 0xb41   : > { %v4542_v52 = vpop.f32.mrb[21].mxu1 }
 0xb42   : > { %v2174_v53 = vpop.f32.mrb[22].mxu1 }
 0xb43   : > { %v2178_v55 = vpack.c.bf16 %v2174_v53, %v2171_v50  ;;  %v4543_v56 = vpop.f32.mrb[23].mxu1 }
 0xb45   : > { %4547 = vmatmul.mubr.msk.bf16.vlgmr.msra.gmra.mrb[28].mxu0 %vm1706_vm4, %v2178_v55 }
 0xb46   : > { %4558 = vmatprep.mubr.msk.bf16.mxu0 %vm4940_vm1, %v4939_v22 }
 0xb48   : > { %v2275_v42 = vpop.f32.mrb[24].mxu1 }
 0xb49   : > { %v2282_v57 = vmul.f32 0.25, %v2275_v42  ;;  %v4554_v58 = vpop.f32.mrb[25].mxu1 }
 0xb4a   : > { %v2278_v59 = vpop.f32.mrb[26].mxu1 }
 0xb4b   : > { %v2283_v60 = vmul.f32 0.25, %v2278_v59  ;;  %v4555_v61 = vpop.f32.mrb[27].mxu1  ;;  %v2284_v63 = vadd.f32 %v2282_v57, %v5400_v43 }
 0xb4d   : > { %v2286_v0 = vsel %vm1706_vm4, %v2284_v63, -inf  ;;  %v2285_v1 = vadd.f32 %v2283_v60, %v5402_v46 }
 0xb4e   : > { %2287 = vmax.xlane.f32.xlu0 %v2286_v0  ;;  %v4724_v0 = vld [vmem:[%s5928_s22 + $0x4] ss:$8 sps:$4 sm:$0xff]  }
 0xb4f   : > { %v2289_v2 = vsel %vm1706_vm4, %v2285_v1, -inf }
 0xb50   : > { %2290 = vmax.xlane.f32.xlu1 %v2289_v2  ;;  %v4727_v2 = vld [vmem:[%s5928_s22 + $0x14] ss:$8 sps:$4 sm:$0xff]  }
 0xb61   : > { %2309 = vrot.lane.b32.xlu1 %v5376_v26, %s5941_s4  ;;  %v4721_v26 = vld [vmem:[%s5924_s18 + $0x18] sm:$0xff]  }
 0xb62   : > { %4563 = vmatpush3.bf16.msra.mxu1 %v4721_v26 }
 0xbdb   : > { %v2288_v4 = vpop.xlane.xlu0 %2287 }
 0xbdc   : > { %v2292_v47 = vsub.f32 %v2284_v63, %v2288_v4  ;;  %v4725_v4 = vld [vmem:[%s5928_s22 + $0x10] ss:$8 sps:$4 sm:$0xff]  }
 0xbdd   : > { %v2291_v5 = vpop.xlane.xlu1 %2290 }
 0xbde   : > { %v2294_v7 = vmul.f32 1.442695, %v2292_v47  ;;  %v2293_v8 = vsub.f32 %v2285_v1, %v2291_v5  ;;  %v4722_v1 = vld [vmem:[%s5928_s22] ss:$8 sps:$4 sm:$0xff]   ;;  %v4730_v47 = vld [vmem:[%s5928_s22 + $0x24] ss:$8 sps:$4 sm:$0xff]  }
 0xbdf   : > { %v4728_v5 = vld [vmem:[%s5928_s22 + $0x20] ss:$8 sps:$4 sm:$0xff]  }
 0xbe0   : > { %4840 = vpow2.f32 %v2294_v7  ;;  %v2296_v9 = vmul.f32 1.442695, %v2293_v8  ;;  %v4731_v7 = vld [vmem:[%s5928_s22 + $0x30] ss:$8 sps:$4 sm:$0xff]   ;;  %v4733_v8 = vld [vmem:[%s5928_s22 + $0x34] ss:$8 sps:$4 sm:$0xff]  }
 0xbe1   : > { %v2310_v10 = vpop.permute.xlu1 %2309 }
 0xbe2   : > { %4842 = vpow2.f32 %v2296_v9  ;;  %4557 = vmatpush3.bf16.msra.mxu0 %v2310_v10 }
 0xbe3   : > { %2522 = vmatprep.subr.bf16.mxu0 %v4724_v0 }
 0xbea   : > { %v4841_v3 = vpop.eup %4840 }
 0xbeb   : > { %v2298_v51 = vsel %vm1706_vm4, %v4841_v3, 0.0 }
 0xbec   : > { %v4843_v13 = vpop.eup %4842  ;;  %2299 = vadd.xlane.f32.xlu0 %v2298_v51 }
 0xbed   : > { %v2301_v15 = vsel %vm1706_vm4, %v4843_v13, 0.0 }
 0xbf0   : > { %2302 = vadd.xlane.f32.xlu0 %v2301_v15 }
 0xc18   : > { %v2222_v16 = vpop.f32.mrb[28].mxu0 }
 0xc19   : > { %v2229_v18 = vadd.f32 %v2222_v16, %v5448_v62  ;;  %v4548_v19 = vpop.f32.mrb[29].mxu0 }
 0xc1a   : > { %v2225_v20 = vpop.f32.mrb[30].mxu0 }
 0xc1b   : > { %v2230_v21 = vadd.f32 %v2225_v20, %v5450_v6  ;;  %v4549_v29 = vpop.f32.mrb[31].mxu0 }
 0xc1c   : > { %v4201_v29 = vld [vmem:[%s5927_s21] ss:$0 sm:$0xff] }
 0xc79   : > { %v2300_v11 = vpop.xlane.xlu0 %2299 }
 0xc7a   : > { %4844 = vrcp.f32 %v2300_v11 }
 0xc7d   : > { %v2303_v17 = vpop.xlane.xlu0 %2302 }
 0xc7e   : > { %4846 = vrcp.f32 %v2303_v17 }
 0xc84   : > { %v4845_v31 = vpop.eup %4844 }
 0xc85   : > { %v2306_v14 = vmul.f32 %v4845_v31, %v4841_v3 }
 0xc88   : > { %v4847_v34 = vpop.eup %4846 }
 0xc89   : > { %v2307_v35 = vmul.f32 %v4847_v34, %v4843_v13 }
 0xc8b   : > { %v2308_v37 = vpack.c.bf16 %v2307_v35, %v2306_v14  ;;  %v4734_v14 = vld [vmem:[%s5930_s24 + $0x40] sm:$0xff]  }
 0xc8c   : > { %v4735_v35 = vld [vmem:[%s5930_s24] sm:$0xff]   ;;  %4388 = vmatprep.subr.bf16.mxu1 %v4734_v14 }
 0xc8d   : > { %4559 = vmatmul.mubr.msk.bf16.vlgmr.msra.gmra.mrb[32].mxu0 %vm1706_vm4, %v2308_v37  ;;  %v4736_v37 = vld [vmem:[%s5930_s24 + $0x48] sm:$0xff]  }
 0xc8e   : > { %2554 = vmatprep.mubr.bf16.mxu0 %v4938_v12  ;;  %2523 = vmatpush1.bf16.msra.mxu0 %v4722_v1 }
 0xc8f   : > { %2524 = vmatprep.subr.bf16.mxu0 %v4727_v2 }
 0xc92   : > { %2525 = vmatpush1.bf16.msra.mxu0 %v4725_v4 }
 0xc93   : > { %2526 = vmatprep.subr.bf16.mxu0 %v4730_v47 }
 0xc96   : > { %2527 = vmatpush1.bf16.msra.mxu0 %v4728_v5 }
 0xc97   : > { %2528 = vmatprep.subr.bf16.mxu0 %v4733_v8 }
 0xc9a   : > { %2529 = vmatpush1.bf16.msra.mxu0 %v4731_v7 }
 0xd60   : > { %v2349_v27 = vpop.f32.mrb[32].mxu0 }
 0xd61   : > { %v4560_v62 = vpop.f32.mrb[33].mxu0 }
 0xd62   : > { %v2352_v38 = vpop.f32.mrb[34].mxu0  ;;  %v4738_v62 = vld [vmem:[%s5930_s24 + $0x50] sm:$0xff]  }
 0xd63   : > { %v2356_v39 = vpack.c.bf16 %v2352_v38, %v2349_v27  ;;  %v4561_v40 = vpop.f32.mrb[35].mxu0  ;;  %v4737_v27 = vld [vmem:[%s5930_s24 + $0x8] sm:$0xff]   ;;  %v4739_v38 = vld [vmem:[%s5930_s24 + $0x10] sm:$0xff]  }
 0xd64   : > { %v4741_v40 = vld [vmem:[%s5930_s24 + $0x18] sm:$0xff]  }
 0xd65   : > { %4565 = vmatmul.mubr.msk.bf16.vlgmr.msra.gmra.mrb[28].mxu1 %vm1706_vm4, %v2356_v39  ;;  %v4740_v39 = vld [vmem:[%s5930_s24 + $0x58] sm:$0xff]  }
 0xd66   : > { %4389 = vmatpush3.bf16.msra.mxu1 %v4735_v35 }
 0xd67   : > { %4390 = vmatprep.subr.bf16.mxu1 %v4736_v37 }
 0xd6a   : > { %4391 = vmatpush3.bf16.msra.mxu1 %v4737_v27 }
 0xd6b   : > { %4392 = vmatprep.subr.bf16.mxu1 %v4738_v62 }
 0xd6e   : > { %4393 = vmatpush3.bf16.msra.mxu1 %v4739_v38 }
 0xd6f   : > { %4394 = vmatprep.subr.bf16.mxu1 %v4740_v39 }
 0xd72   : > { %4395 = vmatpush3.bf16.msra.mxu1 %v4741_v40 }
 0xe38   : > { %v2400_v6 = vpop.f32.mrb[28].mxu1 }
 0xe39   : > { %v2407_v41 = vadd.f32 %v2400_v6, %v2229_v18  ;;  %v4566_v44 = vpop.f32.mrb[29].mxu1  ;;  %v4200_v18 = vld [vmem:[%s5926_s20] ss:$0 sm:$0xff] }
 0xe3a   : > { %v2403_v45 = vpop.f32.mrb[30].mxu1  ;;  %v4742_v6 = vld [vmem:[%s5930_s24 + $0x60] sm:$0xff]   ;;  %v4744_v44 = vld [vmem:[%s5930_s24 + $0x68] sm:$0xff]  }
 0xe3b   : > { %v2409_v33 = vadd.f32 %v2407_v41, %v5309_v54  ;;  %v2408_v24 = vadd.f32 %v2403_v45, %v2230_v21  ;;  %v4567_v25 = vpop.f32.mrb[31].mxu1  ;;  %v4743_v41 = vld [vmem:[%s5930_s24 + $0x20] sm:$0xff]   ;;  %4396 = vmatprep.subr.bf16.mxu1 %v4742_v6  ;;  %v4746_v45 = vld [vmem:[%s5930_s24 + $0x70] sm:$0xff]  }
 0xe3c   : > { %4397 = vmatpush3.bf16.msra.mxu1 %v4743_v41  ;;  %v4749_v25 = vld [vmem:[%s5930_s24 + $0x38] sm:$0xff]  }
 0xe3d   : > { %v5500_v49 = vadd.f32 %v4199_v23, %v2409_v33  ;;  %v2410_v50 = vadd.f32 %v2408_v24, %v5328_v36  ;;  %4398 = vmatprep.subr.bf16.mxu1 %v4744_v44  ;;  %v4747_v33 = vld [vmem:[%s5930_s24 + $0x30] sm:$0xff]   ;;  %v4748_v24 = vld [vmem:[%s5930_s24 + $0x78] sm:$0xff]  }
 0xe3f   : > { %v5503_v52 = vadd.f32 %v4199_v23, %v2410_v50  ;;  %v2420_v53 = vsel %vm1546_vm3, %v5500_v49, 0.0  ;;  %v4745_v23 = vld [vmem:[%s5930_s24 + $0x28] sm:$0xff]   ;;  %v2467_v50 = vld [vmem:[%s5929_s23] ss:$2 sm:$0x3] }
 0xe40   : > { %2421 = vadd.xlane.f32.xlu0 %v2420_v53  ;;  %4399 = vmatpush3.bf16.msra.mxu1 %v4745_v23  ;;  %v2472_v53 = vrot.slane %v2467_v50, %v5175_v30 }
 0xe41   : > { %v2423_v55 = vsel %vm1546_vm3, %v5503_v52, 0.0  ;;  %4400 = vmatprep.subr.bf16.mxu1 %v4746_v45  ;;  %v4211_v45 = vld [vmem:[%s5931_s25] ss:$0 sm:$0xff] }
 0xe44   : > { %2424 = vadd.xlane.f32.xlu0 %v2423_v55  ;;  %4401 = vmatpush3.bf16.msra.mxu1 %v4747_v33  ;;  %v2476_v55 = vrot.slane %v2467_v50, %v5172_v28 }
 0xe45   : > { %4402 = vmatprep.subr.bf16.mxu1 %v4748_v24 }
 0xe48   : > { %4403 = vmatpush3.bf16.msra.mxu1 %v4749_v25 }
 0xe49   : > { %4574 = vmatprep.subr.bf16.mxu1 %v4939_v22 }
 0xecd   : > { %v2422_v56 = vpop.xlane.xlu0 %2421 }
 0xece   : > { %v2426_v42 = vmul.f32 0.015625, %v2422_v56 }
 0xed0   : > { %v2428_v54 = vsub.f32 %v5500_v49, %v2426_v42 }
 0xed1   : > { %v2425_v57 = vpop.xlane.xlu0 %2424 }
 0xed2   : > { %v2427_v58 = vmul.f32 0.015625, %v2425_v57  ;;  %v2430_v59 = vmul.f32 %v2428_v54, %v2428_v54 }
 0xed4   : > { %v2429_v60 = vsub.f32 %v5503_v52, %v2427_v58  ;;  %v2432_v36 = vsel %vm1546_vm3, %v2430_v59, 0.0 }
 0xed5   : > { %2433 = vadd.xlane.f32.xlu0 %v2432_v36 }
 0xed6   : > { %v2431_v61 = vmul.f32 %v2429_v60, %v2429_v60 }
 0xed8   : > { %v2435_v63 = vsel %vm1546_vm3, %v2431_v61, 0.0 }
 0xed9   : > { %2436 = vadd.xlane.f32.xlu0 %v2435_v63 }
 0xf62   : > { %v2434_v9 = vpop.xlane.xlu0 %2433 }
 0xf63   : > { %v2438_v10 = vmul.f32 0.015625, %v2434_v9 }
 0xf65   : > { %v2440_v3 = vadd.f32 1e-05, %v2438_v10 }
 0xf66   : > { %v2437_v51 = vpop.xlane.xlu0 %2436 }
 0xf67   : > { %4848 = vrsqrt.f32 %v2440_v3  ;;  %v2439_v13 = vmul.f32 0.015625, %v2437_v51 }
 0xf69   : > { %v2441_v15 = vadd.f32 1e-05, %v2439_v13 }
 0xf6b   : > { %4850 = vrsqrt.f32 %v2441_v15 }
 0xf71   : > { %v4849_v26 = vpop.eup %4848 }
 0xf72   : > { %v2444_v16 = vmul.f32 %v4849_v26, %v2428_v54 }
 0xf74   : > { %v2450_v20 = vmul.f32 %v4200_v18, %v2444_v16 }
 0xf75   : > { %v4851_v19 = vpop.eup %4850 }
 0xf76   : > { %v2445_v21 = vmul.f32 %v4851_v19, %v2429_v60  ;;  %v2456_v17 = vadd.f32 %v4201_v29, %v2450_v20 }
 0xf78   : > { %v2451_v11 = vmul.f32 %v4200_v18, %v2445_v21 }
 0xf7a   : > { %v2457_v31 = vadd.f32 %v4201_v29, %v2451_v11 }
 0xf7c   : > { %v2458_v34 = vpack.c.bf16 %v2457_v31, %v2456_v17 }
 0xf7e   : > { %4210 = vmatmul.mubr.msk.bf16.vlgmr.msra.gmra.mrb[36].mxu0 %vm1546_vm3, %v2458_v34 }
 0xf7f   : > { %2919 = vmatprep.mubr.bf16.mxu0 %v4938_v12 }
0x1051   : > { %v2556_v56 = vpop.f32.mrb[36].mxu0 }
0x1052   : > { %v2557_v42 = vadd.f32 %v2556_v56, %v2472_v53  ;;  %v2558_v54 = vpop.f32.mrb[37].mxu0 }
0x1053   : > { %v2559_v57 = vadd.f32 %v2558_v54, %v2476_v55  ;;  %v2560_v58 = vpop.f32.mrb[38].mxu0 }
0x1054   : > { %v2569_v59 = vmul.f32 0.044715, %v2557_v42  ;;  %v2561_v60 = vadd.f32 %v2560_v58, %v2472_v53  ;;  %v2562_v36 = vpop.f32.mrb[39].mxu0  ;;  %v2565_v34 = vmul.f32 0.5, %v2557_v42 }
0x1055   : > { %v2570_v61 = vmul.f32 0.044715, %v2559_v57  ;;  %v2563_v63 = vadd.f32 %v2562_v36, %v2476_v55  ;;  %v2566_v37 = vmul.f32 0.5, %v2559_v57 }
0x1056   : > { %v2573_v0 = vmul.f32 %v2569_v59, %v2557_v42  ;;  %v2571_v1 = vmul.f32 0.044715, %v2561_v60  ;;  %v2567_v14 = vmul.f32 0.5, %v2561_v60 }
0x1057   : > { %v2574_v2 = vmul.f32 %v2570_v61, %v2559_v57  ;;  %v2572_v4 = vmul.f32 0.044715, %v2563_v63  ;;  %v2568_v27 = vmul.f32 0.5, %v2563_v63 }
0x1058   : > { %v2577_v47 = vmul.f32 %v2573_v0, %v2557_v42  ;;  %v2575_v5 = vmul.f32 %v2571_v1, %v2561_v60 }
0x1059   : > { %v2578_v7 = vmul.f32 %v2574_v2, %v2559_v57  ;;  %v2576_v8 = vmul.f32 %v2572_v4, %v2563_v63  ;;  %v4752_v4 = vld [vmem:[%s5922_s16 + $0x44] ss:$8 sps:$4 sm:$0xff]  }
0x105a   : > { %v2581_v9 = vadd.f32 %v2577_v47, %v2557_v42  ;;  %v2579_v10 = vmul.f32 %v2575_v5, %v2561_v60  ;;  %v4750_v47 = vld [vmem:[%s5922_s16 + $0x40] ss:$8 sps:$4 sm:$0xff]   ;;  %2887 = vmatprep.subr.bf16.mxu0 %v4752_v4  ;;  %v4755_v5 = vld [vmem:[%s5922_s16 + $0x54] ss:$8 sps:$4 sm:$0xff]  }
0x105b   : > { %v2580_v3 = vmul.f32 %v2576_v8, %v2563_v63  ;;  %v2582_v51 = vadd.f32 %v2578_v7, %v2559_v57  ;;  %2888 = vmatpush1.bf16.msra.mxu0 %v4750_v47  ;;  %v4753_v7 = vld [vmem:[%s5922_s16 + $0x50] ss:$8 sps:$4 sm:$0xff]   ;;  %v4758_v8 = vld [vmem:[%s5922_s16 + $0x64] ss:$8 sps:$4 sm:$0xff]  }
0x105c   : > { %v2585_v13 = vmul.f32 0.7978846, %v2581_v9  ;;  %v2583_v15 = vadd.f32 %v2579_v10, %v2561_v60  ;;  %2889 = vmatprep.subr.bf16.mxu0 %v4755_v5  ;;  %v4756_v9 = vld [vmem:[%s5922_s16 + $0x60] ss:$8 sps:$4 sm:$0xff]   ;;  %v4759_v10 = vld [vmem:[%s5922_s16 + $0x70] ss:$8 sps:$4 sm:$0xff]  }
0x105d   : > { %v2584_v26 = vadd.f32 %v2580_v3, %v2563_v63  ;;  %v2586_v16 = vmul.f32 0.7978846, %v2582_v51  ;;  %v4761_v3 = vld [vmem:[%s5922_s16 + $0x74] ss:$8 sps:$4 sm:$0xff]  }
0x105e   : > { %4852 = vtanh.f32 %v2585_v13  ;;  %v2587_v18 = vmul.f32 0.7978846, %v2583_v15 }
0x105f   : > { %v2588_v19 = vmul.f32 0.7978846, %v2584_v26  ;;  %4854 = vtanh.f32 %v2586_v16  ;;  %2890 = vmatpush1.bf16.msra.mxu0 %v4753_v7 }
0x1060   : > { %4856 = vtanh.f32 %v2587_v18  ;;  %2891 = vmatprep.subr.bf16.mxu0 %v4758_v8 }
0x1061   : > { %4858 = vtanh.f32 %v2588_v19 }
0x1063   : > { %2892 = vmatpush1.bf16.msra.mxu0 %v4756_v9 }
0x1064   : > { %2893 = vmatprep.subr.bf16.mxu0 %v4761_v3 }
0x1067   : > { %2894 = vmatpush1.bf16.msra.mxu0 %v4759_v10 }
0x1068   : > { %v4853_v20 = vpop.eup %4852  ;;  %4568 = vmatprep.subr.bf16.mxu0 %v4939_v22 }
0x1069   : > { %v4855_v21 = vpop.eup %4854  ;;  %v2593_v29 = vadd.f32 1.0, %v4853_v20 }
0x106a   : > { %v4857_v11 = vpop.eup %4856  ;;  %v2594_v17 = vadd.f32 1.0, %v4855_v21  ;;  %v4228_v21 = vld [vmem:[%s5920_s14 + $0x1] ss:$0 sm:$0xff] }
0x106b   : > { %v4859_v31 = vpop.eup %4858  ;;  %v2595_v35 = vadd.f32 1.0, %v4857_v11  ;;  %v2597_v38 = vmul.f32 %v2593_v29, %v2565_v34 }
0x106c   : > { %v2596_v62 = vadd.f32 1.0, %v4859_v31  ;;  %v2598_v40 = vmul.f32 %v2594_v17, %v2566_v37  ;;  %v4229_v31 = vld [vmem:[%s5921_s15 + $0x1] ss:$0 sm:$0xff] }
0x106d   : > { %v2599_v39 = vmul.f32 %v2595_v35, %v2567_v14 }
0x106e   : > { %v2600_v6 = vmul.f32 %v2596_v62, %v2568_v27  ;;  %v4238_v27 = vld [vmem:[%s5923_s17 + $0x1] ss:$2 sm:$0x3] }
0x106f   : > { %v2601_v41 = vpack.c.bf16 %v2599_v39, %v2597_v38  ;;  %v2837_v62 = vrot.slane %v4238_v27, %v5175_v30  ;;  %v2841_v39 = vrot.slane %v4238_v27, %v5172_v28 }
0x1070   : > { %v2602_v44 = vpack.c.bf16 %v2600_v6, %v2598_v40 }
0x1072   : > { %2768 = vmatprep.mubr.bf16.mxu1 %v2602_v44 }
0x1073   : > { %2769 = vmatmul.mubr.bf16.vlgmr.msra.gmra.mrb[32].mxu1 %v2601_v41 }
0x1074   : > { %4576 = vmatprep.mubr.msk.bf16.mxu1 %vm4940_vm1, %v4939_v22 }
0x1146   : > { %v4404_v23 = vpop.f32.mrb[32].mxu1 }
0x1147   : > { %v4405_v33 = vpop.f32.mrb[33].mxu1 }
0x1148   : > { %v4406_v24 = vadd.f32 %v4405_v33, %v4404_v23  ;;  %v4407_v25 = vpop.f32.mrb[34].mxu1 }
0x1149   : > { %v4408_v50 = vpop.f32.mrb[35].mxu1 }
0x114a   : > { %v2771_v53 = vadd.f32 %v4406_v24, %v4211_v45  ;;  %v4409_v55 = vadd.f32 %v4408_v50, %v4407_v25 }
0x114c   : > { %v2777_v56 = vadd.f32 %v2771_v53, %v5500_v49  ;;  %v2774_v42 = vadd.f32 %v4409_v55, %v4211_v45 }
0x114e   : > { %v2778_v54 = vadd.f32 %v2774_v42, %v5503_v52  ;;  %v5607_v57 = vadd.f32 %v2777_v56, %v5306_v48 }
0x1150   : > { %v2783_v58 = vsel %vm1546_vm3, %v5607_v57, 0.0  ;;  %v5612_v59 = vadd.f32 %v2778_v54, %v5325_v32 }
0x1151   : > { %2784 = vadd.xlane.f32.xlu1 %v2783_v58 }
0x1152   : > { %v2786_v60 = vsel %vm1546_vm3, %v5612_v59, 0.0 }
0x1153   : > { %2787 = vadd.xlane.f32.xlu0 %v2786_v60 }
0x11de   : > { %v2785_v36 = vpop.xlane.xlu1 %2784 }
0x11df   : > { %v2789_v61 = vmul.f32 0.015625, %v2785_v36 }
0x11e0   : > { %v2788_v49 = vpop.xlane.xlu0 %2787 }
0x11e1   : > { %v2791_v63 = vsub.f32 %v5607_v57, %v2789_v61  ;;  %v2790_v52 = vmul.f32 0.015625, %v2788_v49 }
0x11e3   : > { %v2792_v48 = vsub.f32 %v5612_v59, %v2790_v52  ;;  %v2793_v0 = vmul.f32 %v2791_v63, %v2791_v63 }
0x11e5   : > { %v2795_v1 = vsel %vm1546_vm3, %v2793_v0, 0.0  ;;  %v2794_v2 = vmul.f32 %v2792_v48, %v2792_v48 }
0x11e6   : > { %2796 = vadd.xlane.f32.xlu0 %v2795_v1 }
0x11e7   : > { %v2798_v32 = vsel %vm1546_vm3, %v2794_v2, 0.0 }
0x11ea   : > { %2799 = vadd.xlane.f32.xlu0 %v2798_v32 }
0x1273   : > { %v2797_v51 = vpop.xlane.xlu0 %2796 }
0x1274   : > { %v2801_v13 = vmul.f32 0.015625, %v2797_v51 }
0x1276   : > { %v2803_v15 = vadd.f32 1e-05, %v2801_v13 }
0x1277   : > { %v2800_v26 = vpop.xlane.xlu0 %2799 }
0x1278   : > { %4860 = vrsqrt.f32 %v2803_v15  ;;  %v2802_v16 = vmul.f32 0.015625, %v2800_v26 }
0x127a   : > { %v2804_v18 = vadd.f32 1e-05, %v2802_v16 }
0x127c   : > { %4862 = vrsqrt.f32 %v2804_v18 }
0x1282   : > { %v4861_v19 = vpop.eup %4860 }
0x1283   : > { %v2807_v20 = vmul.f32 %v4861_v19, %v2791_v63 }
0x1285   : > { %v2813_v11 = vmul.f32 %v4228_v21, %v2807_v20 }
0x1286   : > { %v4863_v29 = vpop.eup %4862 }
0x1287   : > { %v2808_v17 = vmul.f32 %v4863_v29, %v2792_v48  ;;  %v2819_v14 = vadd.f32 %v4229_v31, %v2813_v11 }
0x1289   : > { %v2814_v34 = vmul.f32 %v4228_v21, %v2808_v17 }
0x128b   : > { %v2820_v35 = vadd.f32 %v4229_v31, %v2814_v34 }
0x128d   : > { %v2821_v37 = vpack.c.bf16 %v2820_v35, %v2819_v14 }
0x128f   : > { %4247 = vmatmul.mubr.msk.bf16.vlgmr.msra.gmra.mrb[40].mxu0 %vm1546_vm3, %v2821_v37 }
0x1290   : > { %4570 = vmatprep.mubr.msk.bf16.mxu0 %vm4940_vm1, %v4939_v22 }
0x1362   : > { %v2921_v38 = vpop.f32.mrb[40].mxu0 }
0x1363   : > { %v2923_v40 = vpop.f32.mrb[41].mxu0  ;;  %v2922_v41 = vadd.f32 %v2921_v38, %v2837_v62 }
0x1364   : > { %v2925_v6 = vpop.f32.mrb[42].mxu0  ;;  %v2924_v45 = vadd.f32 %v2923_v40, %v2841_v39 }
0x1365   : > { %v2926_v44 = vadd.f32 %v2925_v6, %v2837_v62  ;;  %v2927_v23 = vpop.f32.mrb[43].mxu0 }
0x1366   : > { %v2928_v33 = vadd.f32 %v2927_v23, %v2841_v39 }
0x1367   : > { %v5659_v24 = vpack.c.bf16 %v2926_v44, %v2922_v41 }
0x1368   : > { %v5661_v25 = vpack.c.bf16 %v2928_v33, %v2924_v45 }
0x1369   : > { %3063 = vrot.lane.b32.xlu1 %v5659_v24, %s5976_s1  ;;  %2942 = vrot.lane.b32.xlu0 %v5659_v24, %s5977_s11 }
0x136a   : > { %4575 = vmatpush3.bf16.msra.mxu1 %v5661_v25 }
0x136b   : > { %4586 = vmatprep.subr.bf16.mxu1 %v4939_v22 }
0x136d   : > { %3065 = vrot.lane.b32.xlu0 %v5659_v24, %s5978_s6 }
0x13db   : > { %v2943_v50 = vpop.permute.xlu0 %2942  ;;  %v3064_v42 = vpop.permute.xlu1 %3063 }
0x13dc   : > { %v2948_v53 = vsel %vm1706_vm4, %v2943_v50, 0 }
0x13dd   : > { %4569 = vmatpush3.bf16.xpose.msra.mxu0 %v2948_v53 }
0x13de   : > { %4580 = vmatprep.subr.bf16.mxu0 %v4939_v22 }
0x13df   : > { %v3066_v55 = vpop.permute.xlu0 %3065 }
0x13e0   : > { %v3071_v56 = vsel %vm1706_vm4, %v3066_v55, 0 }
0x13e4   : > { %4571 = vmatmul.mubr.msk.bf16.vlgmr.msra.gmra.mrb[44].mxu0 %vm1706_vm4, %v5659_v24 }
0x13e5   : > { %4581 = vmatpush3.bf16.xpose.msra.mxu0 %v3071_v56  ;;  %4582 = vmatprep.mubr.msk.bf16.mxu0 %vm4940_vm1, %v4939_v22 }
0x13e6   : > { %4592 = vmatprep.subr.bf16.mxu0 %v4939_v22 }
0x13ec   : > { %4583 = vmatmul.mubr.msk.bf16.vlgmr.msra.gmra.mrb[48].mxu0 %vm1706_vm4, %v3064_v42 }
0x13ed   : > { %4594 = vmatprep.mubr.msk.bf16.mxu0 %vm4940_vm1, %v4939_v22 }
0x14b7   : > { %v2984_v54 = vpop.f32.mrb[44].mxu0 }
0x14b8   : > { %v2991_v58 = vmul.f32 0.25, %v2984_v54  ;;  %v4572_v60 = vpop.f32.mrb[45].mxu0 }
0x14b9   : > { %v2987_v36 = vpop.f32.mrb[46].mxu0  ;;  %v4763_v60 = vld [vmem:[%s5924_s18 + $0x28] sm:$0xff]  }
0x14ba   : > { %v2992_v61 = vmul.f32 0.25, %v2987_v36  ;;  %v4573_v49 = vpop.f32.mrb[47].mxu0  ;;  %v2993_v63 = vadd.f32 %v2991_v58, %v5400_v43  ;;  %v4762_v58 = vld [vmem:[%s5924_s18 + $0x20] sm:$0xff]   ;;  %4593 = vmatpush3.bf16.msra.mxu0 %v4763_v60  ;;  %v4764_v60 = vld [vmem:[%s5924_s18 + $0x30] sm:$0xff]  }
0x14bb   : > { %4604 = vmatprep.subr.bf16.mxu0 %v4939_v22 }
0x14bc   : > { %v2995_v52 = vsel %vm1706_vm4, %v2993_v63, -inf  ;;  %v2994_v48 = vadd.f32 %v2992_v61, %v5402_v46 }
0x14bd   : > { %2996 = vmax.xlane.f32.xlu0 %v2995_v52 }
0x14be   : > { %v2998_v0 = vsel %vm1706_vm4, %v2994_v48, -inf }
0x14bf   : > { %2999 = vmax.xlane.f32.xlu1 %v2998_v0  ;;  %v3107_v1 = vpop.f32.mrb[48].mxu0 }
0x14c0   : > { %v3114_v2 = vmul.f32 0.25, %v3107_v1  ;;  %v4584_v32 = vpop.f32.mrb[49].mxu0 }
0x14c1   : > { %v3110_v4 = vpop.f32.mrb[50].mxu0 }
0x14c2   : > { %v3115_v47 = vmul.f32 0.25, %v3110_v4  ;;  %v4585_v5 = vpop.f32.mrb[51].mxu0  ;;  %v3116_v7 = vadd.f32 %v3114_v2, %v5400_v43 }
0x14c4   : > { %v3118_v8 = vsel %vm1706_vm4, %v3116_v7, -inf  ;;  %v3117_v9 = vadd.f32 %v3115_v47, %v5402_v46 }
0x14c5   : > { %3119 = vmax.xlane.f32.xlu0 %v3118_v8 }
0x14c6   : > { %v3121_v10 = vsel %vm1706_vm4, %v3117_v9, -inf }
0x14c9   : > { %3122 = vmax.xlane.f32.xlu0 %v3121_v10 }
0x154a   : > { %v2997_v3 = vpop.xlane.xlu0 %2996 }
0x154b   : > { %v3001_v51 = vsub.f32 %v2993_v63, %v2997_v3 }
0x154c   : > { %v3000_v13 = vpop.xlane.xlu1 %2999 }
0x154d   : > { %v3003_v15 = vmul.f32 1.442695, %v3001_v51  ;;  %v3002_v26 = vsub.f32 %v2994_v48, %v3000_v13 }
0x154f   : > { %4864 = vpow2.f32 %v3003_v15  ;;  %v3005_v16 = vmul.f32 1.442695, %v3002_v26 }
0x1551   : > { %4866 = vpow2.f32 %v3005_v16 }
0x1552   : > { %v3120_v18 = vpop.xlane.xlu0 %3119 }
0x1553   : > { %v3124_v19 = vsub.f32 %v3116_v7, %v3120_v18 }
0x1555   : > { %v3126_v20 = vmul.f32 1.442695, %v3124_v19 }
0x1556   : > { %v3123_v21 = vpop.xlane.xlu0 %3122 }
0x1557   : > { %4868 = vpow2.f32 %v3126_v20  ;;  %v3125_v29 = vsub.f32 %v3117_v9, %v3123_v21 }
0x1559   : > { %v4865_v11 = vpop.eup %4864  ;;  %v3128_v17 = vmul.f32 1.442695, %v3125_v29 }
0x155a   : > { %v3007_v31 = vsel %vm1706_vm4, %v4865_v11, 0.0 }
0x155b   : > { %v4867_v34 = vpop.eup %4866  ;;  %4870 = vpow2.f32 %v3128_v17  ;;  %3008 = vadd.xlane.f32.xlu0 %v3007_v31 }
0x155c   : > { %v3010_v14 = vsel %vm1706_vm4, %v4867_v34, 0.0 }
0x155f   : > { %3011 = vadd.xlane.f32.xlu0 %v3010_v14 }
0x1561   : > { %v4869_v35 = vpop.eup %4868 }
0x1562   : > { %v3130_v37 = vsel %vm1706_vm4, %v4869_v35, 0.0 }
0x1563   : > { %3131 = vadd.xlane.f32.xlu0 %v3130_v37 }
0x1565   : > { %v4871_v27 = vpop.eup %4870 }
0x1566   : > { %v3133_v62 = vsel %vm1706_vm4, %v4871_v27, 0.0 }
0x1567   : > { %3134 = vadd.xlane.f32.xlu1 %v3133_v62 }
0x1578   : > { %3292 = vrot.lane.b32.xlu1 %v5659_v24, %s5979_s10  ;;  %s4148_s10 = sshll.u32 %s5110_s30, 1 }
0x1579   : > { %3142 = vrot.lane.b32.xlu0 %v5661_v25, %s5976_s1  ;;  %s5982_s1 = smov 16   ;;  %p921_p9 = scmp.lt.s32.totalorder %s4148_s10, 3 }
0x157b   : > { %s5987_s10 = smov (!%p921_p9, %s4148_s10), 3 }
0x157c   : > { %3290 = vrot.lane.b32.xlu1 %v5659_v24, %s5980_s8  ;;  %s4149_s2 = sshll.u32 %s5987_s10, 3 }
0x15e8   : > { %v3009_v38 = vpop.xlane.xlu0 %3008 }
0x15e9   : > { %4872 = vrcp.f32 %v3009_v38 }
0x15ec   : > { %v3012_v39 = vpop.xlane.xlu0 %3011 }
0x15ed   : > { %4874 = vrcp.f32 %v3012_v39 }
0x15f0   : > { %v3132_v40 = vpop.xlane.xlu0 %3131 }
0x15f1   : > { %4876 = vrcp.f32 %v3132_v40 }
0x15f3   : > { %v4873_v41 = vpop.eup %4872 }
0x15f4   : > { %v3135_v6 = vpop.xlane.xlu1 %3134  ;;  %v3015_v23 = vmul.f32 %v4873_v41, %v4865_v11  ;;  %v3143_v50 = vpop.permute.xlu0 %3142 }
0x15f5   : > { %4878 = vrcp.f32 %v3135_v6 }
0x15f7   : > { %v4875_v44 = vpop.eup %4874 }
0x15f8   : > { %v3016_v45 = vmul.f32 %v4875_v44, %v4867_v34  ;;  %v3293_v1 = vpop.permute.xlu1 %3292 }
0x15f9   : > { %v3298_v47 = vsel %vm1706_vm4, %v3293_v1, 0 }
0x15fa   : > { %v3017_v33 = vpack.c.bf16 %v3016_v45, %v3015_v23 }
0x15fb   : > { %v4877_v53 = vpop.eup %4876 }
0x15fc   : > { %4577 = vmatmul.mubr.msk.bf16.vlgmr.msra.gmra.mrb[36].mxu1 %vm1706_vm4, %v3017_v33  ;;  %v3138_v56 = vmul.f32 %v4877_v53, %v4869_v35  ;;  %v3291_v5 = vpop.permute.xlu1 %3290 }
0x15fd   : > { %4587 = vmatpush3.bf16.msra.mxu1 %v3143_v50  ;;  %4588 = vmatprep.mubr.msk.bf16.mxu1 %vm4940_vm1, %v4939_v22 }
0x15fe   : > { %4598 = vmatprep.subr.bf16.mxu1 %v4939_v22 }
0x15ff   : > { %v4879_v55 = vpop.eup %4878 }
0x1600   : > { %v3139_v42 = vmul.f32 %v4879_v55, %v4871_v27 }
0x1602   : > { %v3140_v54 = vpack.c.bf16 %v3139_v42, %v3138_v56 }
0x1604   : > { %4589 = vmatmul.mubr.msk.bf16.vlgmr.msra.gmra.mrb[40].mxu1 %vm1706_vm4, %v3140_v54 }
0x1605   : > { %4600 = vmatprep.mubr.msk.bf16.mxu1 %vm4940_vm1, %v4939_v22  ;;  %4599 = vmatpush3.bf16.msra.mxu1 %v4762_v58 }
0x1606   : > { %4610 = vmatprep.subr.bf16.mxu1 %v4939_v22 }
0x16cf   : > { %v3055_v36 = vpop.f32.mrb[36].mxu1 }
0x16d0   : > { %v4578_v61 = vpop.f32.mrb[37].mxu1 }
0x16d1   : > { %v3058_v49 = vpop.f32.mrb[38].mxu1 }
0x16d2   : > { %v3062_v63 = vpack.c.bf16 %v3058_v49, %v3055_v36  ;;  %v4579_v52 = vpop.f32.mrb[39].mxu1 }
0x16d4   : > { %4601 = vmatmul.mubr.msk.bf16.vlgmr.msra.gmra.mrb[44].mxu1 %vm1706_vm4, %v3062_v63 }
0x16d5   : > { %4612 = vmatprep.mubr.msk.bf16.mxu1 %vm4940_vm1, %v4939_v22 }
0x16d7   : > { %v3182_v48 = vpop.f32.mrb[40].mxu1 }
0x16d8   : > { %v4590_v0 = vpop.f32.mrb[41].mxu1 }
0x16d9   : > { %v3185_v2 = vpop.f32.mrb[42].mxu1 }
0x16da   : > { %v3189_v32 = vpack.c.bf16 %v3185_v2, %v3182_v48  ;;  %v4591_v4 = vpop.f32.mrb[43].mxu1 }
0x16dc   : > { %4595 = vmatmul.mubr.msk.bf16.vlgmr.msra.gmra.mrb[52].mxu0 %vm1706_vm4, %v3189_v32 }
0x16dd   : > { %4605 = vmatpush3.bf16.xpose.msra.mxu0 %v3298_v47  ;;  %4606 = vmatprep.mubr.msk.bf16.mxu0 %vm4940_vm1, %v4939_v22 }
0x16de   : > { %4616 = vmatprep.subr.bf16.mxu0 %v4939_v22 }
0x16e4   : > { %4607 = vmatmul.mubr.msk.bf16.vlgmr.msra.gmra.mrb[56].mxu0 %vm1706_vm4, %v3291_v5 }
0x16e5   : > { %4618 = vmatprep.mubr.msk.bf16.mxu0 %vm4940_vm1, %v4939_v22  ;;  %4617 = vmatpush3.bf16.msra.mxu0 %v4764_v60 }
0x16e6   : > { %4628 = vmatprep.subr.bf16.mxu0 %v4939_v22 }
0x17a7   : > { %v3283_v7 = vpop.f32.mrb[44].mxu1 }
0x17a8   : > { %v4602_v8 = vpop.f32.mrb[45].mxu1 }
0x17a9   : > { %v3286_v9 = vpop.f32.mrb[46].mxu1 }
0x17aa   : > { %v4603_v10 = vpop.f32.mrb[47].mxu1 }
0x17af   : > { %v3233_v3 = vpop.f32.mrb[52].mxu0 }
0x17b0   : > { %v5726_v51 = vadd.f32 %v3283_v7, %v3233_v3  ;;  %v4596_v13 = vpop.f32.mrb[53].mxu0 }
0x17b1   : > { %v3236_v15 = vpop.f32.mrb[54].mxu0 }
0x17b2   : > { %v5728_v26 = vadd.f32 %v3286_v9, %v3236_v15  ;;  %v4597_v16 = vpop.f32.mrb[55].mxu0 }
0x17b7   : > { %v3334_v18 = vpop.f32.mrb[56].mxu0 }
0x17b8   : > { %v3341_v19 = vmul.f32 0.25, %v3334_v18  ;;  %v4608_v20 = vpop.f32.mrb[57].mxu0 }
0x17b9   : > { %v3337_v21 = vpop.f32.mrb[58].mxu0 }
0x17ba   : > { %v3342_v29 = vmul.f32 0.25, %v3337_v21  ;;  %v4609_v11 = vpop.f32.mrb[59].mxu0  ;;  %v3343_v17 = vadd.f32 %v3341_v19, %v5400_v43 }
0x17bc   : > { %v3345_v31 = vsel %vm1706_vm4, %v3343_v17, -inf  ;;  %v3344_v34 = vadd.f32 %v3342_v29, %v5402_v46 }
0x17bd   : > { %3346 = vmax.xlane.f32.xlu0 %v3345_v31 }
0x17be   : > { %v3348_v14 = vsel %vm1706_vm4, %v3344_v34, -inf }
0x17bf   : > { %3349 = vmax.xlane.f32.xlu1 %v3348_v14 }
0x17d0   : > { %3368 = vrot.lane.b32.xlu1 %v5661_v25, %s5980_s8 }
0x17d4   : > { %3468 = vrot.lane.b32.xlu1 %v5659_v24, %s5981_s7 }
0x184a   : > { %v3347_v35 = vpop.xlane.xlu0 %3346 }
0x184b   : > { %v3351_v37 = vsub.f32 %v3343_v17, %v3347_v35 }
0x184c   : > { %v3350_v27 = vpop.xlane.xlu1 %3349 }
0x184d   : > { %v3353_v62 = vmul.f32 1.442695, %v3351_v37  ;;  %v3352_v38 = vsub.f32 %v3344_v34, %v3350_v27 }
0x184f   : > { %4880 = vpow2.f32 %v3353_v62  ;;  %v3355_v39 = vmul.f32 1.442695, %v3352_v38 }
0x1850   : > { %v3369_v40 = vpop.permute.xlu1 %3368 }
0x1851   : > { %4882 = vpow2.f32 %v3355_v39  ;;  %4611 = vmatpush3.bf16.msra.mxu1 %v3369_v40 }
0x1852   : > { %4622 = vmatprep.subr.bf16.mxu1 %v4939_v22 }
0x1859   : > { %v4881_v6 = vpop.eup %4880 }
0x185a   : > { %v3357_v41 = vsel %vm1706_vm4, %v4881_v6, 0.0 }
0x185b   : > { %v4883_v44 = vpop.eup %4882  ;;  %3358 = vadd.xlane.f32.xlu0 %v3357_v41 }
0x185c   : > { %v3360_v23 = vsel %vm1706_vm4, %v4883_v44, 0.0 }
0x185f   : > { %3361 = vadd.xlane.f32.xlu0 %v3360_v23 }
0x1875   : > { %3470 = vrot.lane.b32.xlu0 %v5659_v24, %s5982_s1  ;;  %v3469_v24 = vpop.permute.xlu1 %3468  ;;  %s924_s1 = scalar_lea.vmem %s5934_s28, %s4149_s2 }
0x18e8   : > { %v3359_v45 = vpop.xlane.xlu0 %3358 }
0x18e9   : > { %4884 = vrcp.f32 %v3359_v45  ;;  %v4272_v45 = vld [vmem:[%s5925_s19 + $0x1] ss:$0 sm:$0xff] }
0x18ec   : > { %v3362_v33 = vpop.xlane.xlu0 %3361 }
0x18ed   : > { %4886 = vrcp.f32 %v3362_v33 }
0x18f0   : > { %v3471_v42 = vpop.permute.xlu0 %3470 }
0x18f1   : > { %v3476_v58 = vsel %vm1706_vm4, %v3471_v42, 0 }
0x18f3   : > { %v4885_v50 = vpop.eup %4884 }
0x18f4   : > { %v3365_v55 = vmul.f32 %v4885_v50, %v4881_v6 }
0x18f7   : > { %v4887_v53 = vpop.eup %4886 }
0x18f8   : > { %v3366_v56 = vmul.f32 %v4887_v53, %v4883_v44 }
0x18fa   : > { %v3367_v54 = vpack.c.bf16 %v3366_v56, %v3365_v55 }
0x18fc   : > { %4613 = vmatmul.mubr.msk.bf16.vlgmr.msra.gmra.mrb[48].mxu1 %vm1706_vm4, %v3367_v54 }
0x18fd   : > { %4623 = vmatpush3.bf16.xpose.msra.mxu1 %v3476_v58  ;;  %4624 = vmatprep.mubr.msk.bf16.mxu1 %vm4940_vm1, %v4939_v22 }
0x18fe   : > { %4634 = vmatprep.subr.bf16.mxu1 %v4939_v22 }
0x1904   : > { %4625 = vmatmul.mubr.msk.bf16.vlgmr.msra.gmra.mrb[52].mxu1 %vm1706_vm4, %v3469_v24 }
0x1905   : > { %4636 = vmatprep.mubr.msk.bf16.mxu1 %vm4940_vm1, %v4939_v22 }
0x19cf   : > { %v3408_v36 = vpop.f32.mrb[48].mxu1 }
0x19d0   : > { %v4614_v61 = vpop.f32.mrb[49].mxu1 }
0x19d1   : > { %v3411_v49 = vpop.f32.mrb[50].mxu1 }
0x19d2   : > { %v3415_v63 = vpack.c.bf16 %v3411_v49, %v3408_v36  ;;  %v4615_v52 = vpop.f32.mrb[51].mxu1 }
0x19d4   : > { %4619 = vmatmul.mubr.msk.bf16.vlgmr.msra.gmra.mrb[60].mxu0 %vm1706_vm4, %v3415_v63 }
0x19d5   : > { %4630 = vmatprep.mubr.msk.bf16.mxu0 %vm4940_vm1, %v4939_v22 }
0x19d7   : > { %v3512_v48 = vpop.f32.mrb[52].mxu1 }
0x19d8   : > { %v3519_v0 = vmul.f32 0.25, %v3512_v48  ;;  %v4626_v1 = vpop.f32.mrb[53].mxu1 }
0x19d9   : > { %v3515_v2 = vpop.f32.mrb[54].mxu1  ;;  %v4766_v1 = vld [vmem:[%s5928_s22 + $0x40] ss:$8 sps:$4 sm:$0xff]  }
0x19da   : > { %v3520_v32 = vmul.f32 0.25, %v3515_v2  ;;  %v4627_v4 = vpop.f32.mrb[55].mxu1  ;;  %v3521_v47 = vadd.f32 %v3519_v0, %v5400_v43  ;;  %v4768_v0 = vld [vmem:[%s5928_s22 + $0x44] ss:$8 sps:$4 sm:$0xff]   ;;  %v4771_v2 = vld [vmem:[%s5928_s22 + $0x54] ss:$8 sps:$4 sm:$0xff]  }
0x19db   : > { %v4774_v4 = vld [vmem:[%s5928_s22 + $0x64] ss:$8 sps:$4 sm:$0xff]  }
0x19dc   : > { %v3523_v5 = vsel %vm1706_vm4, %v3521_v47, -inf  ;;  %v3522_v7 = vadd.f32 %v3520_v32, %v5402_v46  ;;  %v4765_v46 = vld [vmem:[%s5924_s18 + $0x38] sm:$0xff]  }
0x19dd   : > { %3524 = vmax.xlane.f32.xlu1 %v3523_v5  ;;  %4635 = vmatpush3.bf16.msra.mxu1 %v4765_v46  ;;  %v4769_v32 = vld [vmem:[%s5928_s22 + $0x50] ss:$8 sps:$4 sm:$0xff]  }
0x19de   : > { %v3526_v8 = vsel %vm1706_vm4, %v3522_v7, -inf  ;;  %v4775_v5 = vld [vmem:[%s5928_s22 + $0x70] ss:$8 sps:$4 sm:$0xff]  }
0x19df   : > { %3527 = vmax.xlane.f32.xlu0 %v3526_v8 }
0x1a6a   : > { %v3525_v9 = vpop.xlane.xlu1 %3524 }
0x1a6b   : > { %v3529_v10 = vsub.f32 %v3521_v47, %v3525_v9  ;;  %v4772_v47 = vld [vmem:[%s5928_s22 + $0x60] ss:$8 sps:$4 sm:$0xff]  }
0x1a6c   : > { %v3528_v3 = vpop.xlane.xlu0 %3527 }
0x1a6d   : > { %v3531_v22 = vmul.f32 1.442695, %v3529_v10  ;;  %v3530_v13 = vsub.f32 %v3522_v7, %v3528_v3  ;;  %v4777_v7 = vld [vmem:[%s5928_s22 + $0x74] ss:$8 sps:$4 sm:$0xff]  }
0x1a6f   : > { %4888 = vpow2.f32 %v3531_v22  ;;  %v3533_v15 = vmul.f32 1.442695, %v3530_v13 }
0x1a71   : > { %4890 = vpow2.f32 %v3533_v15 }
0x1a79   : > { %v4889_v16 = vpop.eup %4888 }
0x1a7a   : > { %v3535_v18 = vsel %vm1706_vm4, %v4889_v16, 0.0 }
0x1a7b   : > { %v4891_v43 = vpop.eup %4890  ;;  %3536 = vadd.xlane.f32.xlu0 %v3535_v18  ;;  %v4273_v18 = vld [vmem:[%s5926_s20 + $0x1] ss:$0 sm:$0xff] }
0x1a7c   : > { %v3538_v19 = vsel %vm1706_vm4, %v4891_v43, 0.0 }
0x1a7d   : > { %3539 = vadd.xlane.f32.xlu1 %v3538_v19 }
0x1a91   : > { %3546 = vrot.lane.b32.xlu0 %v5661_v25, %s5981_s7 }
0x1aa7   : > { %v3459_v20 = vpop.f32.mrb[60].mxu0 }
0x1aa8   : > { %v3466_v21 = vadd.f32 %v3459_v20, %v5726_v51  ;;  %v4620_v29 = vpop.f32.mrb[61].mxu0  ;;  %v4274_v20 = vld [vmem:[%s5927_s21 + $0x1] ss:$0 sm:$0xff] }
0x1aa9   : > { %v3462_v11 = vpop.f32.mrb[62].mxu0 }
0x1aaa   : > { %v3467_v17 = vadd.f32 %v3462_v11, %v5728_v26  ;;  %v4621_v31 = vpop.f32.mrb[63].mxu0 }
0x1aab   : > { %v4778_v31 = vld [vmem:[%s5930_s24 + $0xc0] sm:$0xff]  }
0x1aac   : > { %4434 = vmatprep.subr.bf16.mxu1 %v4778_v31 }
0x1b08   : > { %v3537_v34 = vpop.xlane.xlu0 %3536 }
0x1b09   : > { %4892 = vrcp.f32 %v3537_v34  ;;  %v4779_v34 = vld [vmem:[%s5930_s24 + $0x80] sm:$0xff]  }
0x1b0a   : > { %v3540_v14 = vpop.xlane.xlu1 %3539 }
0x1b0b   : > { %4894 = vrcp.f32 %v3540_v14  ;;  %v4780_v14 = vld [vmem:[%s5930_s24 + $0xc8] sm:$0xff]  }
0x1b0c   : > { %v3547_v35 = vpop.permute.xlu0 %3546 }
0x1b0d   : > { %4629 = vmatpush3.bf16.msra.mxu0 %v3547_v35  ;;  %v4781_v35 = vld [vmem:[%s5930_s24 + $0x88] sm:$0xff]  }
0x1b0e   : > { %3761 = vmatprep.subr.bf16.mxu0 %v4768_v0 }
0x1b13   : > { %v4893_v25 = vpop.eup %4892 }
0x1b14   : > { %v3543_v27 = vmul.f32 %v4893_v25, %v4889_v16  ;;  %v4782_v25 = vld [vmem:[%s5930_s24 + $0xd0] sm:$0xff]  }
0x1b15   : > { %v4895_v37 = vpop.eup %4894 }
0x1b16   : > { %v3544_v62 = vmul.f32 %v4895_v37, %v4891_v43  ;;  %v4783_v37 = vld [vmem:[%s5930_s24 + $0x90] sm:$0xff]  }
0x1b18   : > { %v3545_v38 = vpack.c.bf16 %v3544_v62, %v3543_v27  ;;  %v4784_v27 = vld [vmem:[%s5930_s24 + $0xd8] sm:$0xff]  }
0x1b19   : > { %v4785_v62 = vld [vmem:[%s5930_s24 + $0x98] sm:$0xff]  }
0x1b1a   : > { %4631 = vmatmul.mubr.msk.bf16.vlgmr.msra.gmra.mrb[64].mxu0 %vm1706_vm4, %v3545_v38  ;;  %v4786_v38 = vld [vmem:[%s5930_s24 + $0xe0] sm:$0xff]  }
0x1b1b   : > { %3793 = vmatprep.mubr.bf16.mxu0 %v4938_v12  ;;  %3762 = vmatpush1.bf16.msra.mxu0 %v4766_v1 }
0x1b1c   : > { %3763 = vmatprep.subr.bf16.mxu0 %v4771_v2 }
0x1b1f   : > { %3764 = vmatpush1.bf16.msra.mxu0 %v4769_v32 }
0x1b20   : > { %3765 = vmatprep.subr.bf16.mxu0 %v4774_v4 }
0x1b23   : > { %3766 = vmatpush1.bf16.msra.mxu0 %v4772_v47 }
0x1b24   : > { %3767 = vmatprep.subr.bf16.mxu0 %v4777_v7 }
0x1b27   : > { %3768 = vmatpush1.bf16.msra.mxu0 %v4775_v5 }
0x1bed   : > { %v3586_v51 = vpop.f32.mrb[64].mxu0 }
0x1bee   : > { %v4632_v39 = vpop.f32.mrb[65].mxu0 }
0x1bef   : > { %v3589_v40 = vpop.f32.mrb[66].mxu0  ;;  %v4788_v39 = vld [vmem:[%s5930_s24 + $0xe8] sm:$0xff]  }
0x1bf0   : > { %v3593_v26 = vpack.c.bf16 %v3589_v40, %v3586_v51  ;;  %v4633_v6 = vpop.f32.mrb[67].mxu0  ;;  %v4787_v51 = vld [vmem:[%s5930_s24 + $0xa0] sm:$0xff]   ;;  %v4789_v40 = vld [vmem:[%s5930_s24 + $0xa8] sm:$0xff]  }
0x1bf1   : > { %v4791_v6 = vld [vmem:[%s5930_s24 + $0xb0] sm:$0xff]  }
0x1bf2   : > { %4637 = vmatmul.mubr.msk.bf16.vlgmr.msra.gmra.mrb[56].mxu1 %vm1706_vm4, %v3593_v26  ;;  %v4790_v26 = vld [vmem:[%s5930_s24 + $0xf0] sm:$0xff]  }
0x1bf3   : > { %4435 = vmatpush3.bf16.msra.mxu1 %v4779_v34 }
0x1bf4   : > { %4436 = vmatprep.subr.bf16.mxu1 %v4780_v14 }
0x1bf7   : > { %4437 = vmatpush3.bf16.msra.mxu1 %v4781_v35 }
0x1bf8   : > { %4438 = vmatprep.subr.bf16.mxu1 %v4782_v25  ;;  %v4325_v25 = vld [vmem:[%s5931_s25 + $0x1] ss:$0 sm:$0xff] }
0x1bfb   : > { %4439 = vmatpush3.bf16.msra.mxu1 %v4783_v37 }
0x1bfc   : > { %4440 = vmatprep.subr.bf16.mxu1 %v4784_v27 }
0x1bff   : > { %4441 = vmatpush3.bf16.msra.mxu1 %v4785_v62 }
0x1c00   : > { %4442 = vmatprep.subr.bf16.mxu1 %v4786_v38 }
0x1c03   : > { %4443 = vmatpush3.bf16.msra.mxu1 %v4787_v51 }
0x1c04   : > { %4444 = vmatprep.subr.bf16.mxu1 %v4788_v39 }
0x1c07   : > { %4445 = vmatpush3.bf16.msra.mxu1 %v4789_v40 }
0x1c08   : > { %4446 = vmatprep.subr.bf16.mxu1 %v4790_v26 }
0x1c0b   : > { %4447 = vmatpush3.bf16.msra.mxu1 %v4791_v6 }
0x1cc5   : > { %v3637_v41 = vpop.f32.mrb[56].mxu1 }
0x1cc6   : > { %v3644_v44 = vadd.f32 %v3637_v41, %v3466_v21  ;;  %v4638_v23 = vpop.f32.mrb[57].mxu1  ;;  %v4792_v41 = vld [vmem:[%s5930_s24 + $0xf8] sm:$0xff]  }
0x1cc7   : > { %v3640_v33 = vpop.f32.mrb[58].mxu1  ;;  %4448 = vmatprep.subr.bf16.mxu1 %v4792_v41  ;;  %v4283_v23 = vld [vmem:[%s5929_s23 + $0x1] ss:$2 sm:$0x3] }
0x1cc8   : > { %v3646_v50 = vadd.f32 %v3644_v44, %v5607_v57  ;;  %v3645_v53 = vadd.f32 %v3640_v33, %v3467_v17  ;;  %v4639_v55 = vpop.f32.mrb[59].mxu1  ;;  %v4793_v44 = vld [vmem:[%s5930_s24 + $0xb8] sm:$0xff]   ;;  %v3715_v33 = vrot.slane %v4283_v23, %v5172_v28 }
0x1cc9   : > { %4449 = vmatpush3.bf16.msra.mxu1 %v4793_v44 }
0x1cca   : > { %v5778_v12 = vadd.f32 %v4272_v45, %v3646_v50  ;;  %v3647_v56 = vadd.f32 %v3645_v53, %v5612_v59 }
0x1ccc   : > { %v5781_v42 = vadd.f32 %v4272_v45, %v3647_v56  ;;  %v3657_v54 = vsel %vm1546_vm3, %v5778_v12, 0.0  ;;  %v3711_v45 = vrot.slane %v4283_v23, %v5175_v30 }
0x1ccd   : > { %3658 = vadd.xlane.f32.xlu1 %v3657_v54 }
0x1cce   : > { %v3660_v58 = vsel %vm1546_vm3, %v5781_v42, 0.0 }
0x1cd1   : > { %3661 = vadd.xlane.f32.xlu1 %v3660_v58 }
0x1d5a   : > { %v3659_v24 = vpop.xlane.xlu1 %3658 }
0x1d5b   : > { %v3663_v60 = vmul.f32 0.015625, %v3659_v24 }
0x1d5d   : > { %v3665_v57 = vsub.f32 %v5778_v12, %v3663_v60 }
0x1d5e   : > { %v3662_v36 = vpop.xlane.xlu1 %3661 }
0x1d5f   : > { %v3664_v61 = vmul.f32 0.015625, %v3662_v36  ;;  %v3667_v49 = vmul.f32 %v3665_v57, %v3665_v57 }
0x1d61   : > { %v3666_v63 = vsub.f32 %v5781_v42, %v3664_v61  ;;  %v3669_v59 = vsel %vm1546_vm3, %v3667_v49, 0.0 }
0x1d62   : > { %3670 = vadd.xlane.f32.xlu1 %v3669_v59 }
0x1d63   : > { %v3668_v52 = vmul.f32 %v3666_v63, %v3666_v63 }
0x1d65   : > { %v3672_v48 = vsel %vm1546_vm3, %v3668_v52, 0.0 }
0x1d66   : > { %3673 = vadd.xlane.f32.xlu1 %v3672_v48 }
0x1def   : > { %v3671_v8 = vpop.xlane.xlu1 %3670 }
0x1df0   : > { %v3675_v9 = vmul.f32 0.015625, %v3671_v8 }
0x1df2   : > { %v3677_v10 = vadd.f32 1e-05, %v3675_v9 }
0x1df3   : > { %v3674_v3 = vpop.xlane.xlu1 %3673 }
0x1df4   : > { %4896 = vrsqrt.f32 %v3677_v10  ;;  %v3676_v22 = vmul.f32 0.015625, %v3674_v3 }
0x1df6   : > { %v3678_v13 = vadd.f32 1e-05, %v3676_v22 }
0x1df8   : > { %4898 = vrsqrt.f32 %v3678_v13 }
0x1dfe   : > { %v4897_v15 = vpop.eup %4896 }
0x1dff   : > { %v3681_v16 = vmul.f32 %v4897_v15, %v3665_v57 }
0x1e01   : > { %v3687_v19 = vmul.f32 %v4273_v18, %v3681_v16 }
0x1e02   : > { %v4899_v43 = vpop.eup %4898 }
0x1e03   : > { %v3682_v46 = vmul.f32 %v4899_v43, %v3666_v63  ;;  %v3693_v29 = vadd.f32 %v4274_v20, %v3687_v19 }
0x1e05   : > { %v3688_v21 = vmul.f32 %v4273_v18, %v3682_v46 }
0x1e07   : > { %v3694_v11 = vadd.f32 %v4274_v20, %v3688_v21 }
0x1e09   : > { %v3695_v17 = vpack.c.bf16 %v3694_v11, %v3693_v29 }
0x1e0b   : > { %4292 = vmatmul.mubr.msk.bf16.vlgmr.msra.gmra.mrb[68].mxu0 %vm1546_vm3, %v3695_v17 }
0x1ede   : > { %v3795_v50 = vpop.f32.mrb[68].mxu0 }
0x1edf   : > { %v3796_v53 = vadd.f32 %v3795_v50, %v3711_v45  ;;  %v3797_v55 = vpop.f32.mrb[69].mxu0 }
0x1ee0   : > { %v3798_v56 = vadd.f32 %v3797_v55, %v3715_v33  ;;  %v3799_v54 = vpop.f32.mrb[70].mxu0 }
0x1ee1   : > { %v3808_v58 = vmul.f32 0.044715, %v3796_v53  ;;  %v3800_v24 = vadd.f32 %v3799_v54, %v3711_v45  ;;  %v3801_v60 = vpop.f32.mrb[71].mxu0  ;;  %v3804_v18 = vmul.f32 0.5, %v3796_v53 }
0x1ee2   : > { %v3809_v57 = vmul.f32 0.044715, %v3798_v56  ;;  %v3802_v36 = vadd.f32 %v3801_v60, %v3715_v33  ;;  %v3805_v46 = vmul.f32 0.5, %v3798_v56 }
0x1ee3   : > { %v3812_v61 = vmul.f32 %v3808_v58, %v3796_v53  ;;  %v3810_v49 = vmul.f32 0.044715, %v3800_v24  ;;  %v3806_v43 = vmul.f32 0.5, %v3800_v24 }
0x1ee4   : > { %v3813_v63 = vmul.f32 %v3809_v57, %v3798_v56  ;;  %v3811_v59 = vmul.f32 0.044715, %v3802_v36  ;;  %v3807_v20 = vmul.f32 0.5, %v3802_v36 }
0x1ee5   : > { %v3816_v52 = vmul.f32 %v3812_v61, %v3796_v53  ;;  %v3814_v48 = vmul.f32 %v3810_v49, %v3800_v24 }
0x1ee6   : > { %v3817_v0 = vmul.f32 %v3813_v63, %v3798_v56  ;;  %v3815_v30 = vmul.f32 %v3811_v59, %v3802_v36  ;;  %v4342_v63 = vld [vmem:[%s5932_s26] ss:$0 sm:$0xff] }
0x1ee7   : > { %v3820_v1 = vadd.f32 %v3816_v52, %v3796_v53  ;;  %v3818_v28 = vmul.f32 %v3814_v48, %v3800_v24  ;;  %v4343_v52 = vld [vmem:[%s5933_s27] ss:$0 sm:$0xff] }
0x1ee8   : > { %v3819_v2 = vmul.f32 %v3815_v30, %v3802_v36  ;;  %v3821_v32 = vadd.f32 %v3817_v0, %v3798_v56 }
0x1ee9   : > { %v3824_v4 = vmul.f32 0.7978846, %v3820_v1  ;;  %v3822_v47 = vadd.f32 %v3818_v28, %v3800_v24 }
0x1eea   : > { %v3823_v5 = vadd.f32 %v3819_v2, %v3802_v36  ;;  %v3825_v7 = vmul.f32 0.7978846, %v3821_v32 }
0x1eeb   : > { %4900 = vtanh.f32 %v3824_v4  ;;  %v3826_v8 = vmul.f32 0.7978846, %v3822_v47 }
0x1eec   : > { %v3827_v9 = vmul.f32 0.7978846, %v3823_v5  ;;  %4902 = vtanh.f32 %v3825_v7 }
0x1eed   : > { %4904 = vtanh.f32 %v3826_v8 }
0x1eee   : > { %4906 = vtanh.f32 %v3827_v9 }
0x1ef5   : > { %v4901_v10 = vpop.eup %4900 }
0x1ef6   : > { %v4903_v3 = vpop.eup %4902  ;;  %v3832_v22 = vadd.f32 1.0, %v4901_v10 }
0x1ef7   : > { %v4905_v13 = vpop.eup %4904  ;;  %v3833_v15 = vadd.f32 1.0, %v4903_v3 }
0x1ef8   : > { %v4907_v16 = vpop.eup %4906  ;;  %v3834_v19 = vadd.f32 1.0, %v4905_v13  ;;  %v3836_v29 = vmul.f32 %v3832_v22, %v3804_v18 }
0x1ef9   : > { %v3835_v21 = vadd.f32 1.0, %v4907_v16  ;;  %v3837_v17 = vmul.f32 %v3833_v15, %v3805_v46 }
0x1efa   : > { %v3838_v11 = vmul.f32 %v3834_v19, %v3806_v43 }
0x1efb   : > { %v3839_v31 = vmul.f32 %v3835_v21, %v3807_v20 }
0x1efc   : > { %v3840_v34 = vpack.c.bf16 %v3838_v11, %v3836_v29 }
0x1efd   : > { %v3841_v14 = vpack.c.bf16 %v3839_v31, %v3837_v17 }
0x1eff   : > { %4008 = vmatprep.mubr.bf16.mxu1 %v3841_v14 }
0x1f00   : > { %4009 = vmatmul.mubr.bf16.vlgmr.msra.gmra.mrb[60].mxu1 %v3840_v34 }
0x1fd3   : > { %v4450_v35 = vpop.f32.mrb[60].mxu1 }
0x1fd4   : > { %v4451_v37 = vpop.f32.mrb[61].mxu1 }
0x1fd5   : > { %v4452_v27 = vadd.f32 %v4451_v37, %v4450_v35  ;;  %v4453_v62 = vpop.f32.mrb[62].mxu1 }
0x1fd6   : > { %v4454_v38 = vpop.f32.mrb[63].mxu1 }
0x1fd7   : > { %v4011_v51 = vadd.f32 %v4452_v27, %v4325_v25  ;;  %v4455_v39 = vadd.f32 %v4454_v38, %v4453_v62 }
0x1fd9   : > { %v4014_v40 = vadd.f32 %v4455_v39, %v4325_v25  ;;  %v4017_v26 = vadd.f32 %v4011_v51, %v5778_v12 }
0x1fdb   : > { %v4021_v6 = vsel %vm1546_vm3, %v4017_v26, 0.0  ;;  %v4018_v41 = vadd.f32 %v4014_v40, %v5781_v42 }
0x1fdc   : > { %4022 = vadd.xlane.f32.xlu1 %v4021_v6 }
0x1fdd   : > { %v4024_v44 = vsel %vm1546_vm3, %v4018_v41, 0.0 }
0x1fde   : > { %4025 = vadd.xlane.f32.xlu0 %v4024_v44 }
0x2069   : > { %v4023_v23 = vpop.xlane.xlu1 %4022 }
0x206a   : > { %v4027_v45 = vmul.f32 0.015625, %v4023_v23 }
0x206b   : > { %v4026_v33 = vpop.xlane.xlu0 %4025 }
0x206c   : > { %v4029_v50 = vsub.f32 %v4017_v26, %v4027_v45  ;;  %v4028_v53 = vmul.f32 0.015625, %v4026_v33 }
0x206e   : > { %v4030_v55 = vsub.f32 %v4018_v41, %v4028_v53  ;;  %v4031_v56 = vmul.f32 %v4029_v50, %v4029_v50 }
0x2070   : > { %v4033_v54 = vsel %vm1546_vm3, %v4031_v56, 0.0  ;;  %v4032_v58 = vmul.f32 %v4030_v55, %v4030_v55 }
0x2071   : > { %4034 = vadd.xlane.f32.xlu1 %v4033_v54 }
0x2072   : > { %v4036_v12 = vsel %vm1546_vm3, %v4032_v58, 0.0 }
0x2075   : > { %4037 = vadd.xlane.f32.xlu1 %v4036_v12 }
0x20fe   : > { %v4035_v42 = vpop.xlane.xlu1 %4034 }
0x20ff   : > { %v4039_v24 = vmul.f32 0.015625, %v4035_v42 }
0x2101   : > { %v4041_v60 = vadd.f32 1e-06, %v4039_v24 }
0x2102   : > { %v4038_v57 = vpop.xlane.xlu1 %4037 }
0x2103   : > { %4908 = vrsqrt.f32 %v4041_v60  ;;  %v4040_v36 = vmul.f32 0.015625, %v4038_v57 }
0x2105   : > { %v4042_v61 = vadd.f32 1e-06, %v4040_v36 }
0x2107   : > { %4910 = vrsqrt.f32 %v4042_v61 }
0x210d   : > { %v4909_v49 = vpop.eup %4908 }
0x210e   : > { %v4045_v59 = vmul.f32 %v4909_v49, %v4029_v50 }
0x2110   : > { %v4053_v48 = vmul.f32 %v4342_v63, %v4045_v59 }
0x2111   : > { %v4911_v0 = vpop.eup %4910 }
0x2112   : > { %v4061_v30 = vadd.f32 %v4343_v52, %v4053_v48  ;;  %v4046_v1 = vmul.f32 %v4911_v0, %v4030_v55 }
0x2114   : > { %4063 = vst.msk [vmem:[%s924_s1] sm:$0xff] %vm1546_vm3, %v4061_v30  ;;  %v4054_v28 = vmul.f32 %v4342_v63, %v4046_v1 }
0x2116   : > { %v4062_v2 = vadd.f32 %v4343_v52, %v4054_v28 }
0x2118   : > { %4064 = vst.msk [vmem:[%s924_s1 + $0x8] sm:$0xff] %vm1546_vm3, %v4062_v2 }
0x2119 PF: > { %p35_p10 = scmp.ge.s32.totalorder %s5113_s3, 4   ;;  %s5983_s8 = smov %s4930_s5 }
0x211a   : > { %s5984_s5 = smov %s5122_s0  ;;  %s5985_s9 = smov %s5113_s3 }
0x211b   :  { %37 = sbr.rel (!%p35_p10) target bundleno = 16 (0x10), region = 214 }

</bundles_post_ra>
